<compile_context>
chip_gen: v7x
topology: tpu7x:2x2x1
jax: 0.10.0
libtpu: 0.0.40
codegen_flags: <defaults>
</compile_context>

<pallas_src>
import math

import jax
import jax.numpy as jnp
from jax import lax
from jax.experimental import pallas as pl
from jax.experimental.pallas import tpu as pltpu

# ---------------- small config consistent with the module ----------------
SPECTRA_LEN = 80          # spectra_length (must be divisible by patch_size)
PATCH = 10                # patch_size
HIDDEN = 32               # hidden_dim
MLP_DIM = 40              # mlp_dim
NUM_LAYERS = 2            # num_layers
NUM_HEADS = 4             # num_heads
NUM_OUTPUT = 1            # num_output
BATCH = 2

S0 = SPECTRA_LEN // PATCH          # 8 patch tokens per spectrum
SEQ = S0 + 1                       # 9 real tokens (global + patches)
SEQ_PAD = 16                       # padded per-sequence length (sublane-aligned slabs)
TOK_PAD = BATCH * SEQ_PAD          # 32 flat padded tokens (batch folded into M)
HEAD_DIM = HIDDEN // NUM_HEADS     # 8
HTOK = NUM_HEADS * TOK_PAD         # 128 head-stacked flat tokens
EPS = 1e-6
_INV_SQRT2 = 1.0 / math.sqrt(2.0)
_SCALE = 1.0 / math.sqrt(HEAD_DIM)

# Numerics switches: True == bit-closer parity with PyTorch (work moves EUP -> VPU, slower).
EXACT_GELU = False          # exact erf GELU vs tanh approximation (~1e-3 rel. deviation)
EXACT_SOFTMAX_DIV = False   # exact divide vs pl.reciprocal(approx=True) (~1e-3 rel. deviation)


def _layernorm(v, w, b):
    mu = jnp.mean(v, axis=-1, keepdims=True)
    var = jnp.mean((v - mu) ** 2, axis=-1, keepdims=True)
    return (v - mu) * lax.rsqrt(var + EPS) * w + b


def _gelu(v):
    if EXACT_GELU:
        return 0.5 * v * (1.0 + lax.erf(v * _INV_SQRT2))
    # tanh approximation -> EUP slot (the VPU is the only plausibly busy slot here)
    return 0.5 * v * (1.0 + jnp.tanh(0.7978845608028654 * (v + 0.044715 * v * v * v)))


# ---------------------------------------------------------------------------
# Fused forward kernel: patch embed + NUM_LAYERS encoder blocks + final LN + head
# ---------------------------------------------------------------------------
def fused_kernel(xp_ref, wp_ref, base_ref, mask_ref,
                 ln1w_ref, ln1b_ref, wqkv_ref, bqkv_ref, wo_ref, bo_ref,
                 ln2w_ref, ln2b_ref, w1_ref, b1_ref, w2_ref, b2_ref,
                 lnfw_ref, lnfb_ref, hw_ref, hb_ref,
                 out_ref, qkvs_ref):
    # ---- patch embedding + token assembly (no in-kernel scatter / unaligned stores) ----
    # xp rows are pre-padded: patch rows carry spectra patches, global/pad rows are zero, so one
    # (TOK_PAD, P)@(P, H) dot plus the precomputed 'base' slab (conv bias + sinusoidal pos +
    # encoder pos; zeros on pad rows) assembles every token.
    x = jnp.dot(xp_ref[...], wp_ref[...], preferred_element_type=jnp.float32) + base_ref[...]

    # additive bias over head-stacked tokens: 0 iff same head & same sequence & valid key
    mask = mask_ref[...]                                              # (HTOK, HTOK)

    # ---- NUM_LAYERS pre-LN encoder blocks, statically unrolled ----
    for li in range(NUM_LAYERS):
        # ---------- multi-head self-attention, heads folded into the sublane axis ----------
        h1 = _layernorm(x, ln1w_ref[li], ln1b_ref[li])
        # fused QKV projection; columns head-interleaved [q_h | k_h | v_h], q columns carry the
        # folded 1/sqrt(HEAD_DIM) scale.
        qkv = jnp.dot(h1, wqkv_ref[li], preferred_element_type=jnp.float32) + bqkv_ref[li]
        # stack head h at 8-aligned sublane offset h*TOK_PAD -> (HTOK, 3*HEAD_DIM) slab
        for h in range(NUM_HEADS):
            qkvs_ref[h * TOK_PAD:(h + 1) * TOK_PAD, :] = \
                qkv[:, h * 3 * HEAD_DIM:(h + 1) * 3 * HEAD_DIM]
        qkvs = qkvs_ref[...]
        qs = qkvs[:, 0:HEAD_DIM]                                      # (HTOK, HD)
        ks = qkvs[:, HEAD_DIM:2 * HEAD_DIM]
        vs = qkvs[:, 2 * HEAD_DIM:3 * HEAD_DIM]

        # one lane-dense score matmul + one masked softmax + one P@V per layer
        s = lax.dot_general(qs, ks, (((1,), (1,)), ((), ())),
                            preferred_element_type=jnp.float32) + mask   # (HTOK, HTOK)
        s = s - jnp.max(s, axis=-1, keepdims=True)
        p = jnp.exp(s)                                # masked entries underflow to exactly 0.0
        denom = jnp.sum(p, axis=-1, keepdims=True)
        o = jnp.dot(p, vs, preferred_element_type=jnp.float32)          # (HTOK, HD)
        if EXACT_SOFTMAX_DIV:
            o = o / denom
        else:
            o = o * pl.reciprocal(denom, approx=True)                   # EUP slot
        # out-projection: accumulate per-head 8-aligned row-slabs (dot and += kept adjacent so
        # Mosaic can accumulate in the MXU result buffer on v7x; no head concat).
        attn = jnp.zeros((TOK_PAD, HIDDEN), jnp.float32)
        for h in range(NUM_HEADS):
            attn = attn + jnp.dot(o[h * TOK_PAD:(h + 1) * TOK_PAD, :],
                                  wo_ref[li * NUM_HEADS + h],
                                  preferred_element_type=jnp.float32)
        x = x + attn + bo_ref[li]

        # ---------- MLP block: Linear -> GELU -> Linear ----------
        h2 = _layernorm(x, ln2w_ref[li], ln2b_ref[li])
        m = jnp.dot(h2, w1_ref[li], preferred_element_type=jnp.float32) + b1_ref[li]
        m = _gelu(m)
        m = jnp.dot(m, w2_ref[li], preferred_element_type=jnp.float32) + b2_ref[li]
        x = x + m

    # ---- final LayerNorm + Linear head on the whole slab (wrapper gathers global rows) ----
    hN = _layernorm(x, lnfw_ref[...], lnfb_ref[...])
    out_ref[...] = jnp.dot(hN, hw_ref[...], preferred_element_type=jnp.float32) + hb_ref[...]


# ---------------------------------------------------------------------------
# Wrapper: one pallas_call for the whole forward pass
# ---------------------------------------------------------------------------
@jax.jit
def spectra_transformer(x, params):
    # x: (N, 1, L) -- PyTorch NCL layout
    n, c, length = x.shape
    assert n == BATCH and c == 1 and length == SPECTRA_LEN
    # non-overlapping patches, zero-padded so patch b,i lands on the 8-aligned flat row
    # b*SEQ_PAD + 8 + i; global (row b*SEQ_PAD) and pad rows are zero (layout glue outside kernel)
    xp = x.reshape(BATCH, S0, PATCH)
    xp = jnp.pad(xp, ((0, 0), (SEQ_PAD - S0, 0), (0, 0)))
    xp = xp.reshape(TOK_PAD, PATCH)

    args = [xp, params["conv_w"], params["base"], params["attn_mask"],
            params["ln1_w"], params["ln1_b"], params["wqkv"], params["bqkv"],
            params["wo"], params["bo"], params["ln2_w"], params["ln2_b"],
            params["w1"], params["b1"], params["w2"], params["b2"],
            params["lnf_w"], params["lnf_b"], params["head_w"], params["head_b"]]

    full = lambda a: pl.BlockSpec(a.shape, lambda i, _nd=a.ndim: (0,) * _nd)
    out_full = pl.pallas_call(
        fused_kernel,
        out_shape=jax.ShapeDtypeStruct((TOK_PAD, NUM_OUTPUT), jnp.float32),
        grid=(1,),
        in_specs=[full(a) for a in args],
        out_specs=pl.BlockSpec((TOK_PAD, NUM_OUTPUT), lambda i: (0, 0)),
        scratch_shapes=[pltpu.VMEM((HTOK, 3 * HEAD_DIM), jnp.float32)],
        compiler_params=pltpu.CompilerParams(dimension_semantics=("arbitrary",)),
    )(*args)
    # global token of sequence b sits at flat row b*SEQ_PAD
    return out_full[0::SEQ_PAD]


# ---------------------------------------------------------------------------
# Parameter construction (deterministic, synthetic)
# ---------------------------------------------------------------------------
def init_params(key):
    keys = jax.random.split(key, 12)
    kit = iter(keys)

    def nrm(shape, scale=0.02):
        return scale * jax.random.normal(next(kit), shape, jnp.float32)

    # Conv1d(1, H, kernel=P, stride=P): PyTorch weight (H, 1, P) stored transposed as (P, H)
    conv_w = nrm((PATCH, HIDDEN))
    conv_b = nrm((1, HIDDEN))

    # fixed sinusoidal position embedding (exactly as in the PyTorch __init__)
    position = jnp.arange(S0, dtype=jnp.float32)[:, None]
    div_term = jnp.exp(jnp.arange(0, HIDDEN, 2, dtype=jnp.float32)
                       * (-(math.log(10000.0) / HIDDEN)))
    pe = jnp.zeros((S0, HIDDEN), jnp.float32)
    pe = pe.at[:, 0::2].set(jnp.sin(position * div_term))
    pe = pe.at[:, 1::2].set(jnp.cos(position * div_term))

    # torchvision Encoder's learnable pos_embedding (SEQ, H)
    enc_pos = nrm((SEQ, HIDDEN))

    # precomputed token "base" slab (TOK_PAD, H):
    #   row b*SEQ_PAD          : zero global token + enc_pos[0]
    #   rows b*SEQ_PAD+8..15   : conv bias + sinusoidal pos + enc_pos[1:]   (patch rows)
    #   rows b*SEQ_PAD+1..7    : zero (pad rows; masked as keys, never feed valid outputs)
    patch_base = conv_b + pe + enc_pos[1:, :]
    base = jnp.zeros((TOK_PAD, HIDDEN), jnp.float32)
    for b in range(BATCH):
        base = base.at[b * SEQ_PAD].set(enc_pos[0])
        base = base.at[b * SEQ_PAD + (SEQ_PAD - S0):(b + 1) * SEQ_PAD].set(patch_base)

    # additive mask over head-stacked flat tokens (HTOK, HTOK):
    # 0 iff same head & same sequence & key is a real (non-pad) token, else -1e30.
    # Every valid query row keeps at least its own key unmasked, so row maxima stay finite;
    # pad query rows stay finite (uniform softmax) and are discarded by the wrapper.
    idx = jnp.arange(HTOK)
    head_id = idx // TOK_PAD
    rem = idx % TOK_PAD
    batch_id = rem // SEQ_PAD
    pos_in_seq = rem % SEQ_PAD
    key_valid = (pos_in_seq == 0) | (pos_in_seq >= SEQ_PAD - S0)
    ok = ((head_id[:, None] == head_id[None, :])
          & (batch_id[:, None] == batch_id[None, :])
          & key_valid[None, :])
    attn_mask = jnp.where(ok, 0.0, -1e30).astype(jnp.float32)

    L, NH, HD = NUM_LAYERS, NUM_HEADS, HEAD_DIM

    # MHA in_proj fused per layer into (H, 3H), columns head-interleaved [q_h | k_h | v_h];
    # q weights (and q bias, if nonzero) carry the folded 1/sqrt(HEAD_DIM) scale (exact).
    wq = nrm((L, HIDDEN, HIDDEN)) * _SCALE
    wk = nrm((L, HIDDEN, HIDDEN))
    wv = nrm((L, HIDDEN, HIDDEN))
    wqkv = jnp.concatenate([wq.reshape(L, HIDDEN, NH, HD),
                            wk.reshape(L, HIDDEN, NH, HD),
                            wv.reshape(L, HIDDEN, NH, HD)],
                           axis=-1).reshape(L, HIDDEN, 3 * HIDDEN)
    bqkv = jnp.zeros((L, 1, 3 * HIDDEN), jnp.float32)

    # out_proj.weight.T split per head: wo[l*NH + h] == W_o.T[h*HD:(h+1)*HD, :]
    wo = nrm((L, HIDDEN, HIDDEN)).reshape(L, NH, HD, HIDDEN).reshape(L * NH, HD, HIDDEN)

    params = {
        "conv_w": conv_w,
        "base": base,
        "attn_mask": attn_mask,
        "ln1_w": jnp.ones((L, 1, HIDDEN), jnp.float32),
        "ln1_b": jnp.zeros((L, 1, HIDDEN), jnp.float32),
        "wqkv": wqkv,
        "bqkv": bqkv,
        "wo": wo,
        "bo": jnp.zeros((L, 1, HIDDEN), jnp.float32),
        "ln2_w": jnp.ones((L, 1, HIDDEN), jnp.float32),
        "ln2_b": jnp.zeros((L, 1, HIDDEN), jnp.float32),
        "w1": nrm((L, HIDDEN, MLP_DIM)),
        "b1": jnp.zeros((L, 1, MLP_DIM), jnp.float32),
        "w2": nrm((L, MLP_DIM, HIDDEN)),
        "b2": jnp.zeros((L, 1, HIDDEN), jnp.float32),
        "lnf_w": jnp.ones((1, HIDDEN), jnp.float32),     # encoder final LayerNorm
        "lnf_b": jnp.zeros((1, HIDDEN), jnp.float32),
        "head_w": nrm((HIDDEN, NUM_OUTPUT)),             # heads.head Linear (representation_size=None)
        "head_b": jnp.zeros((1, NUM_OUTPUT), jnp.float32),
    }
    return params


if __name__ == "__main__":
    key = jax.random.PRNGKey(0)
    kx, kp = jax.random.split(key)
    x = jax.random.normal(kx, (BATCH, 1, SPECTRA_LEN), jnp.float32)
    params = init_params(kp)

    out = spectra_transformer(x, params)
    out = jax.block_until_ready(out)
    assert out.shape == (BATCH, NUM_OUTPUT) and out.dtype == jnp.float32
    assert bool(jnp.all(jnp.isfinite(out)))
    print("KERNEL_OK")
</pallas_src>

<mosaic_0001>
module attributes {stable_mosaic.version = 11 : i64} {
  func.func @fused_kernel(%arg0: i32, %arg1: memref<32x10xf32, #tpu.memory_space<vmem>>, %arg2: memref<10x32xf32, #tpu.memory_space<vmem>>, %arg3: memref<32x32xf32, #tpu.memory_space<vmem>>, %arg4: memref<128x128xf32, #tpu.memory_space<vmem>>, %arg5: memref<2x1x32xf32, #tpu.memory_space<vmem>>, %arg6: memref<2x1x32xf32, #tpu.memory_space<vmem>>, %arg7: memref<2x32x96xf32, #tpu.memory_space<vmem>>, %arg8: memref<2x1x96xf32, #tpu.memory_space<vmem>>, %arg9: memref<8x8x32xf32, #tpu.memory_space<vmem>>, %arg10: memref<2x1x32xf32, #tpu.memory_space<vmem>>, %arg11: memref<2x1x32xf32, #tpu.memory_space<vmem>>, %arg12: memref<2x1x32xf32, #tpu.memory_space<vmem>>, %arg13: memref<2x32x40xf32, #tpu.memory_space<vmem>>, %arg14: memref<2x1x40xf32, #tpu.memory_space<vmem>>, %arg15: memref<2x40x32xf32, #tpu.memory_space<vmem>>, %arg16: memref<2x1x32xf32, #tpu.memory_space<vmem>>, %arg17: memref<1x32xf32, #tpu.memory_space<vmem>>, %arg18: memref<1x32xf32, #tpu.memory_space<vmem>>, %arg19: memref<32x1xf32, #tpu.memory_space<vmem>>, %arg20: memref<1x1xf32, #tpu.memory_space<vmem>>, %arg21: memref<32x1xf32, #tpu.memory_space<vmem>>, %arg22: memref<128x24xf32, #tpu.memory_space<vmem>>) attributes {dimension_semantics = [#tpu.dimension_semantics<arbitrary>], iteration_bounds = array<i64: 1>, scalar_prefetch = 0 : i64, scratch_operands = 1 : i64, tpu.core_type = #tpu.core_type<tc>, window_params = [{pipeline_mode = #tpu.pipeline_mode<synchronous>, transform_indices = @transform_0, window_bounds = array<i64: 32, 10>}, {pipeline_mode = #tpu.pipeline_mode<synchronous>, transform_indices = @transform_1, window_bounds = array<i64: 10, 32>}, {pipeline_mode = #tpu.pipeline_mode<synchronous>, transform_indices = @transform_2, window_bounds = array<i64: 32, 32>}, {pipeline_mode = #tpu.pipeline_mode<synchronous>, transform_indices = @transform_3, window_bounds = array<i64: 128, 128>}, {pipeline_mode = #tpu.pipeline_mode<synchronous>, transform_indices = @transform_4, window_bounds = array<i64: 2, 1, 32>}, {pipeline_mode = #tpu.pipeline_mode<synchronous>, transform_indices = @transform_5, window_bounds = array<i64: 2, 1, 32>}, {pipeline_mode = #tpu.pipeline_mode<synchronous>, transform_indices = @transform_6, window_bounds = array<i64: 2, 32, 96>}, {pipeline_mode = #tpu.pipeline_mode<synchronous>, transform_indices = @transform_7, window_bounds = array<i64: 2, 1, 96>}, {pipeline_mode = #tpu.pipeline_mode<synchronous>, transform_indices = @transform_8, window_bounds = array<i64: 8, 8, 32>}, {pipeline_mode = #tpu.pipeline_mode<synchronous>, transform_indices = @transform_9, window_bounds = array<i64: 2, 1, 32>}, {pipeline_mode = #tpu.pipeline_mode<synchronous>, transform_indices = @transform_10, window_bounds = array<i64: 2, 1, 32>}, {pipeline_mode = #tpu.pipeline_mode<synchronous>, transform_indices = @transform_11, window_bounds = array<i64: 2, 1, 32>}, {pipeline_mode = #tpu.pipeline_mode<synchronous>, transform_indices = @transform_12, window_bounds = array<i64: 2, 32, 40>}, {pipeline_mode = #tpu.pipeline_mode<synchronous>, transform_indices = @transform_13, window_bounds = array<i64: 2, 1, 40>}, {pipeline_mode = #tpu.pipeline_mode<synchronous>, transform_indices = @transform_14, window_bounds = array<i64: 2, 40, 32>}, {pipeline_mode = #tpu.pipeline_mode<synchronous>, transform_indices = @transform_15, window_bounds = array<i64: 2, 1, 32>}, {pipeline_mode = #tpu.pipeline_mode<synchronous>, transform_indices = @transform_16, window_bounds = array<i64: 1, 32>}, {pipeline_mode = #tpu.pipeline_mode<synchronous>, transform_indices = @transform_17, window_bounds = array<i64: 1, 32>}, {pipeline_mode = #tpu.pipeline_mode<synchronous>, transform_indices = @transform_18, window_bounds = array<i64: 32, 1>}, {pipeline_mode = #tpu.pipeline_mode<synchronous>, transform_indices = @transform_19, window_bounds = array<i64: 1, 1>}, {pipeline_mode = #tpu.pipeline_mode<synchronous>, transform_indices = @transform_20, window_bounds = array<i64: 32, 1>}]} {
    %c0 = arith.constant 0 : index
    %c0_0 = arith.constant 0 : index
    %0 = vector.load %arg1[%c0, %c0_0] : memref<32x10xf32, #tpu.memory_space<vmem>>, vector<32x10xf32>
    %c0_1 = arith.constant 0 : index
    %c0_2 = arith.constant 0 : index
    %1 = vector.load %arg2[%c0_1, %c0_2] : memref<10x32xf32, #tpu.memory_space<vmem>>, vector<10x32xf32>
    %cst = arith.constant dense<0.000000e+00> : vector<32x32xf32>
    %2 = tpu.matmul %0, %1, %cst {dimension_numbers = #tpu.dot_dimension_numbers<[1], [0], [0], [1], [0, 0, 1, 1], [], []>} : vector<32x10xf32>, vector<10x32xf32>, vector<32x32xf32> -> vector<32x32xf32>
    %c0_3 = arith.constant 0 : index
    %c0_4 = arith.constant 0 : index
    %3 = vector.load %arg3[%c0_3, %c0_4] : memref<32x32xf32, #tpu.memory_space<vmem>>, vector<32x32xf32>
    %4 = arith.addf %2, %3 : vector<32x32xf32>
    %c0_5 = arith.constant 0 : index
    %c0_6 = arith.constant 0 : index
    %5 = vector.load %arg4[%c0_5, %c0_6] : memref<128x128xf32, #tpu.memory_space<vmem>>, vector<128x128xf32>
    %c0_7 = arith.constant 0 : index
    %c0_8 = arith.constant 0 : index
    %c0_9 = arith.constant 0 : index
    %6 = vector.load %arg5[%c0_7, %c0_8, %c0_9] : memref<2x1x32xf32, #tpu.memory_space<vmem>>, vector<1x1x32xf32>
    %7 = vector.shape_cast %6 : vector<1x1x32xf32> to vector<1x32xf32>
    %c0_10 = arith.constant 0 : index
    %c0_11 = arith.constant 0 : index
    %c0_12 = arith.constant 0 : index
    %8 = vector.load %arg6[%c0_10, %c0_11, %c0_12] : memref<2x1x32xf32, #tpu.memory_space<vmem>>, vector<1x1x32xf32>
    %9 = vector.shape_cast %8 : vector<1x1x32xf32> to vector<1x32xf32>
    %cst_13 = arith.constant dense<0.000000e+00> : vector<32xf32>
    %10 = vector.multi_reduction <add>, %4, %cst_13 [1] : vector<32x32xf32> to vector<32xf32>
    %11 = vector.shape_cast %10 : vector<32xf32> to vector<32x1xf32>
    %cst_14 = arith.constant 3.200000e+01 : f32
    %12 = vector.broadcast %cst_14 : f32 to vector<32x1xf32>
    %13 = arith.divf %11, %12 : vector<32x1xf32>
    %14 = vector.broadcast %13 : vector<32x1xf32> to vector<32x32xf32>
    %15 = arith.subf %4, %14 : vector<32x32xf32>
    %16 = arith.mulf %15, %15 : vector<32x32xf32>
    %cst_15 = arith.constant dense<0.000000e+00> : vector<32xf32>
    %17 = vector.multi_reduction <add>, %16, %cst_15 [1] : vector<32x32xf32> to vector<32xf32>
    %18 = vector.shape_cast %17 : vector<32xf32> to vector<32x1xf32>
    %cst_16 = arith.constant 3.200000e+01 : f32
    %19 = vector.broadcast %cst_16 : f32 to vector<32x1xf32>
    %20 = arith.divf %18, %19 : vector<32x1xf32>
    %21 = vector.broadcast %13 : vector<32x1xf32> to vector<32x32xf32>
    %22 = arith.subf %4, %21 : vector<32x32xf32>
    %cst_17 = arith.constant 9.99999997E-7 : f32
    %23 = vector.broadcast %cst_17 : f32 to vector<32x1xf32>
    %24 = arith.addf %20, %23 : vector<32x1xf32>
    %25 = math.rsqrt %24 : vector<32x1xf32>
    %26 = vector.broadcast %25 : vector<32x1xf32> to vector<32x32xf32>
    %27 = arith.mulf %22, %26 : vector<32x32xf32>
    %28 = vector.broadcast %7 : vector<1x32xf32> to vector<32x32xf32>
    %29 = arith.mulf %27, %28 : vector<32x32xf32>
    %30 = vector.broadcast %9 : vector<1x32xf32> to vector<32x32xf32>
    %31 = arith.addf %29, %30 : vector<32x32xf32>
    %c0_18 = arith.constant 0 : index
    %c0_19 = arith.constant 0 : index
    %c0_20 = arith.constant 0 : index
    %32 = vector.load %arg7[%c0_18, %c0_19, %c0_20] : memref<2x32x96xf32, #tpu.memory_space<vmem>>, vector<1x32x96xf32>
    %33 = vector.shape_cast %32 : vector<1x32x96xf32> to vector<32x96xf32>
    %cst_21 = arith.constant dense<0.000000e+00> : vector<32x96xf32>
    %34 = tpu.matmul %31, %33, %cst_21 {dimension_numbers = #tpu.dot_dimension_numbers<[1], [0], [0], [1], [0, 0, 1, 1], [], []>} : vector<32x32xf32>, vector<32x96xf32>, vector<32x96xf32> -> vector<32x96xf32>
    %c0_22 = arith.constant 0 : index
    %c0_23 = arith.constant 0 : index
    %c0_24 = arith.constant 0 : index
    %35 = vector.load %arg8[%c0_22, %c0_23, %c0_24] : memref<2x1x96xf32, #tpu.memory_space<vmem>>, vector<1x1x96xf32>
    %36 = vector.shape_cast %35 : vector<1x1x96xf32> to vector<1x96xf32>
    %37 = vector.broadcast %36 : vector<1x96xf32> to vector<32x96xf32>
    %38 = arith.addf %34, %37 : vector<32x96xf32>
    %39 = vector.extract_strided_slice %38 {offsets = [0, 0], sizes = [32, 24], strides = [1, 1]} : vector<32x96xf32> to vector<32x24xf32>
    %c0_25 = arith.constant 0 : index
    %c0_26 = arith.constant 0 : index
    %40 = vector.load %arg22[%c0_25, %c0_26] : memref<128x24xf32, #tpu.memory_space<vmem>>, vector<32x24xf32>
    tpu.vector_store %arg22[%c0_25, %c0_26], %39 {strides = array<i32>} : memref<128x24xf32, #tpu.memory_space<vmem>>, vector<32x24xf32>,
    %41 = vector.extract_strided_slice %38 {offsets = [0, 24], sizes = [32, 24], strides = [1, 1]} : vector<32x96xf32> to vector<32x24xf32>
    %c32 = arith.constant 32 : index
    %c0_27 = arith.constant 0 : index
    %42 = vector.load %arg22[%c32, %c0_27] : memref<128x24xf32, #tpu.memory_space<vmem>>, vector<32x24xf32>
    tpu.vector_store %arg22[%c32, %c0_27], %41 {strides = array<i32>} : memref<128x24xf32, #tpu.memory_space<vmem>>, vector<32x24xf32>,
    %43 = vector.extract_strided_slice %38 {offsets = [0, 48], sizes = [32, 24], strides = [1, 1]} : vector<32x96xf32> to vector<32x24xf32>
    %c64 = arith.constant 64 : index
    %c0_28 = arith.constant 0 : index
    %44 = vector.load %arg22[%c64, %c0_28] : memref<128x24xf32, #tpu.memory_space<vmem>>, vector<32x24xf32>
    tpu.vector_store %arg22[%c64, %c0_28], %43 {strides = array<i32>} : memref<128x24xf32, #tpu.memory_space<vmem>>, vector<32x24xf32>,
    %45 = vector.extract_strided_slice %38 {offsets = [0, 72], sizes = [32, 24], strides = [1, 1]} : vector<32x96xf32> to vector<32x24xf32>
    %c96 = arith.constant 96 : index
    %c0_29 = arith.constant 0 : index
    %46 = vector.load %arg22[%c96, %c0_29] : memref<128x24xf32, #tpu.memory_space<vmem>>, vector<32x24xf32>
    tpu.vector_store %arg22[%c96, %c0_29], %45 {strides = array<i32>} : memref<128x24xf32, #tpu.memory_space<vmem>>, vector<32x24xf32>,
    %c0_30 = arith.constant 0 : index
    %c0_31 = arith.constant 0 : index
    %47 = vector.load %arg22[%c0_30, %c0_31] : memref<128x24xf32, #tpu.memory_space<vmem>>, vector<128x24xf32>
    %48 = vector.extract_strided_slice %47 {offsets = [0, 0], sizes = [128, 8], strides = [1, 1]} : vector<128x24xf32> to vector<128x8xf32>
    %49 = vector.extract_strided_slice %47 {offsets = [0, 8], sizes = [128, 8], strides = [1, 1]} : vector<128x24xf32> to vector<128x8xf32>
    %50 = vector.extract_strided_slice %47 {offsets = [0, 16], sizes = [128, 8], strides = [1, 1]} : vector<128x24xf32> to vector<128x8xf32>
    %cst_32 = arith.constant dense<0.000000e+00> : vector<128x128xf32>
    %51 = tpu.matmul %48, %49, %cst_32 {dimension_numbers = #tpu.dot_dimension_numbers<[1], [1], [0], [0], [0, 0, 1, 0], [], []>} : vector<128x8xf32>, vector<128x8xf32>, vector<128x128xf32> -> vector<128x128xf32>
    %52 = arith.addf %51, %5 : vector<128x128xf32>
    %cst_33 = arith.constant dense<0xFF800000> : vector<128xf32>
    %53 = vector.multi_reduction <maximumf>, %52, %cst_33 [1] : vector<128x128xf32> to vector<128xf32>
    %54 = vector.shape_cast %53 : vector<128xf32> to vector<128x1xf32>
    %55 = vector.broadcast %54 : vector<128x1xf32> to vector<128x128xf32>
    %56 = arith.subf %52, %55 : vector<128x128xf32>
    %57 = math.exp %56 : vector<128x128xf32>
    %cst_34 = arith.constant dense<0.000000e+00> : vector<128xf32>
    %58 = vector.multi_reduction <add>, %57, %cst_34 [1] : vector<128x128xf32> to vector<128xf32>
    %59 = vector.shape_cast %58 : vector<128xf32> to vector<128x1xf32>
    %cst_35 = arith.constant dense<0.000000e+00> : vector<128x8xf32>
    %60 = tpu.matmul %57, %50, %cst_35 {dimension_numbers = #tpu.dot_dimension_numbers<[1], [0], [0], [1], [0, 0, 1, 1], [], []>} : vector<128x128xf32>, vector<128x8xf32>, vector<128x8xf32> -> vector<128x8xf32>
    %61 = tpu.reciprocal %59 {approx = true} : vector<128x1xf32> -> vector<128x1xf32>
    %62 = vector.broadcast %61 : vector<128x1xf32> to vector<128x8xf32>
    %63 = arith.mulf %60, %62 : vector<128x8xf32>
    %cst_36 = arith.constant 0.000000e+00 : f32
    %64 = vector.broadcast %cst_36 : f32 to vector<32x32xf32>
    %65 = vector.extract_strided_slice %63 {offsets = [0, 0], sizes = [32, 8], strides = [1, 1]} : vector<128x8xf32> to vector<32x8xf32>
    %c0_37 = arith.constant 0 : index
    %c0_38 = arith.constant 0 : index
    %c0_39 = arith.constant 0 : index
    %66 = vector.load %arg9[%c0_37, %c0_38, %c0_39] : memref<8x8x32xf32, #tpu.memory_space<vmem>>, vector<1x8x32xf32>
    %67 = vector.shape_cast %66 : vector<1x8x32xf32> to vector<8x32xf32>
    %cst_40 = arith.constant dense<0.000000e+00> : vector<32x32xf32>
    %68 = tpu.matmul %65, %67, %cst_40 {dimension_numbers = #tpu.dot_dimension_numbers<[1], [0], [0], [1], [0, 0, 1, 1], [], []>} : vector<32x8xf32>, vector<8x32xf32>, vector<32x32xf32> -> vector<32x32xf32>
    %69 = arith.addf %64, %68 : vector<32x32xf32>
    %70 = vector.extract_strided_slice %63 {offsets = [32, 0], sizes = [32, 8], strides = [1, 1]} : vector<128x8xf32> to vector<32x8xf32>
    %c1 = arith.constant 1 : index
    %c0_41 = arith.constant 0 : index
    %c0_42 = arith.constant 0 : index
    %71 = vector.load %arg9[%c1, %c0_41, %c0_42] : memref<8x8x32xf32, #tpu.memory_space<vmem>>, vector<1x8x32xf32>
    %72 = vector.shape_cast %71 : vector<1x8x32xf32> to vector<8x32xf32>
    %cst_43 = arith.constant dense<0.000000e+00> : vector<32x32xf32>
    %73 = tpu.matmul %70, %72, %cst_43 {dimension_numbers = #tpu.dot_dimension_numbers<[1], [0], [0], [1], [0, 0, 1, 1], [], []>} : vector<32x8xf32>, vector<8x32xf32>, vector<32x32xf32> -> vector<32x32xf32>
    %74 = arith.addf %69, %73 : vector<32x32xf32>
    %75 = vector.extract_strided_slice %63 {offsets = [64, 0], sizes = [32, 8], strides = [1, 1]} : vector<128x8xf32> to vector<32x8xf32>
    %c2 = arith.constant 2 : index
    %c0_44 = arith.constant 0 : index
    %c0_45 = arith.constant 0 : index
    %76 = vector.load %arg9[%c2, %c0_44, %c0_45] : memref<8x8x32xf32, #tpu.memory_space<vmem>>, vector<1x8x32xf32>
    %77 = vector.shape_cast %76 : vector<1x8x32xf32> to vector<8x32xf32>
    %cst_46 = arith.constant dense<0.000000e+00> : vector<32x32xf32>
    %78 = tpu.matmul %75, %77, %cst_46 {dimension_numbers = #tpu.dot_dimension_numbers<[1], [0], [0], [1], [0, 0, 1, 1], [], []>} : vector<32x8xf32>, vector<8x32xf32>, vector<32x32xf32> -> vector<32x32xf32>
    %79 = arith.addf %74, %78 : vector<32x32xf32>
    %80 = vector.extract_strided_slice %63 {offsets = [96, 0], sizes = [32, 8], strides = [1, 1]} : vector<128x8xf32> to vector<32x8xf32>
    %c3 = arith.constant 3 : index
    %c0_47 = arith.constant 0 : index
    %c0_48 = arith.constant 0 : index
    %81 = vector.load %arg9[%c3, %c0_47, %c0_48] : memref<8x8x32xf32, #tpu.memory_space<vmem>>, vector<1x8x32xf32>
    %82 = vector.shape_cast %81 : vector<1x8x32xf32> to vector<8x32xf32>
    %cst_49 = arith.constant dense<0.000000e+00> : vector<32x32xf32>
    %83 = tpu.matmul %80, %82, %cst_49 {dimension_numbers = #tpu.dot_dimension_numbers<[1], [0], [0], [1], [0, 0, 1, 1], [], []>} : vector<32x8xf32>, vector<8x32xf32>, vector<32x32xf32> -> vector<32x32xf32>
    %84 = arith.addf %79, %83 : vector<32x32xf32>
    %85 = arith.addf %4, %84 : vector<32x32xf32>
    %c0_50 = arith.constant 0 : index
    %c0_51 = arith.constant 0 : index
    %c0_52 = arith.constant 0 : index
    %86 = vector.load %arg10[%c0_50, %c0_51, %c0_52] : memref<2x1x32xf32, #tpu.memory_space<vmem>>, vector<1x1x32xf32>
    %87 = vector.shape_cast %86 : vector<1x1x32xf32> to vector<1x32xf32>
    %88 = vector.broadcast %87 : vector<1x32xf32> to vector<32x32xf32>
    %89 = arith.addf %85, %88 : vector<32x32xf32>
    %c0_53 = arith.constant 0 : index
    %c0_54 = arith.constant 0 : index
    %c0_55 = arith.constant 0 : index
    %90 = vector.load %arg11[%c0_53, %c0_54, %c0_55] : memref<2x1x32xf32, #tpu.memory_space<vmem>>, vector<1x1x32xf32>
    %91 = vector.shape_cast %90 : vector<1x1x32xf32> to vector<1x32xf32>
    %c0_56 = arith.constant 0 : index
    %c0_57 = arith.constant 0 : index
    %c0_58 = arith.constant 0 : index
    %92 = vector.load %arg12[%c0_56, %c0_57, %c0_58] : memref<2x1x32xf32, #tpu.memory_space<vmem>>, vector<1x1x32xf32>
    %93 = vector.shape_cast %92 : vector<1x1x32xf32> to vector<1x32xf32>
    %cst_59 = arith.constant dense<0.000000e+00> : vector<32xf32>
    %94 = vector.multi_reduction <add>, %89, %cst_59 [1] : vector<32x32xf32> to vector<32xf32>
    %95 = vector.shape_cast %94 : vector<32xf32> to vector<32x1xf32>
    %cst_60 = arith.constant 3.200000e+01 : f32
    %96 = vector.broadcast %cst_60 : f32 to vector<32x1xf32>
    %97 = arith.divf %95, %96 : vector<32x1xf32>
    %98 = vector.broadcast %97 : vector<32x1xf32> to vector<32x32xf32>
    %99 = arith.subf %89, %98 : vector<32x32xf32>
    %100 = arith.mulf %99, %99 : vector<32x32xf32>
    %cst_61 = arith.constant dense<0.000000e+00> : vector<32xf32>
    %101 = vector.multi_reduction <add>, %100, %cst_61 [1] : vector<32x32xf32> to vector<32xf32>
    %102 = vector.shape_cast %101 : vector<32xf32> to vector<32x1xf32>
    %cst_62 = arith.constant 3.200000e+01 : f32
    %103 = vector.broadcast %cst_62 : f32 to vector<32x1xf32>
    %104 = arith.divf %102, %103 : vector<32x1xf32>
    %105 = vector.broadcast %97 : vector<32x1xf32> to vector<32x32xf32>
    %106 = arith.subf %89, %105 : vector<32x32xf32>
    %cst_63 = arith.constant 9.99999997E-7 : f32
    %107 = vector.broadcast %cst_63 : f32 to vector<32x1xf32>
    %108 = arith.addf %104, %107 : vector<32x1xf32>
    %109 = math.rsqrt %108 : vector<32x1xf32>
    %110 = vector.broadcast %109 : vector<32x1xf32> to vector<32x32xf32>
    %111 = arith.mulf %106, %110 : vector<32x32xf32>
    %112 = vector.broadcast %91 : vector<1x32xf32> to vector<32x32xf32>
    %113 = arith.mulf %111, %112 : vector<32x32xf32>
    %114 = vector.broadcast %93 : vector<1x32xf32> to vector<32x32xf32>
    %115 = arith.addf %113, %114 : vector<32x32xf32>
    %c0_64 = arith.constant 0 : index
    %c0_65 = arith.constant 0 : index
    %c0_66 = arith.constant 0 : index
    %116 = vector.load %arg13[%c0_64, %c0_65, %c0_66] : memref<2x32x40xf32, #tpu.memory_space<vmem>>, vector<1x32x40xf32>
    %117 = vector.shape_cast %116 : vector<1x32x40xf32> to vector<32x40xf32>
    %cst_67 = arith.constant dense<0.000000e+00> : vector<32x40xf32>
    %118 = tpu.matmul %115, %117, %cst_67 {dimension_numbers = #tpu.dot_dimension_numbers<[1], [0], [0], [1], [0, 0, 1, 1], [], []>} : vector<32x32xf32>, vector<32x40xf32>, vector<32x40xf32> -> vector<32x40xf32>
    %c0_68 = arith.constant 0 : index
    %c0_69 = arith.constant 0 : index
    %c0_70 = arith.constant 0 : index
    %119 = vector.load %arg14[%c0_68, %c0_69, %c0_70] : memref<2x1x40xf32, #tpu.memory_space<vmem>>, vector<1x1x40xf32>
    %120 = vector.shape_cast %119 : vector<1x1x40xf32> to vector<1x40xf32>
    %121 = vector.broadcast %120 : vector<1x40xf32> to vector<32x40xf32>
    %122 = arith.addf %118, %121 : vector<32x40xf32>
    %cst_71 = arith.constant 5.000000e-01 : f32
    %123 = vector.broadcast %cst_71 : f32 to vector<32x40xf32>
    %124 = arith.mulf %123, %122 : vector<32x40xf32>
    %cst_72 = arith.constant 4.471500e-02 : f32
    %125 = vector.broadcast %cst_72 : f32 to vector<32x40xf32>
    %126 = arith.mulf %125, %122 : vector<32x40xf32>
    %127 = arith.mulf %126, %122 : vector<32x40xf32>
    %128 = arith.mulf %127, %122 : vector<32x40xf32>
    %129 = arith.addf %122, %128 : vector<32x40xf32>
    %cst_73 = arith.constant 0.797884583 : f32
    %130 = vector.broadcast %cst_73 : f32 to vector<32x40xf32>
    %131 = arith.mulf %130, %129 : vector<32x40xf32>
    %132 = math.tanh %131 : vector<32x40xf32>
    %cst_74 = arith.constant 1.000000e+00 : f32
    %133 = vector.broadcast %cst_74 : f32 to vector<32x40xf32>
    %134 = arith.addf %133, %132 : vector<32x40xf32>
    %135 = arith.mulf %124, %134 : vector<32x40xf32>
    %c0_75 = arith.constant 0 : index
    %c0_76 = arith.constant 0 : index
    %c0_77 = arith.constant 0 : index
    %136 = vector.load %arg15[%c0_75, %c0_76, %c0_77] : memref<2x40x32xf32, #tpu.memory_space<vmem>>, vector<1x40x32xf32>
    %137 = vector.shape_cast %136 : vector<1x40x32xf32> to vector<40x32xf32>
    %cst_78 = arith.constant dense<0.000000e+00> : vector<32x32xf32>
    %138 = tpu.matmul %135, %137, %cst_78 {dimension_numbers = #tpu.dot_dimension_numbers<[1], [0], [0], [1], [0, 0, 1, 1], [], []>} : vector<32x40xf32>, vector<40x32xf32>, vector<32x32xf32> -> vector<32x32xf32>
    %c0_79 = arith.constant 0 : index
    %c0_80 = arith.constant 0 : index
    %c0_81 = arith.constant 0 : index
    %139 = vector.load %arg16[%c0_79, %c0_80, %c0_81] : memref<2x1x32xf32, #tpu.memory_space<vmem>>, vector<1x1x32xf32>
    %140 = vector.shape_cast %139 : vector<1x1x32xf32> to vector<1x32xf32>
    %141 = vector.broadcast %140 : vector<1x32xf32> to vector<32x32xf32>
    %142 = arith.addf %138, %141 : vector<32x32xf32>
    %143 = arith.addf %89, %142 : vector<32x32xf32>
    %c1_82 = arith.constant 1 : index
    %c0_83 = arith.constant 0 : index
    %c0_84 = arith.constant 0 : index
    %144 = vector.load %arg5[%c1_82, %c0_83, %c0_84] : memref<2x1x32xf32, #tpu.memory_space<vmem>>, vector<1x1x32xf32>
    %145 = vector.shape_cast %144 : vector<1x1x32xf32> to vector<1x32xf32>
    %c1_85 = arith.constant 1 : index
    %c0_86 = arith.constant 0 : index
    %c0_87 = arith.constant 0 : index
    %146 = vector.load %arg6[%c1_85, %c0_86, %c0_87] : memref<2x1x32xf32, #tpu.memory_space<vmem>>, vector<1x1x32xf32>
    %147 = vector.shape_cast %146 : vector<1x1x32xf32> to vector<1x32xf32>
    %cst_88 = arith.constant dense<0.000000e+00> : vector<32xf32>
    %148 = vector.multi_reduction <add>, %143, %cst_88 [1] : vector<32x32xf32> to vector<32xf32>
    %149 = vector.shape_cast %148 : vector<32xf32> to vector<32x1xf32>
    %cst_89 = arith.constant 3.200000e+01 : f32
    %150 = vector.broadcast %cst_89 : f32 to vector<32x1xf32>
    %151 = arith.divf %149, %150 : vector<32x1xf32>
    %152 = vector.broadcast %151 : vector<32x1xf32> to vector<32x32xf32>
    %153 = arith.subf %143, %152 : vector<32x32xf32>
    %154 = arith.mulf %153, %153 : vector<32x32xf32>
    %cst_90 = arith.constant dense<0.000000e+00> : vector<32xf32>
    %155 = vector.multi_reduction <add>, %154, %cst_90 [1] : vector<32x32xf32> to vector<32xf32>
    %156 = vector.shape_cast %155 : vector<32xf32> to vector<32x1xf32>
    %cst_91 = arith.constant 3.200000e+01 : f32
    %157 = vector.broadcast %cst_91 : f32 to vector<32x1xf32>
    %158 = arith.divf %156, %157 : vector<32x1xf32>
    %159 = vector.broadcast %151 : vector<32x1xf32> to vector<32x32xf32>
    %160 = arith.subf %143, %159 : vector<32x32xf32>
    %cst_92 = arith.constant 9.99999997E-7 : f32
    %161 = vector.broadcast %cst_92 : f32 to vector<32x1xf32>
    %162 = arith.addf %158, %161 : vector<32x1xf32>
    %163 = math.rsqrt %162 : vector<32x1xf32>
    %164 = vector.broadcast %163 : vector<32x1xf32> to vector<32x32xf32>
    %165 = arith.mulf %160, %164 : vector<32x32xf32>
    %166 = vector.broadcast %145 : vector<1x32xf32> to vector<32x32xf32>
    %167 = arith.mulf %165, %166 : vector<32x32xf32>
    %168 = vector.broadcast %147 : vector<1x32xf32> to vector<32x32xf32>
    %169 = arith.addf %167, %168 : vector<32x32xf32>
    %c1_93 = arith.constant 1 : index
    %c0_94 = arith.constant 0 : index
    %c0_95 = arith.constant 0 : index
    %170 = vector.load %arg7[%c1_93, %c0_94, %c0_95] : memref<2x32x96xf32, #tpu.memory_space<vmem>>, vector<1x32x96xf32>
    %171 = vector.shape_cast %170 : vector<1x32x96xf32> to vector<32x96xf32>
    %cst_96 = arith.constant dense<0.000000e+00> : vector<32x96xf32>
    %172 = tpu.matmul %169, %171, %cst_96 {dimension_numbers = #tpu.dot_dimension_numbers<[1], [0], [0], [1], [0, 0, 1, 1], [], []>} : vector<32x32xf32>, vector<32x96xf32>, vector<32x96xf32> -> vector<32x96xf32>
    %c1_97 = arith.constant 1 : index
    %c0_98 = arith.constant 0 : index
    %c0_99 = arith.constant 0 : index
    %173 = vector.load %arg8[%c1_97, %c0_98, %c0_99] : memref<2x1x96xf32, #tpu.memory_space<vmem>>, vector<1x1x96xf32>
    %174 = vector.shape_cast %173 : vector<1x1x96xf32> to vector<1x96xf32>
    %175 = vector.broadcast %174 : vector<1x96xf32> to vector<32x96xf32>
    %176 = arith.addf %172, %175 : vector<32x96xf32>
    %177 = vector.extract_strided_slice %176 {offsets = [0, 0], sizes = [32, 24], strides = [1, 1]} : vector<32x96xf32> to vector<32x24xf32>
    %c0_100 = arith.constant 0 : index
    %c0_101 = arith.constant 0 : index
    %178 = vector.load %arg22[%c0_100, %c0_101] : memref<128x24xf32, #tpu.memory_space<vmem>>, vector<32x24xf32>
    tpu.vector_store %arg22[%c0_100, %c0_101], %177 {strides = array<i32>} : memref<128x24xf32, #tpu.memory_space<vmem>>, vector<32x24xf32>,
    %179 = vector.extract_strided_slice %176 {offsets = [0, 24], sizes = [32, 24], strides = [1, 1]} : vector<32x96xf32> to vector<32x24xf32>
    %c32_102 = arith.constant 32 : index
    %c0_103 = arith.constant 0 : index
    %180 = vector.load %arg22[%c32_102, %c0_103] : memref<128x24xf32, #tpu.memory_space<vmem>>, vector<32x24xf32>
    tpu.vector_store %arg22[%c32_102, %c0_103], %179 {strides = array<i32>} : memref<128x24xf32, #tpu.memory_space<vmem>>, vector<32x24xf32>,
    %181 = vector.extract_strided_slice %176 {offsets = [0, 48], sizes = [32, 24], strides = [1, 1]} : vector<32x96xf32> to vector<32x24xf32>
    %c64_104 = arith.constant 64 : index
    %c0_105 = arith.constant 0 : index
    %182 = vector.load %arg22[%c64_104, %c0_105] : memref<128x24xf32, #tpu.memory_space<vmem>>, vector<32x24xf32>
    tpu.vector_store %arg22[%c64_104, %c0_105], %181 {strides = array<i32>} : memref<128x24xf32, #tpu.memory_space<vmem>>, vector<32x24xf32>,
    %183 = vector.extract_strided_slice %176 {offsets = [0, 72], sizes = [32, 24], strides = [1, 1]} : vector<32x96xf32> to vector<32x24xf32>
    %c96_106 = arith.constant 96 : index
    %c0_107 = arith.constant 0 : index
    %184 = vector.load %arg22[%c96_106, %c0_107] : memref<128x24xf32, #tpu.memory_space<vmem>>, vector<32x24xf32>
    tpu.vector_store %arg22[%c96_106, %c0_107], %183 {strides = array<i32>} : memref<128x24xf32, #tpu.memory_space<vmem>>, vector<32x24xf32>,
    %c0_108 = arith.constant 0 : index
    %c0_109 = arith.constant 0 : index
    %185 = vector.load %arg22[%c0_108, %c0_109] : memref<128x24xf32, #tpu.memory_space<vmem>>, vector<128x24xf32>
    %186 = vector.extract_strided_slice %185 {offsets = [0, 0], sizes = [128, 8], strides = [1, 1]} : vector<128x24xf32> to vector<128x8xf32>
    %187 = vector.extract_strided_slice %185 {offsets = [0, 8], sizes = [128, 8], strides = [1, 1]} : vector<128x24xf32> to vector<128x8xf32>
    %188 = vector.extract_strided_slice %185 {offsets = [0, 16], sizes = [128, 8], strides = [1, 1]} : vector<128x24xf32> to vector<128x8xf32>
    %cst_110 = arith.constant dense<0.000000e+00> : vector<128x128xf32>
    %189 = tpu.matmul %186, %187, %cst_110 {dimension_numbers = #tpu.dot_dimension_numbers<[1], [1], [0], [0], [0, 0, 1, 0], [], []>} : vector<128x8xf32>, vector<128x8xf32>, vector<128x128xf32> -> vector<128x128xf32>
    %190 = arith.addf %189, %5 : vector<128x128xf32>
    %cst_111 = arith.constant dense<0xFF800000> : vector<128xf32>
    %191 = vector.multi_reduction <maximumf>, %190, %cst_111 [1] : vector<128x128xf32> to vector<128xf32>
    %192 = vector.shape_cast %191 : vector<128xf32> to vector<128x1xf32>
    %193 = vector.broadcast %192 : vector<128x1xf32> to vector<128x128xf32>
    %194 = arith.subf %190, %193 : vector<128x128xf32>
    %195 = math.exp %194 : vector<128x128xf32>
    %cst_112 = arith.constant dense<0.000000e+00> : vector<128xf32>
    %196 = vector.multi_reduction <add>, %195, %cst_112 [1] : vector<128x128xf32> to vector<128xf32>
    %197 = vector.shape_cast %196 : vector<128xf32> to vector<128x1xf32>
    %cst_113 = arith.constant dense<0.000000e+00> : vector<128x8xf32>
    %198 = tpu.matmul %195, %188, %cst_113 {dimension_numbers = #tpu.dot_dimension_numbers<[1], [0], [0], [1], [0, 0, 1, 1], [], []>} : vector<128x128xf32>, vector<128x8xf32>, vector<128x8xf32> -> vector<128x8xf32>
    %199 = tpu.reciprocal %197 {approx = true} : vector<128x1xf32> -> vector<128x1xf32>
    %200 = vector.broadcast %199 : vector<128x1xf32> to vector<128x8xf32>
    %201 = arith.mulf %198, %200 : vector<128x8xf32>
    %cst_114 = arith.constant 0.000000e+00 : f32
    %202 = vector.broadcast %cst_114 : f32 to vector<32x32xf32>
    %203 = vector.extract_strided_slice %201 {offsets = [0, 0], sizes = [32, 8], strides = [1, 1]} : vector<128x8xf32> to vector<32x8xf32>
    %c4 = arith.constant 4 : index
    %c0_115 = arith.constant 0 : index
    %c0_116 = arith.constant 0 : index
    %204 = vector.load %arg9[%c4, %c0_115, %c0_116] : memref<8x8x32xf32, #tpu.memory_space<vmem>>, vector<1x8x32xf32>
    %205 = vector.shape_cast %204 : vector<1x8x32xf32> to vector<8x32xf32>
    %cst_117 = arith.constant dense<0.000000e+00> : vector<32x32xf32>
    %206 = tpu.matmul %203, %205, %cst_117 {dimension_numbers = #tpu.dot_dimension_numbers<[1], [0], [0], [1], [0, 0, 1, 1], [], []>} : vector<32x8xf32>, vector<8x32xf32>, vector<32x32xf32> -> vector<32x32xf32>
    %207 = arith.addf %202, %206 : vector<32x32xf32>
    %208 = vector.extract_strided_slice %201 {offsets = [32, 0], sizes = [32, 8], strides = [1, 1]} : vector<128x8xf32> to vector<32x8xf32>
    %c5 = arith.constant 5 : index
    %c0_118 = arith.constant 0 : index
    %c0_119 = arith.constant 0 : index
    %209 = vector.load %arg9[%c5, %c0_118, %c0_119] : memref<8x8x32xf32, #tpu.memory_space<vmem>>, vector<1x8x32xf32>
    %210 = vector.shape_cast %209 : vector<1x8x32xf32> to vector<8x32xf32>
    %cst_120 = arith.constant dense<0.000000e+00> : vector<32x32xf32>
    %211 = tpu.matmul %208, %210, %cst_120 {dimension_numbers = #tpu.dot_dimension_numbers<[1], [0], [0], [1], [0, 0, 1, 1], [], []>} : vector<32x8xf32>, vector<8x32xf32>, vector<32x32xf32> -> vector<32x32xf32>
    %212 = arith.addf %207, %211 : vector<32x32xf32>
    %213 = vector.extract_strided_slice %201 {offsets = [64, 0], sizes = [32, 8], strides = [1, 1]} : vector<128x8xf32> to vector<32x8xf32>
    %c6 = arith.constant 6 : index
    %c0_121 = arith.constant 0 : index
    %c0_122 = arith.constant 0 : index
    %214 = vector.load %arg9[%c6, %c0_121, %c0_122] : memref<8x8x32xf32, #tpu.memory_space<vmem>>, vector<1x8x32xf32>
    %215 = vector.shape_cast %214 : vector<1x8x32xf32> to vector<8x32xf32>
    %cst_123 = arith.constant dense<0.000000e+00> : vector<32x32xf32>
    %216 = tpu.matmul %213, %215, %cst_123 {dimension_numbers = #tpu.dot_dimension_numbers<[1], [0], [0], [1], [0, 0, 1, 1], [], []>} : vector<32x8xf32>, vector<8x32xf32>, vector<32x32xf32> -> vector<32x32xf32>
    %217 = arith.addf %212, %216 : vector<32x32xf32>
    %218 = vector.extract_strided_slice %201 {offsets = [96, 0], sizes = [32, 8], strides = [1, 1]} : vector<128x8xf32> to vector<32x8xf32>
    %c7 = arith.constant 7 : index
    %c0_124 = arith.constant 0 : index
    %c0_125 = arith.constant 0 : index
    %219 = vector.load %arg9[%c7, %c0_124, %c0_125] : memref<8x8x32xf32, #tpu.memory_space<vmem>>, vector<1x8x32xf32>
    %220 = vector.shape_cast %219 : vector<1x8x32xf32> to vector<8x32xf32>
    %cst_126 = arith.constant dense<0.000000e+00> : vector<32x32xf32>
    %221 = tpu.matmul %218, %220, %cst_126 {dimension_numbers = #tpu.dot_dimension_numbers<[1], [0], [0], [1], [0, 0, 1, 1], [], []>} : vector<32x8xf32>, vector<8x32xf32>, vector<32x32xf32> -> vector<32x32xf32>
    %222 = arith.addf %217, %221 : vector<32x32xf32>
    %223 = arith.addf %143, %222 : vector<32x32xf32>
    %c1_127 = arith.constant 1 : index
    %c0_128 = arith.constant 0 : index
    %c0_129 = arith.constant 0 : index
    %224 = vector.load %arg10[%c1_127, %c0_128, %c0_129] : memref<2x1x32xf32, #tpu.memory_space<vmem>>, vector<1x1x32xf32>
    %225 = vector.shape_cast %224 : vector<1x1x32xf32> to vector<1x32xf32>
    %226 = vector.broadcast %225 : vector<1x32xf32> to vector<32x32xf32>
    %227 = arith.addf %223, %226 : vector<32x32xf32>
    %c1_130 = arith.constant 1 : index
    %c0_131 = arith.constant 0 : index
    %c0_132 = arith.constant 0 : index
    %228 = vector.load %arg11[%c1_130, %c0_131, %c0_132] : memref<2x1x32xf32, #tpu.memory_space<vmem>>, vector<1x1x32xf32>
    %229 = vector.shape_cast %228 : vector<1x1x32xf32> to vector<1x32xf32>
    %c1_133 = arith.constant 1 : index
    %c0_134 = arith.constant 0 : index
    %c0_135 = arith.constant 0 : index
    %230 = vector.load %arg12[%c1_133, %c0_134, %c0_135] : memref<2x1x32xf32, #tpu.memory_space<vmem>>, vector<1x1x32xf32>
    %231 = vector.shape_cast %230 : vector<1x1x32xf32> to vector<1x32xf32>
    %cst_136 = arith.constant dense<0.000000e+00> : vector<32xf32>
    %232 = vector.multi_reduction <add>, %227, %cst_136 [1] : vector<32x32xf32> to vector<32xf32>
    %233 = vector.shape_cast %232 : vector<32xf32> to vector<32x1xf32>
    %cst_137 = arith.constant 3.200000e+01 : f32
    %234 = vector.broadcast %cst_137 : f32 to vector<32x1xf32>
    %235 = arith.divf %233, %234 : vector<32x1xf32>
    %236 = vector.broadcast %235 : vector<32x1xf32> to vector<32x32xf32>
    %237 = arith.subf %227, %236 : vector<32x32xf32>
    %238 = arith.mulf %237, %237 : vector<32x32xf32>
    %cst_138 = arith.constant dense<0.000000e+00> : vector<32xf32>
    %239 = vector.multi_reduction <add>, %238, %cst_138 [1] : vector<32x32xf32> to vector<32xf32>
    %240 = vector.shape_cast %239 : vector<32xf32> to vector<32x1xf32>
    %cst_139 = arith.constant 3.200000e+01 : f32
    %241 = vector.broadcast %cst_139 : f32 to vector<32x1xf32>
    %242 = arith.divf %240, %241 : vector<32x1xf32>
    %243 = vector.broadcast %235 : vector<32x1xf32> to vector<32x32xf32>
    %244 = arith.subf %227, %243 : vector<32x32xf32>
    %cst_140 = arith.constant 9.99999997E-7 : f32
    %245 = vector.broadcast %cst_140 : f32 to vector<32x1xf32>
    %246 = arith.addf %242, %245 : vector<32x1xf32>
    %247 = math.rsqrt %246 : vector<32x1xf32>
    %248 = vector.broadcast %247 : vector<32x1xf32> to vector<32x32xf32>
    %249 = arith.mulf %244, %248 : vector<32x32xf32>
    %250 = vector.broadcast %229 : vector<1x32xf32> to vector<32x32xf32>
    %251 = arith.mulf %249, %250 : vector<32x32xf32>
    %252 = vector.broadcast %231 : vector<1x32xf32> to vector<32x32xf32>
    %253 = arith.addf %251, %252 : vector<32x32xf32>
    %c1_141 = arith.constant 1 : index
    %c0_142 = arith.constant 0 : index
    %c0_143 = arith.constant 0 : index
    %254 = vector.load %arg13[%c1_141, %c0_142, %c0_143] : memref<2x32x40xf32, #tpu.memory_space<vmem>>, vector<1x32x40xf32>
    %255 = vector.shape_cast %254 : vector<1x32x40xf32> to vector<32x40xf32>
    %cst_144 = arith.constant dense<0.000000e+00> : vector<32x40xf32>
    %256 = tpu.matmul %253, %255, %cst_144 {dimension_numbers = #tpu.dot_dimension_numbers<[1], [0], [0], [1], [0, 0, 1, 1], [], []>} : vector<32x32xf32>, vector<32x40xf32>, vector<32x40xf32> -> vector<32x40xf32>
    %c1_145 = arith.constant 1 : index
    %c0_146 = arith.constant 0 : index
    %c0_147 = arith.constant 0 : index
    %257 = vector.load %arg14[%c1_145, %c0_146, %c0_147] : memref<2x1x40xf32, #tpu.memory_space<vmem>>, vector<1x1x40xf32>
    %258 = vector.shape_cast %257 : vector<1x1x40xf32> to vector<1x40xf32>
    %259 = vector.broadcast %258 : vector<1x40xf32> to vector<32x40xf32>
    %260 = arith.addf %256, %259 : vector<32x40xf32>
    %cst_148 = arith.constant 5.000000e-01 : f32
    %261 = vector.broadcast %cst_148 : f32 to vector<32x40xf32>
    %262 = arith.mulf %261, %260 : vector<32x40xf32>
    %cst_149 = arith.constant 4.471500e-02 : f32
    %263 = vector.broadcast %cst_149 : f32 to vector<32x40xf32>
    %264 = arith.mulf %263, %260 : vector<32x40xf32>
    %265 = arith.mulf %264, %260 : vector<32x40xf32>
    %266 = arith.mulf %265, %260 : vector<32x40xf32>
    %267 = arith.addf %260, %266 : vector<32x40xf32>
    %cst_150 = arith.constant 0.797884583 : f32
    %268 = vector.broadcast %cst_150 : f32 to vector<32x40xf32>
    %269 = arith.mulf %268, %267 : vector<32x40xf32>
    %270 = math.tanh %269 : vector<32x40xf32>
    %cst_151 = arith.constant 1.000000e+00 : f32
    %271 = vector.broadcast %cst_151 : f32 to vector<32x40xf32>
    %272 = arith.addf %271, %270 : vector<32x40xf32>
    %273 = arith.mulf %262, %272 : vector<32x40xf32>
    %c1_152 = arith.constant 1 : index
    %c0_153 = arith.constant 0 : index
    %c0_154 = arith.constant 0 : index
    %274 = vector.load %arg15[%c1_152, %c0_153, %c0_154] : memref<2x40x32xf32, #tpu.memory_space<vmem>>, vector<1x40x32xf32>
    %275 = vector.shape_cast %274 : vector<1x40x32xf32> to vector<40x32xf32>
    %cst_155 = arith.constant dense<0.000000e+00> : vector<32x32xf32>
    %276 = tpu.matmul %273, %275, %cst_155 {dimension_numbers = #tpu.dot_dimension_numbers<[1], [0], [0], [1], [0, 0, 1, 1], [], []>} : vector<32x40xf32>, vector<40x32xf32>, vector<32x32xf32> -> vector<32x32xf32>
    %c1_156 = arith.constant 1 : index
    %c0_157 = arith.constant 0 : index
    %c0_158 = arith.constant 0 : index
    %277 = vector.load %arg16[%c1_156, %c0_157, %c0_158] : memref<2x1x32xf32, #tpu.memory_space<vmem>>, vector<1x1x32xf32>
    %278 = vector.shape_cast %277 : vector<1x1x32xf32> to vector<1x32xf32>
    %279 = vector.broadcast %278 : vector<1x32xf32> to vector<32x32xf32>
    %280 = arith.addf %276, %279 : vector<32x32xf32>
    %281 = arith.addf %227, %280 : vector<32x32xf32>
    %c0_159 = arith.constant 0 : index
    %c0_160 = arith.constant 0 : index
    %282 = vector.load %arg17[%c0_159, %c0_160] : memref<1x32xf32, #tpu.memory_space<vmem>>, vector<1x32xf32>
    %c0_161 = arith.constant 0 : index
    %c0_162 = arith.constant 0 : index
    %283 = vector.load %arg18[%c0_161, %c0_162] : memref<1x32xf32, #tpu.memory_space<vmem>>, vector<1x32xf32>
    %cst_163 = arith.constant dense<0.000000e+00> : vector<32xf32>
    %284 = vector.multi_reduction <add>, %281, %cst_163 [1] : vector<32x32xf32> to vector<32xf32>
    %285 = vector.shape_cast %284 : vector<32xf32> to vector<32x1xf32>
    %cst_164 = arith.constant 3.200000e+01 : f32
    %286 = vector.broadcast %cst_164 : f32 to vector<32x1xf32>
    %287 = arith.divf %285, %286 : vector<32x1xf32>
    %288 = vector.broadcast %287 : vector<32x1xf32> to vector<32x32xf32>
    %289 = arith.subf %281, %288 : vector<32x32xf32>
    %290 = arith.mulf %289, %289 : vector<32x32xf32>
    %cst_165 = arith.constant dense<0.000000e+00> : vector<32xf32>
    %291 = vector.multi_reduction <add>, %290, %cst_165 [1] : vector<32x32xf32> to vector<32xf32>
    %292 = vector.shape_cast %291 : vector<32xf32> to vector<32x1xf32>
    %cst_166 = arith.constant 3.200000e+01 : f32
    %293 = vector.broadcast %cst_166 : f32 to vector<32x1xf32>
    %294 = arith.divf %292, %293 : vector<32x1xf32>
    %295 = vector.broadcast %287 : vector<32x1xf32> to vector<32x32xf32>
    %296 = arith.subf %281, %295 : vector<32x32xf32>
    %cst_167 = arith.constant 9.99999997E-7 : f32
    %297 = vector.broadcast %cst_167 : f32 to vector<32x1xf32>
    %298 = arith.addf %294, %297 : vector<32x1xf32>
    %299 = math.rsqrt %298 : vector<32x1xf32>
    %300 = vector.broadcast %299 : vector<32x1xf32> to vector<32x32xf32>
    %301 = arith.mulf %296, %300 : vector<32x32xf32>
    %302 = vector.broadcast %282 : vector<1x32xf32> to vector<32x32xf32>
    %303 = arith.mulf %301, %302 : vector<32x32xf32>
    %304 = vector.broadcast %283 : vector<1x32xf32> to vector<32x32xf32>
    %305 = arith.addf %303, %304 : vector<32x32xf32>
    %c0_168 = arith.constant 0 : index
    %c0_169 = arith.constant 0 : index
    %306 = vector.load %arg19[%c0_168, %c0_169] : memref<32x1xf32, #tpu.memory_space<vmem>>, vector<32x1xf32>
    %cst_170 = arith.constant dense<0.000000e+00> : vector<32x1xf32>
    %307 = tpu.matmul %305, %306, %cst_170 {dimension_numbers = #tpu.dot_dimension_numbers<[1], [0], [0], [1], [0, 0, 1, 1], [], []>} : vector<32x32xf32>, vector<32x1xf32>, vector<32x1xf32> -> vector<32x1xf32>
    %c0_171 = arith.constant 0 : index
    %c0_172 = arith.constant 0 : index
    %308 = vector.load %arg20[%c0_171, %c0_172] : memref<1x1xf32, #tpu.memory_space<vmem>>, vector<1x1xf32>
    %309 = vector.broadcast %308 : vector<1x1xf32> to vector<32x1xf32>
    %310 = arith.addf %307, %309 : vector<32x1xf32>
    %c0_173 = arith.constant 0 : index
    %c0_174 = arith.constant 0 : index
    %311 = vector.load %arg21[%c0_173, %c0_174] : memref<32x1xf32, #tpu.memory_space<vmem>>, vector<32x1xf32>
    tpu.vector_store %arg21[%c0_173, %c0_174], %310 {strides = array<i32>} : memref<32x1xf32, #tpu.memory_space<vmem>>, vector<32x1xf32>,
    return
  }
  func.func @transform_0(%arg0: i32) -> (i32, i32) {
    %c0_i32 = arith.constant 0 : i32
    %c0_i32_0 = arith.constant 0 : i32
    %c0_i32_1 = arith.constant 0 : i32
    return %c0_i32, %c0_i32_0 : i32, i32
  }
  func.func @transform_1(%arg0: i32) -> (i32, i32) {
    %c0_i32 = arith.constant 0 : i32
    %c0_i32_0 = arith.constant 0 : i32
    %c0_i32_1 = arith.constant 0 : i32
    return %c0_i32, %c0_i32_0 : i32, i32
  }
  func.func @transform_2(%arg0: i32) -> (i32, i32) {
    %c0_i32 = arith.constant 0 : i32
    %c0_i32_0 = arith.constant 0 : i32
    %c0_i32_1 = arith.constant 0 : i32
    return %c0_i32, %c0_i32_0 : i32, i32
  }
  func.func @transform_3(%arg0: i32) -> (i32, i32) {
    %c0_i32 = arith.constant 0 : i32
    %c0_i32_0 = arith.constant 0 : i32
    %c0_i32_1 = arith.constant 0 : i32
    return %c0_i32, %c0_i32_0 : i32, i32
  }
  func.func @transform_4(%arg0: i32) -> (i32, i32, i32) {
    %c0_i32 = arith.constant 0 : i32
    %c0_i32_0 = arith.constant 0 : i32
    %c0_i32_1 = arith.constant 0 : i32
    %c0_i32_2 = arith.constant 0 : i32
    return %c0_i32, %c0_i32_0, %c0_i32_1 : i32, i32, i32
  }
  func.func @transform_5(%arg0: i32) -> (i32, i32, i32) {
    %c0_i32 = arith.constant 0 : i32
    %c0_i32_0 = arith.constant 0 : i32
    %c0_i32_1 = arith.constant 0 : i32
    %c0_i32_2 = arith.constant 0 : i32
    return %c0_i32, %c0_i32_0, %c0_i32_1 : i32, i32, i32
  }
  func.func @transform_6(%arg0: i32) -> (i32, i32, i32) {
    %c0_i32 = arith.constant 0 : i32
    %c0_i32_0 = arith.constant 0 : i32
    %c0_i32_1 = arith.constant 0 : i32
    %c0_i32_2 = arith.constant 0 : i32
    return %c0_i32, %c0_i32_0, %c0_i32_1 : i32, i32, i32
  }
  func.func @transform_7(%arg0: i32) -> (i32, i32, i32) {
    %c0_i32 = arith.constant 0 : i32
    %c0_i32_0 = arith.constant 0 : i32
    %c0_i32_1 = arith.constant 0 : i32
    %c0_i32_2 = arith.constant 0 : i32
    return %c0_i32, %c0_i32_0, %c0_i32_1 : i32, i32, i32
  }
  func.func @transform_8(%arg0: i32) -> (i32, i32, i32) {
    %c0_i32 = arith.constant 0 : i32
    %c0_i32_0 = arith.constant 0 : i32
    %c0_i32_1 = arith.constant 0 : i32
    %c0_i32_2 = arith.constant 0 : i32
    return %c0_i32, %c0_i32_0, %c0_i32_1 : i32, i32, i32
  }
  func.func @transform_9(%arg0: i32) -> (i32, i32, i32) {
    %c0_i32 = arith.constant 0 : i32
    %c0_i32_0 = arith.constant 0 : i32
    %c0_i32_1 = arith.constant 0 : i32
    %c0_i32_2 = arith.constant 0 : i32
    return %c0_i32, %c0_i32_0, %c0_i32_1 : i32, i32, i32
  }
  func.func @transform_10(%arg0: i32) -> (i32, i32, i32) {
    %c0_i32 = arith.constant 0 : i32
    %c0_i32_0 = arith.constant 0 : i32
    %c0_i32_1 = arith.constant 0 : i32
    %c0_i32_2 = arith.constant 0 : i32
    return %c0_i32, %c0_i32_0, %c0_i32_1 : i32, i32, i32
  }
  func.func @transform_11(%arg0: i32) -> (i32, i32, i32) {
    %c0_i32 = arith.constant 0 : i32
    %c0_i32_0 = arith.constant 0 : i32
    %c0_i32_1 = arith.constant 0 : i32
    %c0_i32_2 = arith.constant 0 : i32
    return %c0_i32, %c0_i32_0, %c0_i32_1 : i32, i32, i32
  }
  func.func @transform_12(%arg0: i32) -> (i32, i32, i32) {
    %c0_i32 = arith.constant 0 : i32
    %c0_i32_0 = arith.constant 0 : i32
    %c0_i32_1 = arith.constant 0 : i32
    %c0_i32_2 = arith.constant 0 : i32
    return %c0_i32, %c0_i32_0, %c0_i32_1 : i32, i32, i32
  }
  func.func @transform_13(%arg0: i32) -> (i32, i32, i32) {
    %c0_i32 = arith.constant 0 : i32
    %c0_i32_0 = arith.constant 0 : i32
    %c0_i32_1 = arith.constant 0 : i32
    %c0_i32_2 = arith.constant 0 : i32
    return %c0_i32, %c0_i32_0, %c0_i32_1 : i32, i32, i32
  }
  func.func @transform_14(%arg0: i32) -> (i32, i32, i32) {
    %c0_i32 = arith.constant 0 : i32
    %c0_i32_0 = arith.constant 0 : i32
    %c0_i32_1 = arith.constant 0 : i32
    %c0_i32_2 = arith.constant 0 : i32
    return %c0_i32, %c0_i32_0, %c0_i32_1 : i32, i32, i32
  }
  func.func @transform_15(%arg0: i32) -> (i32, i32, i32) {
    %c0_i32 = arith.constant 0 : i32
    %c0_i32_0 = arith.constant 0 : i32
    %c0_i32_1 = arith.constant 0 : i32
    %c0_i32_2 = arith.constant 0 : i32
    return %c0_i32, %c0_i32_0, %c0_i32_1 : i32, i32, i32
  }
  func.func @transform_16(%arg0: i32) -> (i32, i32) {
    %c0_i32 = arith.constant 0 : i32
    %c0_i32_0 = arith.constant 0 : i32
    %c0_i32_1 = arith.constant 0 : i32
    return %c0_i32, %c0_i32_0 : i32, i32
  }
  func.func @transform_17(%arg0: i32) -> (i32, i32) {
    %c0_i32 = arith.constant 0 : i32
    %c0_i32_0 = arith.constant 0 : i32
    %c0_i32_1 = arith.constant 0 : i32
    return %c0_i32, %c0_i32_0 : i32, i32
  }
  func.func @transform_18(%arg0: i32) -> (i32, i32) {
    %c0_i32 = arith.constant 0 : i32
    %c0_i32_0 = arith.constant 0 : i32
    %c0_i32_1 = arith.constant 0 : i32
    return %c0_i32, %c0_i32_0 : i32, i32
  }
  func.func @transform_19(%arg0: i32) -> (i32, i32) {
    %c0_i32 = arith.constant 0 : i32
    %c0_i32_0 = arith.constant 0 : i32
    %c0_i32_1 = arith.constant 0 : i32
    return %c0_i32, %c0_i32_0 : i32, i32
  }
  func.func @transform_20(%arg0: i32) -> (i32, i32) {
    %c0_i32 = arith.constant 0 : i32
    %c0_i32_0 = arith.constant 0 : i32
    %c0_i32_1 = arith.constant 0 : i32
    return %c0_i32, %c0_i32_0 : i32, i32
  }
}

</mosaic_0001>

<bundles_post_ra>
// kernel: spectra_transformer.1
= control target key start
LH: loop header
LB: loop body
LE: loop exit
PB: predicated region body
PF: predicated region fallthrough
CT: control target
= control target key end

     0   :  { %s6661_s0 = inlined_call_operand.vmem [shape: f32[32,10], index: 0, kind: input, shape index: {}]   ;;  %s6662_s1 = inlined_call_operand.hbm [shape: f32[10,32], index: 1, kind: input, shape index: {}]   ;;  %s6663_s2 = inlined_call_operand.hbm [shape: f32[32,32], index: 2, kind: input, shape index: {}]   ;;  %s6664_s3 = inlined_call_operand.vmem [shape: f32[128,128], index: 3, kind: input, shape index: {}]   ;;  %s6665_s4 = inlined_call_operand.hbm [shape: f32[2,1,32], index: 4, kind: input, shape index: {}]   ;;  %s6666_s5 = inlined_call_operand.hbm [shape: f32[2,1,32], index: 5, kind: input, shape index: {}]   ;;  %s6667_s6 = inlined_call_operand.vmem [shape: f32[2,32,96], index: 6, kind: input, shape index: {}]   ;;  %s6668_s7 = inlined_call_operand.hbm [shape: f32[2,1,96], index: 7, kind: input, shape index: {}]   ;;  %s6669_s8 = inlined_call_operand.vmem [shape: f32[8,8,32], index: 8, kind: input, shape index: {}]   ;;  %s6670_s9 = inlined_call_operand.hbm [shape: f32[2,1,32], index: 9, kind: input, shape index: {}]   ;;  %s6671_s10 = inlined_call_operand.hbm [shape: f32[2,1,32], index: 10, kind: input, shape index: {}]   ;;  %s6672_s11 = inlined_call_operand.hbm [shape: f32[2,1,32], index: 11, kind: input, shape index: {}]   ;;  %s6673_s12 = inlined_call_operand.hbm [shape: f32[2,32,40], index: 12, kind: input, shape index: {}]   ;;  %s6674_s13 = inlined_call_operand.hbm [shape: f32[2,1,40], index: 13, kind: input, shape index: {}]   ;;  %s6675_s14 = inlined_call_operand.vmem [shape: f32[2,40,32], index: 14, kind: input, shape index: {}]   ;;  %s6676_s15 = inlined_call_operand.hbm [shape: f32[2,1,32], index: 15, kind: input, shape index: {}]   ;;  %s6677_s16 = inlined_call_operand.hbm [shape: f32[1,32], index: 16, kind: input, shape index: {}]   ;;  %s6678_s17 = inlined_call_operand.hbm [shape: f32[1,32], index: 17, kind: input, shape index: {}]   ;;  %s6679_s18 = inlined_call_operand.vmem [shape: f32[32,1], index: 18, kind: input, shape index: {}]   ;;  %s6680_s19 = inlined_call_operand.<no memory space> [shape: f32[1,1], index: 19, kind: input, shape index: {}]   ;;  %s6681_s20 = inlined_call_operand.vmem [shape: f32[32,1], index: 20, kind: output, shape index: {}]  }
   0x1   :  { %6688 = sst [smem:[#allocation31_spill]] %s6661_s0  ;;  %v25_v0 = vstv %s6680_s19 }
   0x2   :  { %6689 = sst [smem:[#allocation32_spill]] %s6662_s1  ;;  %26 = vst [vmem:[#allocation3] sm:$0x1] %v25_v0 }
   0x3   :  { %6690 = sst [smem:[#allocation33_spill]] %s6663_s2 }
   0x4   :  { %6691 = sst [smem:[#allocation34_spill]] %s6664_s3 }
   0x5   :  { %6692 = sst [smem:[#allocation35_spill]] %s6665_s4 }
   0x6   :  { %6693 = sst [smem:[#allocation36_spill]] %s6681_s20 }
   0x7   :  { %27 = vsyncpa [#allocation5], 0 }
   0x8   :  { %28 = vsyncpa [#allocation7], 0 }
   0x9   :  { %29 = vsyncpa [#allocation10], 0 }
   0xa   :  { %30 = vsyncpa [#allocation13], 0 }
   0xb   :  { %31 = vsyncpa [#allocation16], 0 }
   0xc   :  { %32 = vsyncpa [#allocation19], 0 }
   0xd   :  { %33 = vsyncpa [#allocation22], 0  ;;  %s5501_s23 = smov [#allocation6]   ;;  %s6694_s3 = sld [smem:[#allocation33_spill]] }
   0xe   :  { %s53_s24 = sshll.u32 %s5501_s23, 4  ;;  %s54_s24 = int_to_ptr.vmem [resolvable:$true] %s53_s24 }
  0x13   :  { %s5201_s26 = scalar_lea.hbm %s6694_s3, 512 }
  0x14   :  { %p5202_p0 = scmp.ne.s32.totalorder %s6694_s3, %s5201_s26  ;;  %p5205_p1 = scmp.lt.u32.totalorder %s5201_s26, %s6694_s3 }
  0x16   :  { %p5207_p2 = pnand %p5205_p1, %p5202_p0 }
  0x18   :  { %5210 = shalt.err (!%p5207_p2)
}
  0x19   :  { %s5211_s29 = scalar_lea.vmem %s54_s24, 512  ;;  %p5216_p4 = scmp.lt.s32.totalorder %s54_s24, %s54_s24 }
  0x1a   :  { %p5212_p3 = scmp.ne.s32.totalorder %s54_s24, %s5211_s29  ;;  %p5217_p5 = scmp.lt.s32.totalorder %s5211_s29, %s5211_s29 }
  0x1c   :  { %p5218_p6 = por %p5217_p5, %p5216_p4 }
  0x1e   :  { %p5219_p7 = pnand %p5218_p6, %p5212_p3 }
  0x20   :  { %5222 = shalt.err (!%p5219_p7)
}
  0x21   :  { %s5502_s30 = smov 128   ;;  %s5503_s0 = smov 8  }
  0x22   :  { %59 = dma.hbm_to_vmem [thread:$0]  %s6694_s3, 512, %s54_s24, [#allocation7], %s5502_s30, %s5502_s30, %s5503_s0  }
  0x23   :  { %s5504_s22 = smov [#allocation9]   ;;  %s5505_s2 = smov [#allocation12]  }
  0x24   :  { %s79_s23 = sshll.u32 %s5504_s22, 4  ;;  %s107_s25 = sshll.u32 %s5505_s2, 4  ;;  %s80_s23 = int_to_ptr.vmem [resolvable:$true] %s79_s23  ;;  %s108_s25 = int_to_ptr.vmem [resolvable:$true] %s107_s25 }
  0x25   :  { %s5223_s28 = scalar_lea.hbm %s6666_s5, 32 }
  0x26   :  { %p5224_p8 = scmp.ne.s32.totalorder %s6666_s5, %s5223_s28  ;;  %p5227_p9 = scmp.lt.u32.totalorder %s5223_s28, %s6666_s5 }
  0x28   :  { %p5229_p10 = pnand %p5227_p9, %p5224_p8 }
  0x2a   :  { %5232 = shalt.err (!%p5229_p10)
}
  0x2b   :  { %s5233_s24 = scalar_lea.vmem %s80_s23, 32  ;;  %p5238_p12 = scmp.lt.s32.totalorder %s80_s23, %s80_s23 }
  0x2c   :  { %p5234_p11 = scmp.ne.s32.totalorder %s80_s23, %s5233_s24  ;;  %p5239_p13 = scmp.lt.s32.totalorder %s5233_s24, %s5233_s24 }
  0x2e   :  { %p5240_p0 = por %p5239_p13, %p5238_p12 }
  0x30   :  { %p5241_p1 = pnand %p5240_p0, %p5234_p11 }
  0x32   :  { %5244 = shalt.err (!%p5241_p1)
}
  0x33   :  { %s5506_s3 = smov 16   ;;  %s5507_s21 = smov 1  }
  0x34   :  { %85 = dma.hbm_to_vmem [thread:$0]  %s6666_s5, 32, %s80_s23, [#allocation10], %s5506_s3, %s5506_s3, %s5507_s21  }
  0x35   :  { %s5245_s26 = scalar_lea.hbm %s6670_s9, 32 }
  0x36   :  { %p5246_p2 = scmp.ne.s32.totalorder %s6670_s9, %s5245_s26  ;;  %p5249_p3 = scmp.lt.u32.totalorder %s5245_s26, %s6670_s9 }
  0x38   :  { %p5251_p4 = pnand %p5249_p3, %p5246_p2 }
  0x3a   :  { %5254 = shalt.err (!%p5251_p4)
}
  0x3b   :  { %s5255_s29 = scalar_lea.vmem %s108_s25, 32  ;;  %p5260_p6 = scmp.lt.s32.totalorder %s108_s25, %s108_s25 }
  0x3c   :  { %p5256_p5 = scmp.ne.s32.totalorder %s108_s25, %s5255_s29  ;;  %p5261_p7 = scmp.lt.s32.totalorder %s5255_s29, %s5255_s29 }
  0x3e   :  { %p5262_p8 = por %p5261_p7, %p5260_p6 }
  0x40   :  { %p5263_p9 = pnand %p5262_p8, %p5256_p5 }
  0x42   :  { %5266 = shalt.err (!%p5263_p9)
}
  0x43   :  { %113 = dma.hbm_to_vmem [thread:$0]  %s6670_s9, 32, %s108_s25, [#allocation13], %s5506_s3, %s5506_s3, %s5507_s21  }
  0x44   :  { %s5508_s24 = smov [#allocation15]   ;;  %s5509_s22 = smov [#allocation18]  }
  0x45   :  { %s131_s1 = sshll.u32 %s5508_s24, 4  ;;  %s155_s20 = sshll.u32 %s5509_s22, 4  ;;  %s132_s1 = int_to_ptr.vmem [resolvable:$true] %s131_s1  ;;  %s156_s20 = int_to_ptr.vmem [resolvable:$true] %s155_s20 }
  0x46   :  { %s5267_s27 = scalar_lea.hbm %s6672_s11, 32 }
  0x47   :  { %p5268_p10 = scmp.ne.s32.totalorder %s6672_s11, %s5267_s27  ;;  %p5271_p11 = scmp.lt.u32.totalorder %s5267_s27, %s6672_s11 }
  0x49   :  { %p5273_p12 = pnand %p5271_p11, %p5268_p10 }
  0x4b   :  { %5276 = shalt.err (!%p5273_p12)
}
  0x4c   :  { %s5277_s9 = scalar_lea.vmem %s132_s1, 32  ;;  %p5282_p0 = scmp.lt.s32.totalorder %s132_s1, %s132_s1 }
  0x4d   :  { %p5278_p13 = scmp.ne.s32.totalorder %s132_s1, %s5277_s9  ;;  %p5283_p1 = scmp.lt.s32.totalorder %s5277_s9, %s5277_s9 }
  0x4f   :  { %p5284_p2 = por %p5283_p1, %p5282_p0 }
  0x51   :  { %p5285_p3 = pnand %p5284_p2, %p5278_p13 }
  0x53   :  { %5288 = shalt.err (!%p5285_p3)
}
  0x54   :  { %137 = dma.hbm_to_vmem [thread:$0]  %s6672_s11, 32, %s132_s1, [#allocation16], %s5506_s3, %s5506_s3, %s5507_s21  }
  0x55   :  { %s5289_s22 = scalar_lea.hbm %s6674_s13, 32 }
  0x56   :  { %p5290_p4 = scmp.ne.s32.totalorder %s6674_s13, %s5289_s22  ;;  %p5293_p5 = scmp.lt.u32.totalorder %s5289_s22, %s6674_s13 }
  0x58   :  { %p5295_p6 = pnand %p5293_p5, %p5290_p4 }
  0x5a   :  { %5298 = shalt.err (!%p5295_p6)
}
  0x5b   :  { %s5299_s19 = scalar_lea.vmem %s156_s20, 32  ;;  %p5304_p8 = scmp.lt.s32.totalorder %s156_s20, %s156_s20 }
  0x5c   :  { %p5300_p7 = scmp.ne.s32.totalorder %s156_s20, %s5299_s19  ;;  %p5305_p9 = scmp.lt.s32.totalorder %s5299_s19, %s5299_s19 }
  0x5e   :  { %p5306_p10 = por %p5305_p9, %p5304_p8 }
  0x60   :  { %p5307_p11 = pnand %p5306_p10, %p5300_p7 }
  0x62   :  { %5310 = shalt.err (!%p5307_p11)
}
  0x63   :  { %161 = dma.hbm_to_vmem [thread:$0]  %s6674_s13, 32, %s156_s20, [#allocation19], %s5506_s3, %s5506_s3, %s5507_s21  }
  0x64   :  { %s5510_s4 = smov [#allocation21]   ;;  %s5511_s9 = smov [#allocation4]  }
  0x65   :  { %s182_s29 = sshll.u32 %s5510_s4, 4  ;;  %s41_s25 = sshll.u32 %s5511_s9, 4  ;;  %s183_s29 = int_to_ptr.vmem [resolvable:$true] %s182_s29  ;;  %s42_s25 = int_to_ptr.vmem [resolvable:$true] %s41_s25 }
  0x66   :  { %s5311_s24 = scalar_lea.hbm %s6677_s16, 16 }
  0x67   :  { %p5312_p12 = scmp.ne.s32.totalorder %s6677_s16, %s5311_s24  ;;  %p5315_p13 = scmp.lt.u32.totalorder %s5311_s24, %s6677_s16 }
  0x69   :  { %p5317_p0 = pnand %p5315_p13, %p5312_p12 }
  0x6b   :  { %5320 = shalt.err (!%p5317_p0)
}
  0x6c   :  { %s5321_s13 = scalar_lea.vmem %s183_s29, 16  ;;  %s5325_s20 = scalar_lea.vmem %s183_s29, 32 }
  0x6d   :  { %p5322_p1 = scmp.ne.s32.totalorder %s183_s29, %s5321_s13  ;;  %p5326_p2 = scmp.lt.s32.totalorder %s183_s29, %s183_s29 }
  0x6e   :  { %p5327_p3 = scmp.lt.s32.totalorder %s5325_s20, %s5321_s13 }
  0x70   :  { %p5328_p4 = por %p5327_p3, %p5326_p2 }
  0x72   :  { %p5329_p5 = pnand %p5328_p4, %p5322_p1 }
  0x74   :  { %5332 = shalt.err (!%p5329_p5)
}
  0x75   :  { %185 = dma.hbm_to_vmem [thread:$0]  %s6677_s16, 16, %s183_s29, [#allocation22]  }
  0x76   :  { %s6695_s4 = sld [smem:[#allocation32_spill]] }
  0x7c   :  { %s5333_s9 = scalar_lea.hbm %s6695_s4, 256 }
  0x7d   :  { %p5334_p6 = scmp.ne.s32.totalorder %s6695_s4, %s5333_s9  ;;  %p5337_p7 = scmp.lt.u32.totalorder %s5333_s9, %s6695_s4 }
  0x7f   :  { %p5339_p8 = pnand %p5337_p7, %p5334_p6 }
  0x81   :  { %5342 = shalt.err (!%p5339_p8)
}
  0x82   :  { %s5343_s2 = scalar_lea.vmem %s42_s25, 256  ;;  %p5348_p10 = scmp.lt.s32.totalorder %s42_s25, %s42_s25 }
  0x83   :  { %p5344_p9 = scmp.ne.s32.totalorder %s42_s25, %s5343_s2  ;;  %p5349_p11 = scmp.lt.s32.totalorder %s5343_s2, %s5343_s2 }
  0x85   :  { %p5350_p12 = por %p5349_p11, %p5348_p10 }
  0x87   :  { %p5351_p13 = pnand %p5350_p12, %p5344_p9 }
  0x89   :  { %5354 = shalt.err (!%p5351_p13)
}
  0x8a   :  { %47 = dma.hbm_to_vmem [thread:$0]  %s6695_s4, 256, %s42_s25, [#allocation5], %s5502_s30, %s5502_s30, %s5503_s0  }
  0x8b   :  { %s5512_s26 = smov [#allocation8]   ;;  %s5513_s13 = smov [#allocation11]  }
  0x8c   :  { %s67_s27 = sshll.u32 %s5512_s26, 4  ;;  %s93_s20 = sshll.u32 %s5513_s13, 4  ;;  %s68_s27 = int_to_ptr.vmem [resolvable:$true] %s67_s27  ;;  %s94_s20 = int_to_ptr.vmem [resolvable:$true] %s93_s20 }
  0x8d   :  { %s6696_s11 = sld [smem:[#allocation35_spill]] }
  0x93   :  { %s5355_s1 = scalar_lea.hbm %s6696_s11, 32 }
  0x94   :  { %p5356_p0 = scmp.ne.s32.totalorder %s6696_s11, %s5355_s1  ;;  %p5359_p1 = scmp.lt.u32.totalorder %s5355_s1, %s6696_s11 }
  0x96   :  { %p5361_p2 = pnand %p5359_p1, %p5356_p0 }
  0x98   :  { %5364 = shalt.err (!%p5361_p2)
}
  0x99   :  { %s5365_s25 = scalar_lea.vmem %s68_s27, 32  ;;  %p5370_p4 = scmp.lt.s32.totalorder %s68_s27, %s68_s27 }
  0x9a   :  { %p5366_p3 = scmp.ne.s32.totalorder %s68_s27, %s5365_s25  ;;  %p5371_p5 = scmp.lt.s32.totalorder %s5365_s25, %s5365_s25 }
  0x9c   :  { %p5372_p6 = por %p5371_p5, %p5370_p4 }
  0x9e   :  { %p5373_p7 = pnand %p5372_p6, %p5366_p3 }
  0xa0   :  { %5376 = shalt.err (!%p5373_p7)
}
  0xa1   :  { %73 = dma.hbm_to_vmem [thread:$0]  %s6696_s11, 32, %s68_s27, [#allocation7], %s5506_s3, %s5506_s3, %s5507_s21  }
  0xa2   :  { %s5377_s29 = scalar_lea.hbm %s6668_s7, 32 }
  0xa3   :  { %p5378_p8 = scmp.ne.s32.totalorder %s6668_s7, %s5377_s29  ;;  %p5381_p9 = scmp.lt.u32.totalorder %s5377_s29, %s6668_s7 }
  0xa5   :  { %p5383_p10 = pnand %p5381_p9, %p5378_p8 }
  0xa7   :  { %5386 = shalt.err (!%p5383_p10)
}
  0xa8   :  { %s5387_s1 = scalar_lea.vmem %s94_s20, 32  ;;  %p5392_p12 = scmp.lt.s32.totalorder %s94_s20, %s94_s20 }
  0xa9   :  { %p5388_p11 = scmp.ne.s32.totalorder %s94_s20, %s5387_s1  ;;  %p5393_p13 = scmp.lt.s32.totalorder %s5387_s1, %s5387_s1 }
  0xab   :  { %p5394_p0 = por %p5393_p13, %p5392_p12 }
  0xad   :  { %p5395_p1 = pnand %p5394_p0, %p5388_p11 }
  0xaf   :  { %5398 = shalt.err (!%p5395_p1)
}
  0xb0   :  { %99 = dma.hbm_to_vmem [thread:$0]  %s6668_s7, 32, %s94_s20, [#allocation10], %s5506_s3, %s5506_s3, %s5507_s21  }
  0xb1   :  { %s5514_s9 = smov [#allocation14]   ;;  %s5515_s23 = smov [#allocation17]  }
  0xb2   :  { %s119_s5 = sshll.u32 %s5514_s9, 4  ;;  %s143_s24 = sshll.u32 %s5515_s23, 4  ;;  %s120_s5 = int_to_ptr.vmem [resolvable:$true] %s119_s5  ;;  %s144_s24 = int_to_ptr.vmem [resolvable:$true] %s143_s24 }
  0xb3   :  { %s5399_s22 = scalar_lea.hbm %s6671_s10, 32 }
  0xb4   :  { %p5400_p2 = scmp.ne.s32.totalorder %s6671_s10, %s5399_s22  ;;  %p5403_p3 = scmp.lt.u32.totalorder %s5399_s22, %s6671_s10 }
  0xb6   :  { %p5405_p4 = pnand %p5403_p3, %p5400_p2 }
  0xb8   :  { %5408 = shalt.err (!%p5405_p4)
}
  0xb9   :  { %s5409_s7 = scalar_lea.vmem %s120_s5, 32  ;;  %p5414_p6 = scmp.lt.s32.totalorder %s120_s5, %s120_s5 }
  0xba   :  { %p5410_p5 = scmp.ne.s32.totalorder %s120_s5, %s5409_s7  ;;  %p5415_p7 = scmp.lt.s32.totalorder %s5409_s7, %s5409_s7 }
  0xbc   :  { %p5416_p8 = por %p5415_p7, %p5414_p6 }
  0xbe   :  { %p5417_p9 = pnand %p5416_p8, %p5410_p5 }
  0xc0   :  { %5420 = shalt.err (!%p5417_p9)
}
  0xc1   :  { %125 = dma.hbm_to_vmem [thread:$0]  %s6671_s10, 32, %s120_s5, [#allocation13], %s5506_s3, %s5506_s3, %s5507_s21  }
  0xc2   :  { %s5421_s1 = scalar_lea.hbm %s6673_s12, 1024 }
  0xc3   :  { %p5422_p10 = scmp.ne.s32.totalorder %s6673_s12, %s5421_s1  ;;  %p5425_p11 = scmp.lt.u32.totalorder %s5421_s1, %s6673_s12 }
  0xc5   :  { %p5427_p12 = pnand %p5425_p11, %p5422_p10 }
  0xc7   :  { %5430 = shalt.err (!%p5427_p12)
}
  0xc8   :  { %s5431_s25 = scalar_lea.vmem %s144_s24, 1024  ;;  %p5436_p0 = scmp.lt.s32.totalorder %s144_s24, %s144_s24 }
  0xc9   :  { %p5432_p13 = scmp.ne.s32.totalorder %s144_s24, %s5431_s25  ;;  %p5437_p1 = scmp.lt.s32.totalorder %s5431_s25, %s5431_s25 }
  0xcb   :  { %p5438_p2 = por %p5437_p1, %p5436_p0 }
  0xcd   :  { %p5439_p3 = pnand %p5438_p2, %p5432_p13 }
  0xcf   :  { %5442 = shalt.err (!%p5439_p3)
}
  0xd0   :  { %149 = dma.hbm_to_vmem [thread:$0]  %s6673_s12, 1024, %s144_s24, [#allocation16], %s5502_s30, %s5502_s30, %s5503_s0  }
  0xd1   :  { %s5516_s4 = smov [#allocation20]   ;;  %s5517_s2 = smov [#allocation23]  }
  0xd2   :  { %s169_s22 = sshll.u32 %s5516_s4, 4  ;;  %s192_s16 = sshll.u32 %s5517_s2, 4  ;;  %s170_s22 = int_to_ptr.vmem [resolvable:$true] %s169_s22  ;;  %s193_s16 = int_to_ptr.vmem [resolvable:$true] %s192_s16 }
  0xd3   :  { %s5443_s7 = scalar_lea.hbm %s6676_s15, 32 }
  0xd4   :  { %p5444_p4 = scmp.ne.s32.totalorder %s6676_s15, %s5443_s7  ;;  %p5447_p5 = scmp.lt.u32.totalorder %s5443_s7, %s6676_s15 }
  0xd6   :  { %p5449_p6 = pnand %p5447_p5, %p5444_p4 }
  0xd8   :  { %5452 = shalt.err (!%p5449_p6)
}
  0xd9   :  { %s5453_s12 = scalar_lea.vmem %s170_s22, 32  ;;  %p5458_p8 = scmp.lt.s32.totalorder %s170_s22, %s170_s22 }
  0xda   :  { %p5454_p7 = scmp.ne.s32.totalorder %s170_s22, %s5453_s12  ;;  %p5459_p9 = scmp.lt.s32.totalorder %s5453_s12, %s5453_s12 }
  0xdc   :  { %p5460_p10 = por %p5459_p9, %p5458_p8 }
  0xde   :  { %p5461_p11 = pnand %p5460_p10, %p5454_p7 }
  0xe0   :  { %5464 = shalt.err (!%p5461_p11)
}
  0xe1   :  { %175 = dma.hbm_to_vmem [thread:$0]  %s6676_s15, 32, %s170_s22, [#allocation19], %s5506_s3, %s5506_s3, %s5507_s21  }
  0xe2   :  { %s5465_s27 = scalar_lea.hbm %s6678_s17, 16 }
  0xe3   :  { %p5466_p12 = scmp.ne.s32.totalorder %s6678_s17, %s5465_s27  ;;  %p5469_p13 = scmp.lt.u32.totalorder %s5465_s27, %s6678_s17 }
  0xe5   :  { %p5471_p0 = pnand %p5469_p13, %p5466_p12 }
  0xe7   :  { %5474 = shalt.err (!%p5471_p0)
}
  0xe8   :  { %s5475_s10 = scalar_lea.vmem %s193_s16, 16  ;;  %s5479_s5 = scalar_lea.vmem %s193_s16, 32 }
  0xe9   :  { %p5476_p1 = scmp.ne.s32.totalorder %s193_s16, %s5475_s10  ;;  %p5480_p2 = scmp.lt.s32.totalorder %s193_s16, %s193_s16 }
  0xea   :  { %p5481_p3 = scmp.lt.s32.totalorder %s5479_s5, %s5475_s10 }
  0xec   :  { %p5482_p4 = por %p5481_p3, %p5480_p2 }
  0xee   :  { %p5483_p5 = pnand %p5482_p4, %p5476_p1 }
  0xf0   :  { %5486 = shalt.err (!%p5483_p5)
}
  0xf1   :  { %195 = dma.hbm_to_vmem [thread:$0]  %s6678_s17, 16, %s193_s16, [#allocation22]  }
  0xf2   :  { %5487 = dma.done.wait [#allocation5], 256  }
  0xf3   :  { %5488 = vsyncadd [#allocation5], 4294967040 }
  0xf4   :  { %5489 = dma.done.wait [#allocation7], 544  }
  0xf5   :  { %5490 = vsyncadd [#allocation7], 4294966752 }
  0xf6   :  { %5491 = dma.done.wait [#allocation10], 64  }
  0xf7   :  { %5492 = vsyncadd [#allocation10], 4294967232 }
  0xf8   :  { %5493 = dma.done.wait [#allocation13], 64  }
  0xf9   :  { %5494 = vsyncadd [#allocation13], 4294967232 }
  0xfa   :  { %5495 = dma.done.wait [#allocation16], 1056  }
  0xfb   :  { %5496 = vsyncadd [#allocation16], 4294966240 }
  0xfc   :  { %5497 = dma.done.wait [#allocation19], 64  }
  0xfd   :  { %5498 = vsyncadd [#allocation19], 4294967232 }
  0xfe   :  { %5499 = dma.done.wait [#allocation22], 32  }
  0xff   :  { %5500 = vsyncadd [#allocation22], 4294967264  ;;  %vm262_vm0 = vcmask 1041408   ;;  %vm249_vm1 = vcmask 80896   ;;  %vm5518_vm2 = vmmov 1   ;;  %v243_v1 = vld [vmem:[#allocation4] sm:$0xff] }
 0x100   :  { %vm4573_vm3 = vmpackc.low %vm262_vm0, %vm5518_vm2  ;;  %v244_v2 = vld [vmem:[#allocation4 + $0x8] sm:$0x3]  ;;  %s6697_s4 = sld [smem:[#allocation31_spill]]  ;;  %v245_v8 = vld [vmem:[#allocation6] sm:$0xff]  ;;  %vm369_vm4 = vcmask 261120   ;;  %vm551_vm5 = vcmask 195584  }
 0x101   :  { %v4572_v4 = vpack.c.bf16 %v244_v2, %v243_v1  ;;  %v246_v10 = vld [vmem:[#allocation6 + $0x8] sm:$0xff]  ;;  %v247_v13 = vld [vmem:[#allocation6 + $0x10] sm:$0xff]  ;;  %v248_v17 = vld [vmem:[#allocation6 + $0x18] sm:$0xff]  ;;  %s5519_s1 = smov 104   ;;  %s5520_s27 = smov 80   ;;  %vm672_vm6 = vcmask 64512  }
 0x102   :  { %v443_v44 = vld [vmem:[%s6667_s6] sm:$0xff]  ;;  %v444_v45 = vld [vmem:[%s6667_s6 + $0x8] sm:$0xff]  ;;  %v445_v46 = vld [vmem:[%s6667_s6 + $0x10] sm:$0xff]  ;;  %s5521_s11 = smov 56   ;;  %s5522_s9 = smov 120   ;;  %vm1867_vm8 = vcmask 326656  }
 0x103   :  { %4574 = vmatprep.subr.msk.bf16.mxu0 %vm4573_vm3, %v4572_v4  ;;  %v4578_v47 = vpack.c.bf16 %v444_v45, %v443_v44  ;;  %v446_v48 = vld [vmem:[%s6667_s6 + $0x18] sm:$0xff]  ;;  %v3781_v63 = vld [vmem:[#allocation8] ss:$0 sm:$0xff]  ;;  %v3782_v1 = vld [vmem:[#allocation9] ss:$0 sm:$0xff]  ;;  %s5523_s23 = smov 112  }
 0x104   :  { %4577 = vmatpush3.bf16.msk.msra.mxu0 %vm4573_vm3, %v4572_v4  ;;  %v4582_v49 = vpack.c.bf16 %v446_v48, %v445_v46  ;;  %vm5940_vm7 = vmpackc.low %vm672_vm6, %vm672_vm6  ;;  %s6700_s5 = sld [smem:[#allocation34_spill]]  ;;  %vm3760_vm9 = vcmask 7168  }
 0x105   :  { %4579 = vmatprep.subr.bf16.mxu1 %v4578_v47 }
 0x106   :  { %v239_v3 = vld [vmem:[%s6697_s4] sm:$0xff]  ;;  %v240_v5 = vld [vmem:[%s6697_s4 + $0x8] sm:$0xff]  ;;  %v241_v6 = vld [vmem:[%s6697_s4 + $0x10] sm:$0xff]  ;;  %4581 = vmatpush3.bf16.msra.mxu1 %v4578_v47 }
 0x107   :  { %4176 = vmatprep.mubr.msk.f32.mxu0 %vm249_vm1, %v239_v3  ;;  %v242_v7 = vld [vmem:[%s6697_s4 + $0x18] sm:$0xff]  ;;  %4583 = vmatprep.subr.bf16.mxu1 %v4582_v49 }
 0x108   :  { %4177 = vmatmul.mubr.msk.f32.vlgmr.msra.gmra.mrb[0].mxu0 %vm249_vm1, %v240_v5 }
 0x109   :  { %4179 = vmatprep.mubr.msk.f32.mxu0 %vm249_vm1, %v241_v6 }
 0x10a   :  { %4585 = vmatpush3.bf16.msra.mxu1 %v4582_v49 }
 0x10c   :  { %4180 = vmatmul.mubr.msk.f32.gmra.mrb[2].mxu0 %vm249_vm1, %v242_v7 }
 0x1db   :  { %v4178_v9 = vpop.f32.mrb[0].mxu0 }
 0x1dc   :  { %v332_v11 = vpop.f32.mrb[1].mxu0  ;;  %v5835_v14 = vadd.f32 %v4178_v9, %v246_v10 }
 0x1dd   :  { %v5833_v12 = vadd.f32 %v332_v11, %v245_v8 }
 0x1de   :  { %v373_v22 = vsel %vm369_vm4, %v5835_v14, 0.0 }
 0x1df   :  { %v4181_v15 = vpop.f32.mrb[2].mxu0  ;;  %v370_v16 = vsel %vm369_vm4, %v5833_v12, 0.0 }
 0x1e0   :  { %v342_v18 = vpop.f32.mrb[3].mxu0  ;;  %371 = vadd.xlane.f32.xlu0 %v370_v16  ;;  %v5841_v20 = vadd.f32 %v4181_v15, %v248_v17 }
 0x1e1   :  { %v5839_v19 = vadd.f32 %v342_v18, %v247_v13  ;;  %v3783_v18 = vld [vmem:[#allocation11] ss:$0 sm:$0xff] }
 0x1e2   :  { %v379_v23 = vsel %vm369_vm4, %v5841_v20, 0.0 }
 0x1e3   :  { %v376_v21 = vsel %vm369_vm4, %v5839_v19, 0.0 }
 0x1e4   :  { %377 = vadd.xlane.f32.xlu1 %v376_v21  ;;  %374 = vadd.xlane.f32.xlu0 %v373_v22 }
 0x1e8   :  { %380 = vadd.xlane.f32.xlu1 %v379_v23 }
 0x26d   :  { %v372_v24 = vpop.xlane.xlu0 %371 }
 0x26e   :  { %v383_v25 = vmul.f32 0.03125, %v372_v24 }
 0x270   :  { %v387_v26 = vsub.f32 %v5833_v12, %v383_v25 }
 0x271   :  { %v378_v27 = vpop.xlane.xlu1 %377  ;;  %v375_v28 = vpop.xlane.xlu0 %374 }
 0x272   :  { %v385_v29 = vmul.f32 0.03125, %v378_v27  ;;  %v384_v30 = vmul.f32 0.03125, %v375_v28  ;;  %v391_v31 = vmul.f32 %v387_v26, %v387_v26 }
 0x274   :  { %v389_v32 = vsub.f32 %v5839_v19, %v385_v29  ;;  %v388_v33 = vsub.f32 %v5835_v14, %v384_v30  ;;  %v395_v34 = vsel %vm369_vm4, %v391_v31, 0.0 }
 0x275   :  { %v381_v35 = vpop.xlane.xlu1 %380  ;;  %396 = vadd.xlane.f32.xlu0 %v395_v34 }
 0x276   :  { %v386_v36 = vmul.f32 0.03125, %v381_v35  ;;  %v393_v37 = vmul.f32 %v389_v32, %v389_v32  ;;  %v392_v38 = vmul.f32 %v388_v33, %v388_v33 }
 0x278   :  { %v390_v39 = vsub.f32 %v5841_v20, %v386_v36  ;;  %v401_v40 = vsel %vm369_vm4, %v393_v37, 0.0  ;;  %v398_v41 = vsel %vm369_vm4, %v392_v38, 0.0 }
 0x279   :  { %402 = vadd.xlane.f32.xlu0 %v401_v40  ;;  %399 = vadd.xlane.f32.xlu1 %v398_v41 }
 0x27a   :  { %v394_v42 = vmul.f32 %v390_v39, %v390_v39 }
 0x27c   :  { %v404_v43 = vsel %vm369_vm4, %v394_v42, 0.0 }
 0x27d   :  { %405 = vadd.xlane.f32.xlu1 %v404_v43 }
 0x302   :  { %v397_v50 = vpop.xlane.xlu0 %396 }
 0x303   :  { %v407_v51 = vmul.f32 0.03125, %v397_v50 }
 0x305   :  { %v411_v52 = vadd.f32 1e-06, %v407_v51 }
 0x306   :  { %v400_v53 = vpop.xlane.xlu1 %399  ;;  %v403_v54 = vpop.xlane.xlu0 %402 }
 0x307   :  { %5001 = vrsqrt.f32 %v411_v52  ;;  %v408_v55 = vmul.f32 0.03125, %v400_v53  ;;  %v409_v56 = vmul.f32 0.03125, %v403_v54 }
 0x309   :  { %v412_v57 = vadd.f32 1e-06, %v408_v55  ;;  %v413_v58 = vadd.f32 1e-06, %v409_v56 }
 0x30a   :  { %v406_v59 = vpop.xlane.xlu1 %405 }
 0x30b   :  { %5003 = vrsqrt.f32 %v412_v57  ;;  %v410_v60 = vmul.f32 0.03125, %v406_v59 }
 0x30c   :  { %5005 = vrsqrt.f32 %v413_v58 }
 0x30d   :  { %v414_v61 = vadd.f32 1e-06, %v410_v60 }
 0x30f   :  { %5007 = vrsqrt.f32 %v414_v61 }
 0x311   :  { %v5002_v62 = vpop.eup %5001 }
 0x312   :  { %v419_v0 = vmul.f32 %v5002_v62, %v387_v26 }
 0x314   :  { %v429_v2 = vmul.f32 %v3781_v63, %v419_v0 }
 0x315   :  { %v5004_v3 = vpop.eup %5003 }
 0x316   :  { %v5006_v4 = vpop.eup %5005  ;;  %v439_v5 = vadd.f32 %v3782_v1, %v429_v2  ;;  %v420_v6 = vmul.f32 %v5004_v3, %v388_v33 }
 0x317   :  { %v421_v7 = vmul.f32 %v5006_v4, %v389_v32 }
 0x318   :  { %4190 = vmatprep.mubr.msk.f32.mxu1 %vm369_vm4, %v439_v5  ;;  %v430_v8 = vmul.f32 %v3781_v63, %v420_v6 }
 0x319   :  { %v5008_v9 = vpop.eup %5007  ;;  %v431_v10 = vmul.f32 %v3781_v63, %v421_v7 }
 0x31a   :  { %v440_v11 = vadd.f32 %v3782_v1, %v430_v8  ;;  %v422_v13 = vmul.f32 %v5008_v9, %v390_v39 }
 0x31b   :  { %v441_v15 = vadd.f32 %v3782_v1, %v431_v10 }
 0x31c   :  { %4191 = vmatmul.mubr.msk.f32.vlgmr.msra.gmra.mrb[0].mxu1 %vm369_vm4, %v440_v11  ;;  %v432_v16 = vmul.f32 %v3781_v63, %v422_v13 }
 0x31d   :  { %4193 = vmatprep.mubr.msk.f32.mxu1 %vm369_vm4, %v441_v15 }
 0x31e   :  { %v442_v17 = vadd.f32 %v3782_v1, %v432_v16 }
 0x320   :  { %4194 = vmatmul.mubr.msk.f32.gmra.mrb[2].mxu1 %vm369_vm4, %v442_v17 }
 0x3ef   :  { %v4192_v21 = vpop.f32.mrb[0].mxu1 }
 0x3f0   :  { %v538_v22 = vadd.f32 %v4192_v21, %v3783_v18  ;;  %v532_v23 = vpop.f32.mrb[1].mxu1 }
 0x3f1   :  { %v533_v24 = vadd.f32 %v3783_v18, %v532_v23 }
 0x3f2   :  { %553 = vst.msk [vmem:[#allocation2 + $0x8] sm:$0xff] %vm551_vm5, %v538_v22  ;;  %562 = vrot.lane.b32.xlu1 %v538_v22, %s5519_s1 }
 0x3f3   :  { %552 = vst.msk [vmem:[#allocation2] sm:$0xff] %vm551_vm5, %v533_v24  ;;  %560 = vrot.lane.b32.xlu0 %v533_v24, %s5519_s1  ;;  %v4195_v25 = vpop.f32.mrb[2].mxu1 }
 0x3f4   :  { %v548_v26 = vadd.f32 %v4195_v25, %v3783_v18  ;;  %v542_v27 = vpop.f32.mrb[3].mxu1 }
 0x3f5   :  { %v543_v28 = vadd.f32 %v3783_v18, %v542_v27 }
 0x3f6   :  { %555 = vst.msk [vmem:[#allocation2 + $0x18] sm:$0xff] %vm551_vm5, %v548_v26 }
 0x3f7   :  { %554 = vst.msk [vmem:[#allocation2 + $0x10] sm:$0xff] %vm551_vm5, %v543_v28  ;;  %576 = vrot.lane.b32.xlu0 %v533_v24, %s5520_s27  ;;  %564 = vrot.lane.b32.xlu1 %v543_v28, %s5519_s1 }
 0x3f9   :  { %v5886_v30 = vld [vmem:[#allocation2 + $0x8] sm:$0xff] }
 0x3fa   :  { %v608_v29 = vld [vmem:[#allocation2] sm:$0xff] }
 0x3fb   :  { %4228 = vmatprep.mubr.msk.f32.mxu0 %vm672_vm6, %v608_v29  ;;  %580 = vrot.lane.b32.xlu0 %v543_v28, %s5520_s27  ;;  %v5891_v31 = vpack.i.bf16 %v5886_v30, %v608_v29 }
 0x3fc   :  { %566 = vrot.lane.b32.xlu1 %v548_v26, %s5519_s1 }
 0x3fd   :  { %v5898_v33 = vld [vmem:[#allocation2 + $0x18] sm:$0xff] }
 0x3fe   :  { %v5896_v32 = vld [vmem:[#allocation2 + $0x10] sm:$0xff] }
 0x3ff   :  { %592 = vrot.lane.b32.xlu0 %v533_v24, %s5521_s11  ;;  %v5903_v34 = vpack.i.bf16 %v5898_v33, %v5896_v32 }
 0x400   :  { %578 = vrot.lane.b32.xlu1 %v538_v22, %s5520_s27 }
 0x403   :  { %596 = vrot.lane.b32.xlu0 %v543_v28, %s5521_s11 }
 0x404   :  { %582 = vrot.lane.b32.xlu1 %v548_v26, %s5520_s27 }
 0x407   :  { %4842 = vrot.lane.b32.xlu0 %v5891_v31, %s5522_s9 }
 0x408   :  { %594 = vrot.lane.b32.xlu1 %v538_v22, %s5521_s11 }
 0x40c   :  { %598 = vrot.lane.b32.xlu1 %v548_v26, %s5521_s11 }
 0x410   :  { %4847 = vrot.lane.b32.xlu1 %v5903_v34, %s5522_s9 }
 0x464   :  { %v563_v35 = vpop.permute.xlu1 %562 }
 0x465   :  { %573 = vst.msk [vmem:[#allocation2 + $0x28] sm:$0xff] %vm551_vm5, %v563_v35  ;;  %v561_v36 = vpop.permute.xlu0 %560 }
 0x466   :  { %572 = vst.msk [vmem:[#allocation2 + $0x20] sm:$0xff] %vm551_vm5, %v561_v36 }
 0x469   :  { %v565_v37 = vpop.permute.xlu1 %564  ;;  %v577_v38 = vpop.permute.xlu0 %576 }
 0x46a   :  { %574 = vst.msk [vmem:[#allocation2 + $0x30] sm:$0xff] %vm551_vm5, %v565_v37  ;;  %588 = vst.msk [vmem:[#allocation2 + $0x40] sm:$0xff] %vm551_vm5, %v577_v38 }
 0x46c   :  { %v5911_v39 = vld [vmem:[#allocation2 + $0x28] sm:$0xff] }
 0x46d   :  { %v581_v40 = vpop.permute.xlu0 %580  ;;  %v5913_v41 = vld [vmem:[#allocation2 + $0x20] sm:$0xff] }
 0x46e   :  { %v567_v42 = vpop.permute.xlu1 %566  ;;  %590 = vst.msk [vmem:[#allocation2 + $0x50] sm:$0xff] %vm551_vm5, %v581_v40  ;;  %v4851_v43 = vpack.i.bf16 %v5911_v39, %v5913_v41 }
 0x46f   :  { %575 = vst.msk [vmem:[#allocation2 + $0x38] sm:$0xff] %vm551_vm5, %v567_v42 }
 0x470   :  { %4852 = vrot.lane.b32.xlu0 %v4851_v43, %s5522_s9 }
 0x471   :  { %v593_v44 = vpop.permute.xlu0 %592  ;;  %v5923_v48 = vld [vmem:[#allocation2 + $0x30] sm:$0xff]  ;;  %v5931_v55 = vld [vmem:[#allocation2 + $0x40] sm:$0xff] }
 0x472   :  { %v579_v45 = vpop.permute.xlu1 %578  ;;  %604 = vst.msk [vmem:[#allocation2 + $0x60] sm:$0xff] %vm551_vm5, %v593_v44 }
 0x473   :  { %589 = vst.msk [vmem:[#allocation2 + $0x48] sm:$0xff] %vm551_vm5, %v579_v45 }
 0x475   :  { %v597_v46 = vpop.permute.xlu0 %596  ;;  %v5947_v61 = vld [vmem:[#allocation2 + $0x50] sm:$0xff] }
 0x476   :  { %v583_v47 = vpop.permute.xlu1 %582  ;;  %606 = vst.msk [vmem:[#allocation2 + $0x70] sm:$0xff] %vm551_vm5, %v597_v46  ;;  %v5925_v49 = vld [vmem:[#allocation2 + $0x38] sm:$0xff] }
 0x477   :  { %591 = vst.msk [vmem:[#allocation2 + $0x58] sm:$0xff] %vm551_vm5, %v583_v47  ;;  %v4856_v50 = vpack.i.bf16 %v5925_v49, %v5923_v48 }
 0x479   :  { %4857 = vrot.lane.b32.xlu1 %v4856_v50, %s5522_s9  ;;  %v4843_v51 = vpop.permute.xlu0 %4842  ;;  %v5957_v1 = vld [vmem:[#allocation2 + $0x60] sm:$0xff] }
 0x47a   :  { %v595_v52 = vpop.permute.xlu1 %594  ;;  %v4845_v53 = vunpack.i.h.bf16 %v4843_v51  ;;  %v4844_v54 = vunpack.i.l.bf16 %v4843_v51  ;;  %v5933_v56 = vld [vmem:[#allocation2 + $0x48] sm:$0xff] }
 0x47b   :  { %605 = vst.msk [vmem:[#allocation2 + $0x68] sm:$0xff] %vm551_vm5, %v595_v52  ;;  %v4861_v57 = vpack.i.bf16 %v5933_v56, %v5931_v55 }
 0x47c   :  { %v4586_v59 = vpack.c.bf16 %v4845_v53, %v4844_v54 }
 0x47d   :  { %4862 = vrot.lane.b32.xlu0 %v4861_v57, %s5522_s9  ;;  %v5967_v7 = vld [vmem:[#allocation2 + $0x70] sm:$0xff] }
 0x47e   :  { %v599_v60 = vpop.permute.xlu1 %598  ;;  %4588 = vmatprep.subr.msk.bf16.mxu0 %vm5940_vm7, %v4586_v59  ;;  %v5949_v62 = vld [vmem:[#allocation2 + $0x58] sm:$0xff] }
 0x47f   :  { %607 = vst.msk [vmem:[#allocation2 + $0x78] sm:$0xff] %vm551_vm5, %v599_v60  ;;  %4591 = vmatpush3.bf16.xpose.msk.msra.mxu0 %vm5940_vm7, %v4586_v59  ;;  %v4866_v63 = vpack.i.bf16 %v5949_v62, %v5947_v61 }
 0x481   :  { %4867 = vrot.lane.b32.xlu1 %v4866_v63, %s5522_s9 }
 0x482   :  { %v4848_v0 = vpop.permute.xlu1 %4847  ;;  %v5959_v2 = vld [vmem:[#allocation2 + $0x68] sm:$0xff] }
 0x483   :  { %v4850_v3 = vunpack.i.h.bf16 %v4848_v0  ;;  %v4849_v4 = vunpack.i.l.bf16 %v4848_v0  ;;  %v5963_v5 = vpack.i.bf16 %v5959_v2, %v5957_v1 }
 0x485   :  { %v4592_v6 = vpack.c.bf16 %v4850_v3, %v4849_v4  ;;  %4872 = vrot.lane.b32.xlu0 %v5963_v5, %s5522_s9 }
 0x486   :  { %v5969_v8 = vld [vmem:[#allocation2 + $0x78] sm:$0xff] }
 0x487   :  { %4594 = vmatprep.subr.msk.bf16.mxu0 %vm5940_vm7, %v4592_v6  ;;  %v5975_v9 = vpack.i.bf16 %v5969_v8, %v5967_v7 }
 0x488   :  { %4597 = vmatpush3.bf16.xpose.msk.msra.mxu0 %vm5940_vm7, %v4592_v6 }
 0x489   :  { %4882 = vrot.lane.b32.xlu0 %v5891_v31, %s5523_s23  ;;  %4877 = vrot.lane.b32.xlu1 %v5975_v9, %s5522_s9 }
 0x48d   :  { %4887 = vrot.lane.b32.xlu0 %v5903_v34, %s5523_s23  ;;  %4892 = vrot.lane.b32.xlu1 %v4851_v43, %s5523_s23 }
 0x491   :  { %4902 = vrot.lane.b32.xlu0 %v4856_v50, %s5523_s23  ;;  %4897 = vrot.lane.b32.xlu1 %v4861_v57, %s5523_s23 }
 0x495   :  { %4907 = vrot.lane.b32.xlu0 %v4866_v63, %s5523_s23 }
 0x4e2   :  { %v4853_v10 = vpop.permute.xlu0 %4852 }
 0x4e3   :  { %v4855_v11 = vunpack.i.h.bf16 %v4853_v10  ;;  %v4854_v13 = vunpack.i.l.bf16 %v4853_v10 }
 0x4e5   :  { %v4598_v15 = vpack.c.bf16 %v4855_v11, %v4854_v13 }
 0x4e7   :  { %4600 = vmatprep.subr.msk.bf16.mxu0 %vm5940_vm7, %v4598_v15 }
 0x4e8   :  { %4603 = vmatpush3.bf16.xpose.msk.msra.mxu0 %vm5940_vm7, %v4598_v15 }
 0x4eb   :  { %v4858_v16 = vpop.permute.xlu1 %4857 }
 0x4ec   :  { %v4860_v17 = vunpack.i.h.bf16 %v4858_v16  ;;  %v4859_v18 = vunpack.i.l.bf16 %v4858_v16 }
 0x4ee   :  { %v4604_v21 = vpack.c.bf16 %v4860_v17, %v4859_v18 }
 0x4ef   :  { %v4863_v22 = vpop.permute.xlu0 %4862 }
 0x4f0   :  { %v4865_v23 = vunpack.i.h.bf16 %v4863_v22  ;;  %v4864_v24 = vunpack.i.l.bf16 %v4863_v22  ;;  %4606 = vmatprep.subr.msk.bf16.mxu0 %vm5940_vm7, %v4604_v21 }
 0x4f1   :  { %4609 = vmatpush3.bf16.xpose.msk.msra.mxu0 %vm5940_vm7, %v4604_v21  ;;  %v355_v21 = vld [vmem:[%s6700_s5 + $0x20] sm:$0xff] }
 0x4f2   :  { %v4610_v25 = vpack.c.bf16 %v4865_v23, %v4864_v24 }
 0x4f3   :  { %v4868_v26 = vpop.permute.xlu1 %4867 }
 0x4f4   :  { %v4870_v27 = vunpack.i.h.bf16 %v4868_v26  ;;  %v4869_v28 = vunpack.i.l.bf16 %v4868_v26  ;;  %4612 = vmatprep.subr.msk.bf16.mxu0 %vm5940_vm7, %v4610_v25 }
 0x4f6   :  { %v4616_v31 = vpack.c.bf16 %v4870_v27, %v4869_v28 }
 0x4f7   :  { %v4873_v29 = vpop.permute.xlu0 %4872 }
 0x4f8   :  { %v4875_v34 = vunpack.i.h.bf16 %v4873_v29  ;;  %v4874_v35 = vunpack.i.l.bf16 %v4873_v29  ;;  %v357_v29 = vld [vmem:[%s6700_s5 + $0x30] sm:$0xff] }
 0x4f9   :  { %4615 = vmatpush3.bf16.xpose.msk.msra.mxu0 %vm5940_vm7, %v4610_v25  ;;  %v358_v25 = vld [vmem:[%s6700_s5 + $0x38] sm:$0xff] }
 0x4fa   :  { %4618 = vmatprep.subr.msk.bf16.mxu0 %vm5940_vm7, %v4616_v31  ;;  %v4622_v43 = vpack.c.bf16 %v4875_v34, %v4874_v35 }
 0x4fb   :  { %v4878_v36 = vpop.permute.xlu1 %4877  ;;  %v4883_v37 = vpop.permute.xlu0 %4882 }
 0x4fc   :  { %v4885_v38 = vunpack.i.h.bf16 %v4883_v37  ;;  %v4884_v40 = vunpack.i.l.bf16 %v4883_v37  ;;  %v4880_v53 = vunpack.i.h.bf16 %v4878_v36  ;;  %v4879_v57 = vunpack.i.l.bf16 %v4878_v36 }
 0x4fe   :  { %v4634_v42 = vpack.c.bf16 %v4885_v38, %v4884_v40  ;;  %v4628_v3 = vpack.c.bf16 %v4880_v53, %v4879_v57  ;;  %v365_v53 = vld [vmem:[%s6700_s5 + $0x70] sm:$0xff] }
 0x4ff   :  { %v4893_v44 = vpop.permute.xlu1 %4892  ;;  %v4888_v45 = vpop.permute.xlu0 %4887 }
 0x500   :  { %v4895_v46 = vunpack.i.h.bf16 %v4893_v44  ;;  %v4894_v47 = vunpack.i.l.bf16 %v4893_v44  ;;  %v4890_v50 = vunpack.i.h.bf16 %v4888_v45  ;;  %v4889_v51 = vunpack.i.l.bf16 %v4888_v45  ;;  %4635 = vmatprep.subr.bf16.mxu1 %v4634_v42  ;;  %v362_v44 = vld [vmem:[%s6700_s5 + $0x58] sm:$0xff] }
 0x501   :  { %4621 = vmatpush3.bf16.xpose.msk.msra.mxu0 %vm5940_vm7, %v4616_v31  ;;  %4637 = vmatpush3.bf16.msra.mxu1 %v4634_v42  ;;  %v359_v42 = vld [vmem:[%s6700_s5 + $0x40] sm:$0xff] }
 0x502   :  { %4624 = vmatprep.subr.msk.bf16.mxu0 %vm5940_vm7, %v4622_v43  ;;  %v4638_v52 = vpack.c.bf16 %v4890_v50, %v4889_v51  ;;  %v4642_v63 = vpack.c.bf16 %v4895_v46, %v4894_v47  ;;  %v360_v46 = vld [vmem:[%s6700_s5 + $0x48] sm:$0xff]  ;;  %v363_v47 = vld [vmem:[%s6700_s5 + $0x60] sm:$0xff] }
 0x503   :  { %v4903_v54 = vpop.permute.xlu0 %4902  ;;  %v4898_v0 = vpop.permute.xlu1 %4897 }
 0x504   :  { %v4905_v59 = vunpack.i.h.bf16 %v4903_v54  ;;  %v4904_v60 = vunpack.i.l.bf16 %v4903_v54  ;;  %4639 = vmatprep.subr.bf16.mxu1 %v4638_v52  ;;  %v4900_v4 = vunpack.i.h.bf16 %v4898_v0  ;;  %v4899_v6 = vunpack.i.l.bf16 %v4898_v0 }
 0x505   :  { %4641 = vmatpush3.bf16.msra.mxu1 %v4638_v52  ;;  %v364_v52 = vld [vmem:[%s6700_s5 + $0x68] sm:$0xff] }
 0x506   :  { %4643 = vmatprep.subr.bf16.mxu1 %v4642_v63  ;;  %v4646_v10 = vpack.c.bf16 %v4905_v59, %v4904_v60  ;;  %v4650_v16 = vpack.c.bf16 %v4900_v4, %v4899_v6  ;;  %v366_v59 = vld [vmem:[%s6700_s5 + $0x78] sm:$0xff] }
 0x507   :  { %v4908_v11 = vpop.permute.xlu0 %4907 }
 0x508   :  { %v4910_v13 = vunpack.i.h.bf16 %v4908_v11  ;;  %v4909_v15 = vunpack.i.l.bf16 %v4908_v11 }
 0x509   :  { %4627 = vmatpush3.bf16.xpose.msk.msra.mxu0 %vm5940_vm7, %v4622_v43  ;;  %4645 = vmatpush3.bf16.msra.mxu1 %v4642_v63 }
 0x50a   :  { %4630 = vmatprep.subr.msk.bf16.mxu0 %vm5940_vm7, %v4628_v3  ;;  %4647 = vmatprep.subr.bf16.mxu1 %v4646_v10  ;;  %v4654_v17 = vpack.c.bf16 %v4910_v13, %v4909_v15 }
 0x50d   :  { %4649 = vmatpush3.bf16.msra.mxu1 %v4646_v10 }
 0x50e   :  { %4651 = vmatprep.subr.bf16.mxu1 %v4650_v16 }
 0x511   :  { %4633 = vmatpush3.bf16.xpose.msk.msra.mxu0 %vm5940_vm7, %v4628_v3  ;;  %4653 = vmatpush3.bf16.msra.mxu1 %v4650_v16 }
 0x512   :  { %4655 = vmatprep.subr.bf16.mxu1 %v4654_v17 }
 0x515   :  { %4657 = vmatpush3.bf16.msra.mxu1 %v4654_v17 }
 0x518   :  { %4229 = vmatmul.mubr.msk.f32.vlgmr.msra.gmra.mrb[4].mxu0 %vm672_vm6, %v5886_v30  ;;  %v352_v30 = vld [vmem:[%s6700_s5 + $0x8] sm:$0xff] }
 0x519   :  { %4231 = vmatprep.mubr.msk.f32.mxu0 %vm672_vm6, %v5896_v32  ;;  %v351_v32 = vld [vmem:[%s6700_s5] sm:$0xff] }
 0x51c   :  { %4232 = vmatmul.mubr.msk.f32.gmra.mrb[6].mxu0 %vm672_vm6, %v5898_v33 }
 0x51d   :  { %4234 = vmatprep.mubr.msk.f32.mxu0 %vm672_vm6, %v5913_v41 }
 0x520   :  { %4235 = vmatmul.mubr.msk.f32.gmra.mrb[8].mxu0 %vm672_vm6, %v5911_v39 }
 0x521   :  { %4237 = vmatprep.mubr.msk.f32.mxu0 %vm672_vm6, %v5923_v48 }
 0x524   :  { %4238 = vmatmul.mubr.msk.f32.gmra.mrb[10].mxu0 %vm672_vm6, %v5925_v49  ;;  %v354_v49 = vld [vmem:[%s6700_s5 + $0x18] sm:$0xff] }
 0x525   :  { %4240 = vmatprep.mubr.msk.f32.mxu0 %vm672_vm6, %v5931_v55 }
 0x528   :  { %4241 = vmatmul.mubr.msk.f32.gmra.mrb[12].mxu0 %vm672_vm6, %v5933_v56 }
 0x529   :  { %4243 = vmatprep.mubr.msk.f32.mxu0 %vm672_vm6, %v5947_v61 }
 0x52c   :  { %4244 = vmatmul.mubr.msk.f32.gmra.mrb[14].mxu0 %vm672_vm6, %v5949_v62  ;;  %v353_v62 = vld [vmem:[%s6700_s5 + $0x10] sm:$0xff] }
 0x52d   :  { %4246 = vmatprep.mubr.msk.f32.mxu0 %vm672_vm6, %v5957_v1  ;;  %v356_v1 = vld [vmem:[%s6700_s5 + $0x28] sm:$0xff] }
 0x530   :  { %4247 = vmatmul.mubr.msk.f32.gmra.mrb[16].mxu0 %vm672_vm6, %v5959_v2 }
 0x531   :  { %4249 = vmatprep.mubr.msk.f32.mxu0 %vm672_vm6, %v5967_v7 }
 0x534   :  { %4250 = vmatmul.mubr.msk.f32.gmra.mrb[18].mxu0 %vm672_vm6, %v5969_v8 }
 0x5eb   :  { %v4230_v33 = vpop.f32.mrb[4].mxu0 }
 0x5ec   :  { %v6049_v39 = vadd.f32 %v4230_v33, %v352_v30  ;;  %v803_v41 = vpop.f32.mrb[5].mxu0 }
 0x5ed   :  { %v6051_v48 = vadd.f32 %v803_v41, %v351_v32 }
 0x5ee   :  { %884 = vmax.xlane.f32.xlu0 %v6049_v39 }
 0x5ef   :  { %v4233_v55 = vpop.f32.mrb[6].mxu0  ;;  %882 = vmax.xlane.f32.xlu1 %v6051_v48 }
 0x5f0   :  { %v6058_v56 = vadd.f32 %v4233_v55, %v354_v49  ;;  %v813_v61 = vpop.f32.mrb[7].mxu0 }
 0x5f1   :  { %v6067_v7 = vadd.f32 %v813_v61, %v353_v62 }
 0x5f2   :  { %888 = vmax.xlane.f32.xlu0 %v6058_v56 }
 0x5f3   :  { %v4236_v2 = vpop.f32.mrb[8].mxu0 }
 0x5f4   :  { %v829_v8 = vadd.f32 %v4236_v2, %v356_v1  ;;  %v823_v18 = vpop.f32.mrb[9].mxu0 }
 0x5f5   :  { %v824_v23 = vadd.f32 %v823_v18, %v355_v21 }
 0x5f6   :  { %886 = vmax.xlane.f32.xlu0 %v6067_v7  ;;  %892 = vmax.xlane.f32.xlu1 %v829_v8 }
 0x5f7   :  { %v4239_v22 = vpop.f32.mrb[10].mxu0 }
 0x5f8   :  { %v833_v24 = vpop.f32.mrb[11].mxu0  ;;  %v6076_v27 = vadd.f32 %v4239_v22, %v358_v25 }
 0x5f9   :  { %v6082_v34 = vadd.f32 %v833_v24, %v357_v29 }
 0x5fa   :  { %890 = vmax.xlane.f32.xlu0 %v824_v23 }
 0x5fb   :  { %v4242_v26 = vpop.f32.mrb[12].mxu0 }
 0x5fc   :  { %v843_v28 = vpop.f32.mrb[13].mxu0  ;;  %v6113_v50 = vadd.f32 %v4242_v26, %v360_v46 }
 0x5fd   :  { %v6092_v43 = vadd.f32 %v843_v28, %v359_v42 }
 0x5fe   :  { %896 = vmax.xlane.f32.xlu0 %v6076_v27 }
 0x5ff   :  { %v4245_v31 = vpop.f32.mrb[14].mxu0 }
 0x600   :  { %v853_v35 = vpop.f32.mrb[15].mxu0  ;;  %v6098_v45 = vadd.f32 %v4245_v31, %v362_v44 }
 0x602   :  { %894 = vmax.xlane.f32.xlu0 %v6082_v34 }
 0x603   :  { %v4248_v36 = vpop.f32.mrb[16].mxu0 }
 0x604   :  { %v863_v37 = vpop.f32.mrb[17].mxu0  ;;  %v6125_v54 = vadd.f32 %v4248_v36, %v364_v52 }
 0x605   :  { %v6115_v51 = vadd.f32 %v863_v37, %v363_v47 }
 0x607   :  { %v4251_v38 = vpop.f32.mrb[18].mxu0  ;;  %4912 = vrot.lane.b32.xlu1 %v5963_v5, %s5523_s23  ;;  %v361_v5 = vld [vmem:[%s6700_s5 + $0x50] sm:$0xff] }
 0x608   :  { %v873_v40 = vpop.f32.mrb[19].mxu0  ;;  %v6134_v60 = vadd.f32 %v4251_v38, %v366_v59 }
 0x609   :  { %v6127_v57 = vadd.f32 %v873_v40, %v365_v53 }
 0x618   :  { %4917 = vrot.lane.b32.xlu0 %v5975_v9, %s5523_s23  ;;  %v6104_v9 = vadd.f32 %v853_v35, %v361_v5 }
 0x62b   :  { %898 = vmax.xlane.f32.xlu1 %v6092_v43 }
 0x62f   :  { %904 = vmax.xlane.f32.xlu1 %v6098_v45 }
 0x633   :  { %902 = vmax.xlane.f32.xlu1 %v6104_v9 }
 0x637   :  { %900 = vmax.xlane.f32.xlu0 %v6113_v50  ;;  %906 = vmax.xlane.f32.xlu1 %v6115_v51 }
 0x63b   :  { %910 = vmax.xlane.f32.xlu0 %v6127_v57  ;;  %908 = vmax.xlane.f32.xlu1 %v6125_v54 }
 0x63f   :  { %912 = vmax.xlane.f32.xlu1 %v6134_v60 }
 0x67b   :  { %v885_v63 = vpop.xlane.xlu0 %884 }
 0x67c   :  { %v883_v0 = vpop.xlane.xlu1 %882  ;;  %v915_v41 = vsub.f32 %v6049_v39, %v885_v63 }
 0x67d   :  { %v914_v3 = vsub.f32 %v6051_v48, %v883_v0 }
 0x67e   :  { %v932_v2 = vmul.f32 1.442695, %v915_v41  ;;  %v1219_v41 = vld [vmem:[%s6669_s8] sm:$0xff] }
 0x67f   :  { %v930_v4 = vmul.f32 1.442695, %v914_v3  ;;  %v889_v6 = vpop.xlane.xlu0 %888 }
 0x681   :  { %5009 = vpow2.f32 %v930_v4 }
 0x683   :  { %v887_v10 = vpop.xlane.xlu0 %886  ;;  %v893_v11 = vpop.xlane.xlu1 %892 }
 0x684   :  { %v919_v13 = vsub.f32 %v829_v8, %v893_v11  ;;  %v916_v49 = vsub.f32 %v6067_v7, %v887_v10  ;;  %v917_v8 = vsub.f32 %v6058_v56, %v889_v6 }
 0x686   :  { %v940_v15 = vmul.f32 1.442695, %v919_v13  ;;  %v934_v18 = vmul.f32 1.442695, %v916_v49  ;;  %v936_v7 = vmul.f32 1.442695, %v917_v8 }
 0x687   :  { %v891_v16 = vpop.xlane.xlu0 %890  ;;  %v4913_v17 = vpop.permute.xlu1 %4912 }
 0x688   :  { %v918_v30 = vsub.f32 %v824_v23, %v891_v16  ;;  %v4915_v32 = vunpack.i.h.bf16 %v4913_v17  ;;  %v4914_v33 = vunpack.i.l.bf16 %v4913_v17  ;;  %5011 = vpow2.f32 %v940_v15 }
 0x68a   :  { %v938_v55 = vmul.f32 1.442695, %v918_v30  ;;  %v4658_v61 = vpack.c.bf16 %v4915_v32, %v4914_v33  ;;  %v3820_v33 = vld [vmem:[%s6669_s8 + $0x8] sm:$0xff] }
 0x68b   :  { %v5010_v48 = vpop.eup %5009  ;;  %v897_v62 = vpop.xlane.xlu0 %896 }
 0x68c   :  { %5013 = vpow2.f32 %v938_v55  ;;  %v921_v1 = vsub.f32 %v6076_v27, %v897_v62  ;;  %4659 = vmatprep.subr.bf16.mxu1 %v4658_v61  ;;  %4284 = vmatprep.mubr.f32.mxu1 %v5010_v48 }
 0x68d   :  { %4661 = vmatpush3.bf16.msra.mxu1 %v4658_v61 }
 0x68e   :  { %v944_v21 = vmul.f32 1.442695, %v921_v1 }
 0x68f   :  { %v895_v22 = vpop.xlane.xlu0 %894 }
 0x690   :  { %5015 = vpow2.f32 %v944_v21  ;;  %v920_v39 = vsub.f32 %v6082_v34, %v895_v22 }
 0x691   :  { %5017 = vpow2.f32 %v932_v2 }
 0x692   :  { %5019 = vpow2.f32 %v934_v18  ;;  %v942_v23 = vmul.f32 1.442695, %v920_v39  ;;  %v5012_v24 = vpop.eup %5011 }
 0x693   :  { %v4918_v25 = vpop.permute.xlu0 %4917  ;;  %972 = vadd.xlane.f32.xlu1 %v5012_v24 }
 0x694   :  { %5021 = vpow2.f32 %v942_v23  ;;  %v4920_v26 = vunpack.i.h.bf16 %v4918_v25  ;;  %v4919_v27 = vunpack.i.l.bf16 %v4918_v25 }
 0x695   :  { %5023 = vpow2.f32 %v936_v7 }
 0x696   :  { %v5014_v28 = vpop.eup %5013  ;;  %v4662_v56 = vpack.c.bf16 %v4920_v26, %v4919_v27 }
 0x697   :  { %970 = vadd.xlane.f32.xlu0 %v5014_v28 }
 0x698   :  { %4663 = vmatprep.subr.bf16.mxu1 %v4662_v56 }
 0x699   :  { %4665 = vmatpush3.bf16.msra.mxu1 %v4662_v56  ;;  %v3829_v56 = vld [vmem:[%s6669_s8 + $0x10] sm:$0xff] }
 0x69a   :  { %v5016_v29 = vpop.eup %5015  ;;  %4308 = vmatprep.subr.mxu1 %v3820_v33 }
 0x69b   :  { %v5018_v31 = vpop.eup %5017  ;;  %976 = vadd.xlane.f32.xlu1 %v5016_v29 }
 0x69c   :  { %v5020_v34 = vpop.eup %5019  ;;  %4285 = vmatmul.mubr.f32.vlgmr.msra.gmra.mrb[4].mxu1 %v5018_v31 }
 0x69d   :  { %4287 = vmatprep.mubr.f32.mxu1 %v5020_v34  ;;  %4309 = vmatpush3.msra.mxu1 %v3820_v33 }
 0x69e   :  { %v5022_v35 = vpop.eup %5021  ;;  %4316 = vmatprep.subr.mxu1 %v1219_v41 }
 0x69f   :  { %v5024_v36 = vpop.eup %5023  ;;  %974 = vadd.xlane.f32.xlu0 %v5022_v35  ;;  %964 = vadd.xlane.f32.xlu1 %v5018_v31 }
 0x6a0   :  { %4288 = vmatmul.mubr.f32.gmra.mrb[6].mxu1 %v5024_v36 }
 0x6a1   :  { %4290 = vmatprep.mubr.f32.mxu1 %v5014_v28 }
 0x6a3   :  { %962 = vadd.xlane.f32.xlu0 %v5010_v48  ;;  %968 = vadd.xlane.f32.xlu1 %v5024_v36 }
 0x6a4   :  { %4291 = vmatmul.mubr.f32.gmra.mrb[8].mxu1 %v5012_v24 }
 0x6a5   :  { %4293 = vmatprep.mubr.f32.mxu1 %v5022_v35 }
 0x6a7   :  { %966 = vadd.xlane.f32.xlu0 %v5020_v34 }
 0x6a8   :  { %4294 = vmatmul.mubr.f32.gmra.mrb[10].mxu1 %v5016_v29 }
 0x6b8   :  { %v899_v37 = vpop.xlane.xlu1 %898 }
 0x6b9   :  { %v922_v38 = vsub.f32 %v6092_v43, %v899_v37 }
 0x6bb   :  { %v946_v40 = vmul.f32 1.442695, %v922_v38 }
 0x6bc   :  { %v905_v42 = vpop.xlane.xlu1 %904 }
 0x6bd   :  { %5025 = vpow2.f32 %v946_v40  ;;  %v925_v47 = vsub.f32 %v6098_v45, %v905_v42 }
 0x6bf   :  { %v952_v43 = vmul.f32 1.442695, %v925_v47 }
 0x6c0   :  { %v903_v44 = vpop.xlane.xlu1 %902 }
 0x6c1   :  { %v924_v5 = vsub.f32 %v6104_v9, %v903_v44 }
 0x6c3   :  { %v950_v46 = vmul.f32 1.442695, %v924_v5 }
 0x6c4   :  { %v901_v52 = vpop.xlane.xlu0 %900  ;;  %v907_v53 = vpop.xlane.xlu1 %906 }
 0x6c5   :  { %5027 = vpow2.f32 %v950_v46  ;;  %v923_v59 = vsub.f32 %v6113_v50, %v901_v52  ;;  %v926_v63 = vsub.f32 %v6115_v51, %v907_v53  ;;  %v3834_v46 = vld [vmem:[%s6669_s8 + $0x18] sm:$0xff] }
 0x6c7   :  { %v5026_v0 = vpop.eup %5025  ;;  %v948_v3 = vmul.f32 1.442695, %v923_v59  ;;  %v954_v4 = vmul.f32 1.442695, %v926_v63 }
 0x6c8   :  { %v911_v6 = vpop.xlane.xlu0 %910  ;;  %978 = vadd.xlane.f32.xlu0 %v5026_v0  ;;  %v909_v10 = vpop.xlane.xlu1 %908  ;;  %4296 = vmatprep.mubr.f32.mxu1 %v5026_v0 }
 0x6c9   :  { %5029 = vpow2.f32 %v948_v3  ;;  %v928_v9 = vsub.f32 %v6127_v57, %v911_v6  ;;  %v927_v45 = vsub.f32 %v6125_v54, %v909_v10 }
 0x6ca   :  { %5031 = vpow2.f32 %v954_v4 }
 0x6cb   :  { %v958_v11 = vmul.f32 1.442695, %v928_v9  ;;  %5033 = vpow2.f32 %v952_v43  ;;  %v956_v50 = vmul.f32 1.442695, %v927_v45 }
 0x6cc   :  { %v913_v13 = vpop.xlane.xlu1 %912 }
 0x6cd   :  { %5035 = vpow2.f32 %v958_v11  ;;  %v929_v51 = vsub.f32 %v6134_v60, %v913_v13 }
 0x6ce   :  { %5037 = vpow2.f32 %v956_v50 }
 0x6cf   :  { %v5028_v15 = vpop.eup %5027  ;;  %v960_v16 = vmul.f32 1.442695, %v929_v51 }
 0x6d0   :  { %982 = vadd.xlane.f32.xlu0 %v5028_v15 }
 0x6d1   :  { %5039 = vpow2.f32 %v960_v16 }
 0x6d3   :  { %v5030_v17 = vpop.eup %5029 }
 0x6d4   :  { %v5032_v30 = vpop.eup %5031  ;;  %980 = vadd.xlane.f32.xlu1 %v5030_v17  ;;  %4297 = vmatmul.mubr.f32.gmra.mrb[12].mxu1 %v5030_v17 }
 0x6d5   :  { %986 = vadd.xlane.f32.xlu0 %v5032_v30  ;;  %4299 = vmatprep.mubr.f32.mxu1 %v5028_v15  ;;  %v5034_v54 = vpop.eup %5033 }
 0x6d7   :  { %v5036_v57 = vpop.eup %5035 }
 0x6d8   :  { %984 = vadd.xlane.f32.xlu1 %v5034_v54  ;;  %4300 = vmatmul.mubr.f32.gmra.mrb[14].mxu1 %v5034_v54  ;;  %v5038_v32 = vpop.eup %5037 }
 0x6d9   :  { %990 = vadd.xlane.f32.xlu0 %v5036_v57  ;;  %4302 = vmatprep.mubr.f32.mxu1 %v5032_v30 }
 0x6db   :  { %v5040_v60 = vpop.eup %5039 }
 0x6dc   :  { %988 = vadd.xlane.f32.xlu1 %v5038_v32  ;;  %4303 = vmatmul.mubr.f32.gmra.mrb[16].mxu1 %v5038_v32 }
 0x6dd   :  { %4305 = vmatprep.mubr.f32.mxu1 %v5036_v57 }
 0x6e0   :  { %992 = vadd.xlane.f32.xlu1 %v5040_v60  ;;  %4306 = vmatmul.mubr.f32.gmra.mrb[18].mxu1 %v5040_v60 }
 0x720   :  { %v973_v55 = vpop.xlane.xlu1 %972 }
 0x724   :  { %v971_v49 = vpop.xlane.xlu0 %970 }
 0x725   :  { %5041 = vrcp.f32 %v971_v49 }
 0x726   :  { %5043 = vrcp.f32 %v973_v55 }
 0x728   :  { %v977_v48 = vpop.xlane.xlu1 %976 }
 0x72c   :  { %v975_v61 = vpop.xlane.xlu0 %974  ;;  %v965_v8 = vpop.xlane.xlu1 %964 }
 0x72d   :  { %5045 = vrcp.f32 %v975_v61 }
 0x72e   :  { %5047 = vrcp.f32 %v977_v48 }
 0x72f   :  { %v5042_v7 = vpop.eup %5041 }
 0x730   :  { %v963_v62 = vpop.xlane.xlu0 %962  ;;  %v969_v23 = vpop.xlane.xlu1 %968 }
 0x731   :  { %5049 = vrcp.f32 %v963_v62  ;;  %v5044_v25 = vpop.eup %5043 }
 0x732   :  { %5051 = vrcp.f32 %v965_v8 }
 0x734   :  { %v967_v22 = vpop.xlane.xlu0 %966 }
 0x735   :  { %5053 = vrcp.f32 %v967_v22 }
 0x736   :  { %5055 = vrcp.f32 %v969_v23 }
 0x737   :  { %v5046_v29 = vpop.eup %5045 }
 0x738   :  { %v5048_v34 = vpop.eup %5047 }
 0x73b   :  { %v5050_v36 = vpop.eup %5049 }
 0x73c   :  { %v5052_v40 = vpop.eup %5051 }
 0x73f   :  { %v5054_v42 = vpop.eup %5053 }
 0x740   :  { %v5056_v47 = vpop.eup %5055 }
 0x755   :  { %v979_v59 = vpop.xlane.xlu0 %978 }
 0x756   :  { %5057 = vrcp.f32 %v979_v59 }
 0x75d   :  { %v983_v63 = vpop.xlane.xlu0 %982 }
 0x760   :  { %v5058_v10 = vpop.eup %5057 }
 0x761   :  { %v981_v53 = vpop.xlane.xlu1 %980 }
 0x762   :  { %5059 = vrcp.f32 %v981_v53  ;;  %v987_v3 = vpop.xlane.xlu0 %986 }
 0x763   :  { %5061 = vrcp.f32 %v983_v63 }
 0x765   :  { %v985_v0 = vpop.xlane.xlu1 %984 }
 0x766   :  { %5063 = vrcp.f32 %v985_v0  ;;  %v991_v43 = vpop.xlane.xlu0 %990 }
 0x767   :  { %5065 = vrcp.f32 %v987_v3 }
 0x769   :  { %v989_v4 = vpop.xlane.xlu1 %988 }
 0x76a   :  { %5067 = vrcp.f32 %v989_v4 }
 0x76b   :  { %5069 = vrcp.f32 %v991_v43 }
 0x76c   :  { %v5060_v11 = vpop.eup %5059 }
 0x76d   :  { %v993_v9 = vpop.xlane.xlu1 %992  ;;  %v5062_v15 = vpop.eup %5061 }
 0x76e   :  { %5071 = vrcp.f32 %v993_v9  ;;  %v1713_v9 = vld [vmem:[#allocation17 + $0x10] sm:$0xff] }
 0x76f   :  { %v4286_v1 = vpop.f32.mrb[4].mxu1 }
 0x770   :  { %v1108_v2 = vpop.f32.mrb[5].mxu1  ;;  %v1204_v44 = vmul.f32 %v5052_v40, %v4286_v1  ;;  %v5064_v17 = vpop.eup %5063 }
 0x771   :  { %v1203_v38 = vmul.f32 %v5050_v36, %v1108_v2  ;;  %v5066_v32 = vpop.eup %5065 }
 0x773   :  { %v4289_v18 = vpop.f32.mrb[6].mxu1 }
 0x774   :  { %v1118_v21 = vpop.f32.mrb[7].mxu1  ;;  %v1206_v52 = vmul.f32 %v5056_v47, %v4289_v18  ;;  %v5068_v33 = vpop.eup %5067  ;;  %v3839_v18 = vld [vmem:[#allocation12] ss:$0 sm:$0xff] }
 0x775   :  { %v1205_v5 = vmul.f32 %v5054_v42, %v1118_v21  ;;  %v5070_v61 = vpop.eup %5069 }
 0x777   :  { %v4292_v39 = vpop.f32.mrb[8].mxu1 }
 0x778   :  { %v1128_v24 = vpop.f32.mrb[9].mxu1  ;;  %v1208_v27 = vmul.f32 %v5044_v25, %v4292_v39  ;;  %v5072_v62 = vpop.eup %5071 }
 0x779   :  { %v1207_v26 = vmul.f32 %v5042_v7, %v1128_v24 }
 0x77b   :  { %v4295_v28 = vpop.f32.mrb[10].mxu1  ;;  %4310 = vmatprep.mubr.msk.f32.mxu1 %vm672_vm6, %v1207_v26 }
 0x77c   :  { %v1138_v31 = vpop.f32.mrb[11].mxu1  ;;  %4311 = vmatmul.mubr.msk.f32.vlgmr.msra.gmra.mrb[20].mxu1 %vm672_vm6, %v1208_v27  ;;  %v1210_v37 = vmul.f32 %v5048_v34, %v4295_v28  ;;  %v1712_v34 = vld [vmem:[#allocation17 + $0x8] sm:$0xff] }
 0x77d   :  { %v1209_v35 = vmul.f32 %v5046_v29, %v1138_v31  ;;  %4317 = vmatpush3.msra.mxu1 %v1219_v41  ;;  %v1711_v31 = vld [vmem:[#allocation17] sm:$0xff] }
 0x77e   :  { %4324 = vmatprep.subr.mxu1 %v3829_v56 }
 0x77f   :  { %4313 = vmatprep.mubr.msk.f32.mxu1 %vm672_vm6, %v1209_v35 }
 0x780   :  { %4314 = vmatmul.mubr.msk.f32.gmra.mrb[22].mxu1 %vm672_vm6, %v1210_v37 }
 0x781   :  { %4318 = vmatprep.mubr.msk.f32.mxu1 %vm672_vm6, %v1203_v38 }
 0x784   :  { %4319 = vmatmul.mubr.msk.f32.vlgmr.msra.gmra.mrb[20].mxu1 %vm672_vm6, %v1204_v44 }
 0x785   :  { %4321 = vmatprep.mubr.msk.f32.mxu1 %vm672_vm6, %v1205_v5  ;;  %4325 = vmatpush3.msra.mxu1 %v3829_v56 }
 0x786   :  { %4332 = vmatprep.subr.mxu1 %v3834_v46 }
 0x788   :  { %4322 = vmatmul.mubr.msk.f32.gmra.mrb[22].mxu1 %vm672_vm6, %v1206_v52 }
 0x7a7   :  { %v4298_v6 = vpop.f32.mrb[12].mxu1 }
 0x7a8   :  { %v1148_v45 = vpop.f32.mrb[13].mxu1  ;;  %v1212_v50 = vmul.f32 %v5060_v11, %v4298_v6 }
 0x7a9   :  { %v1211_v13 = vmul.f32 %v5058_v10, %v1148_v45  ;;  %v1714_v45 = vld [vmem:[#allocation17 + $0x18] sm:$0xff] }
 0x7aa   :  { %v4670_v11 = vpack.c.bf16 %v1714_v45, %v1713_v9 }
 0x7ab   :  { %v4301_v51 = vpop.f32.mrb[14].mxu1  ;;  %4326 = vmatprep.mubr.msk.f32.mxu1 %vm672_vm6, %v1211_v13 }
 0x7ac   :  { %v1158_v16 = vpop.f32.mrb[15].mxu1  ;;  %4327 = vmatmul.mubr.msk.f32.vlgmr.msra.gmra.mrb[20].mxu1 %vm672_vm6, %v1212_v50  ;;  %v1214_v54 = vmul.f32 %v5064_v17, %v4301_v51 }
 0x7ad   :  { %v1213_v30 = vmul.f32 %v5062_v15, %v1158_v16  ;;  %4333 = vmatpush3.msra.mxu1 %v3834_v46 }
 0x7af   :  { %v4304_v57 = vpop.f32.mrb[16].mxu1  ;;  %4329 = vmatprep.mubr.msk.f32.mxu1 %vm672_vm6, %v1213_v30 }
 0x7b0   :  { %v1168_v60 = vpop.f32.mrb[17].mxu1  ;;  %4330 = vmatmul.mubr.msk.f32.gmra.mrb[22].mxu1 %vm672_vm6, %v1214_v54  ;;  %v1216_v49 = vmul.f32 %v5068_v33, %v4304_v57 }
 0x7b1   :  { %v1215_v41 = vmul.f32 %v5066_v32, %v1168_v60 }
 0x7b3   :  { %v4307_v55 = vpop.f32.mrb[18].mxu1  ;;  %4334 = vmatprep.mubr.msk.f32.mxu1 %vm672_vm6, %v1215_v41 }
 0x7b4   :  { %v1178_v48 = vpop.f32.mrb[19].mxu1  ;;  %4335 = vmatmul.mubr.msk.f32.vlgmr.msra.gmra.mrb[20].mxu1 %vm672_vm6, %v1216_v49  ;;  %v1218_v2 = vmul.f32 %v5072_v62, %v4307_v55  ;;  %v3840_v49 = vld [vmem:[#allocation14] ss:$0 sm:$0xff]  ;;  %v3841_v62 = vld [vmem:[#allocation15] ss:$0 sm:$0xff] }
 0x7b5   :  { %v1217_v1 = vmul.f32 %v5070_v61, %v1178_v48 }
 0x7b7   :  { %4337 = vmatprep.mubr.msk.f32.mxu1 %vm672_vm6, %v1217_v1 }
 0x7b8   :  { %4338 = vmatmul.mubr.msk.f32.gmra.mrb[22].mxu1 %vm672_vm6, %v1218_v2 }
 0x887   :  { %v4336_v8 = vpop.f32.mrb[20].mxu1 }
 0x888   :  { %v1623_v21 = vadd.f32 %v4336_v8, %v5835_v14  ;;  %v1599_v22 = vpop.f32.mrb[21].mxu1 }
 0x889   :  { %v1622_v39 = vadd.f32 %v1599_v22, %v5833_v12 }
 0x88a   :  { %v6181_v7 = vadd.f32 %v3839_v18, %v1623_v21 }
 0x88b   :  { %v6183_v23 = vadd.f32 %v3839_v18, %v1622_v39  ;;  %v4339_v24 = vpop.f32.mrb[22].mxu1 }
 0x88c   :  { %v1625_v25 = vadd.f32 %v4339_v24, %v5841_v20  ;;  %v1609_v26 = vpop.f32.mrb[23].mxu1  ;;  %v1642_v27 = vsel %vm369_vm4, %v6181_v7, 0.0 }
 0x88d   :  { %v1624_v28 = vadd.f32 %v1609_v26, %v5839_v19  ;;  %1643 = vadd.xlane.f32.xlu1 %v1642_v27  ;;  %v1639_v14 = vsel %vm369_vm4, %v6183_v23, 0.0  ;;  %v4666_v19 = vpack.c.bf16 %v1712_v34, %v1711_v31  ;;  %v1857_v31 = vld [vmem:[%s6675_s14 + $0x10] sm:$0xff]  ;;  %v1858_v34 = vld [vmem:[%s6675_s14 + $0x18] sm:$0xff] }
 0x88e   :  { %v6191_v56 = vadd.f32 %v3839_v18, %v1625_v25  ;;  %1640 = vadd.xlane.f32.xlu0 %v1639_v14  ;;  %v1855_v14 = vld [vmem:[%s6675_s14] sm:$0xff] }
 0x88f   :  { %v6193_v12 = vadd.f32 %v3839_v18, %v1624_v28  ;;  %4667 = vmatprep.subr.bf16.mxu0 %v4666_v19 }
 0x890   :  { %v1648_v29 = vsel %vm369_vm4, %v6191_v56, 0.0  ;;  %4669 = vmatpush3.bf16.msra.mxu0 %v4666_v19  ;;  %v4678_v19 = vpack.c.bf16 %v1858_v34, %v1857_v31 }
 0x891   :  { %1649 = vadd.xlane.f32.xlu1 %v1648_v29  ;;  %v1645_v20 = vsel %vm369_vm4, %v6193_v12, 0.0  ;;  %4671 = vmatprep.subr.bf16.mxu0 %v4670_v11  ;;  %v1856_v29 = vld [vmem:[%s6675_s14 + $0x8] sm:$0xff] }
 0x892   :  { %1646 = vadd.xlane.f32.xlu0 %v1645_v20  ;;  %v4674_v20 = vpack.c.bf16 %v1856_v29, %v1855_v14 }
 0x894   :  { %4673 = vmatpush3.bf16.msra.mxu0 %v4670_v11  ;;  %4675 = vmatprep.subr.bf16.mxu1 %v4674_v20 }
 0x895   :  { %4677 = vmatpush3.bf16.msra.mxu1 %v4674_v20 }
 0x896   :  { %4679 = vmatprep.subr.bf16.mxu1 %v4678_v19 }
 0x899   :  { %4681 = vmatpush3.bf16.msra.mxu1 %v4678_v19 }
 0x91a   :  { %v1644_v35 = vpop.xlane.xlu1 %1643 }
 0x91b   :  { %v1652_v36 = vmul.f32 0.03125, %v1644_v35  ;;  %v1641_v37 = vpop.xlane.xlu0 %1640  ;;  %v1859_v35 = vld [vmem:[%s6675_s14 + $0x20] sm:$0xff] }
 0x91c   :  { %v1651_v38 = vmul.f32 0.03125, %v1641_v37  ;;  %4362 = vmatprep.subr.mxu1 %v1859_v35 }
 0x91d   :  { %v1656_v40 = vsub.f32 %v6181_v7, %v1652_v36  ;;  %4363 = vmatpush3.msra.mxu1 %v1859_v35  ;;  %v3842_v36 = vld [vmem:[#allocation18] ss:$0 sm:$0xff] }
 0x91e   :  { %v1655_v42 = vsub.f32 %v6183_v23, %v1651_v38  ;;  %v1650_v44 = vpop.xlane.xlu1 %1649 }
 0x91f   :  { %v1654_v5 = vmul.f32 0.03125, %v1650_v44  ;;  %v1647_v46 = vpop.xlane.xlu0 %1646  ;;  %v1660_v47 = vmul.f32 %v1656_v40, %v1656_v40 }
 0x920   :  { %v1653_v52 = vmul.f32 0.03125, %v1647_v46  ;;  %v1659_v53 = vmul.f32 %v1655_v42, %v1655_v42 }
 0x921   :  { %v1658_v59 = vsub.f32 %v6191_v56, %v1654_v5  ;;  %v1666_v63 = vsel %vm369_vm4, %v1660_v47, 0.0 }
 0x922   :  { %v1657_v0 = vsub.f32 %v6193_v12, %v1653_v52  ;;  %1667 = vadd.xlane.f32.xlu1 %v1666_v63  ;;  %v1663_v3 = vsel %vm369_vm4, %v1659_v53, 0.0 }
 0x923   :  { %1664 = vadd.xlane.f32.xlu0 %v1663_v3  ;;  %v1662_v4 = vmul.f32 %v1658_v59, %v1658_v59 }
 0x924   :  { %v1661_v43 = vmul.f32 %v1657_v0, %v1657_v0 }
 0x925   :  { %v1672_v6 = vsel %vm369_vm4, %v1662_v4, 0.0 }
 0x926   :  { %1673 = vadd.xlane.f32.xlu1 %v1672_v6  ;;  %v1669_v10 = vsel %vm369_vm4, %v1661_v43, 0.0 }
 0x927   :  { %1670 = vadd.xlane.f32.xlu0 %v1669_v10 }
 0x9af   :  { %v1668_v13 = vpop.xlane.xlu1 %1667 }
 0x9b0   :  { %v1676_v50 = vmul.f32 0.03125, %v1668_v13  ;;  %v1665_v51 = vpop.xlane.xlu0 %1664 }
 0x9b1   :  { %v1675_v15 = vmul.f32 0.03125, %v1665_v51 }
 0x9b2   :  { %v1680_v16 = vadd.f32 1e-06, %v1676_v50 }
 0x9b3   :  { %v1679_v17 = vadd.f32 1e-06, %v1675_v15  ;;  %v1674_v30 = vpop.xlane.xlu1 %1673 }
 0x9b4   :  { %5073 = vrsqrt.f32 %v1680_v16  ;;  %v1678_v54 = vmul.f32 0.03125, %v1674_v30  ;;  %v1671_v57 = vpop.xlane.xlu0 %1670 }
 0x9b5   :  { %5075 = vrsqrt.f32 %v1679_v17  ;;  %v1677_v32 = vmul.f32 0.03125, %v1671_v57 }
 0x9b6   :  { %v1682_v60 = vadd.f32 1e-06, %v1678_v54 }
 0x9b7   :  { %v1681_v33 = vadd.f32 1e-06, %v1677_v32 }
 0x9b8   :  { %5077 = vrsqrt.f32 %v1682_v60 }
 0x9b9   :  { %5079 = vrsqrt.f32 %v1681_v33 }
 0x9be   :  { %v5074_v41 = vpop.eup %5073 }
 0x9bf   :  { %v5076_v55 = vpop.eup %5075  ;;  %v1688_v61 = vmul.f32 %v5074_v41, %v1656_v40 }
 0x9c0   :  { %v1687_v48 = vmul.f32 %v5076_v55, %v1655_v42 }
 0x9c1   :  { %v1698_v1 = vmul.f32 %v3840_v49, %v1688_v61 }
 0x9c2   :  { %v5078_v2 = vpop.eup %5077  ;;  %v1697_v8 = vmul.f32 %v3840_v49, %v1687_v48 }
 0x9c3   :  { %v5080_v18 = vpop.eup %5079  ;;  %v1690_v21 = vmul.f32 %v5078_v2, %v1658_v59  ;;  %v1708_v24 = vadd.f32 %v3841_v62, %v1698_v1 }
 0x9c4   :  { %v1707_v22 = vadd.f32 %v3841_v62, %v1697_v8  ;;  %v1689_v39 = vmul.f32 %v5080_v18, %v1657_v0 }
 0x9c5   :  { %v1700_v25 = vmul.f32 %v3840_v49, %v1690_v21 }
 0x9c6   :  { %4348 = vmatprep.mubr.msk.f32.mxu0 %vm369_vm4, %v1707_v22  ;;  %v1699_v26 = vmul.f32 %v3840_v49, %v1689_v39  ;;  %v3847_v22 = vld [vmem:[#allocation20] ss:$0 sm:$0xff] }
 0x9c7   :  { %4349 = vmatmul.mubr.msk.f32.vlgmr.msra.gmra.mrb[20].mxu0 %vm369_vm4, %v1708_v24  ;;  %v1710_v28 = vadd.f32 %v3841_v62, %v1700_v25 }
 0x9c8   :  { %v1709_v27 = vadd.f32 %v3841_v62, %v1699_v26 }
 0x9ca   :  { %4351 = vmatprep.mubr.msk.f32.mxu0 %vm369_vm4, %v1709_v27 }
 0x9cb   :  { %4352 = vmatmul.mubr.msk.f32.gmra.mrb[22].mxu0 %vm369_vm4, %v1710_v28 }
 0xa9a   :  { %v4350_v37 = vpop.f32.mrb[20].mxu0 }
 0xa9b   :  { %v1806_v38 = vadd.f32 %v4350_v37, %v3842_v36  ;;  %v1800_v40 = vpop.f32.mrb[21].mxu0 }
 0xa9c   :  { %v1801_v42 = vadd.f32 %v3842_v36, %v1800_v40 }
 0xa9d   :  { %v1824_v44 = vmul.f32 0.044715, %v1806_v38  ;;  %v1820_v41 = vmul.f32 0.5, %v1806_v38 }
 0xa9e   :  { %v1823_v5 = vmul.f32 0.044715, %v1801_v42  ;;  %v4353_v46 = vpop.f32.mrb[22].mxu0  ;;  %v1819_v60 = vmul.f32 0.5, %v1801_v42 }
 0xa9f   :  { %v1828_v47 = vmul.f32 %v1824_v44, %v1806_v38  ;;  %v1816_v52 = vadd.f32 %v4353_v46, %v3842_v36  ;;  %v1810_v53 = vpop.f32.mrb[23].mxu0 }
 0xaa0   :  { %v1827_v59 = vmul.f32 %v1823_v5, %v1801_v42  ;;  %v1811_v63 = vadd.f32 %v3842_v36, %v1810_v53 }
 0xaa1   :  { %v1832_v0 = vmul.f32 %v1828_v47, %v1806_v38  ;;  %v1826_v3 = vmul.f32 0.044715, %v1816_v52  ;;  %v1822_v8 = vmul.f32 0.5, %v1816_v52 }
 0xaa2   :  { %v1831_v4 = vmul.f32 %v1827_v59, %v1801_v42  ;;  %v1825_v43 = vmul.f32 0.044715, %v1811_v63  ;;  %v1821_v1 = vmul.f32 0.5, %v1811_v63 }
 0xaa3   :  { %v1836_v6 = vadd.f32 %v1832_v0, %v1806_v38  ;;  %v1830_v10 = vmul.f32 %v1826_v3, %v1816_v52 }
 0xaa4   :  { %v1835_v9 = vadd.f32 %v1831_v4, %v1801_v42  ;;  %v1829_v45 = vmul.f32 %v1825_v43, %v1811_v63 }
 0xaa5   :  { %v1840_v11 = vmul.f32 0.7978846, %v1836_v6  ;;  %v1834_v13 = vmul.f32 %v1830_v10, %v1816_v52 }
 0xaa6   :  { %v1833_v50 = vmul.f32 %v1829_v45, %v1811_v63  ;;  %v1839_v51 = vmul.f32 0.7978846, %v1835_v9  ;;  %v3854_v9 = vld [vmem:[%s6667_s6 + $0x20] sm:$0xff]  ;;  %v3855_v45 = vld [vmem:[%s6667_s6 + $0x28] sm:$0xff] }
 0xaa7   :  { %5081 = vtanh.f32 %v1840_v11  ;;  %v1838_v15 = vadd.f32 %v1834_v13, %v1816_v52  ;;  %v4682_v11 = vpack.c.bf16 %v3855_v45, %v3854_v9  ;;  %v3856_v13 = vld [vmem:[%s6667_s6 + $0x30] sm:$0xff] }
 0xaa8   :  { %v1837_v16 = vadd.f32 %v1833_v50, %v1811_v63  ;;  %5083 = vtanh.f32 %v1839_v51  ;;  %v3857_v50 = vld [vmem:[%s6667_s6 + $0x38] sm:$0xff] }
 0xaa9   :  { %v1842_v17 = vmul.f32 0.7978846, %v1838_v15  ;;  %4683 = vmatprep.subr.bf16.mxu0 %v4682_v11  ;;  %v4686_v51 = vpack.c.bf16 %v3857_v50, %v3856_v13 }
 0xaaa   :  { %v1841_v30 = vmul.f32 0.7978846, %v1837_v16  ;;  %4685 = vmatpush3.bf16.msra.mxu0 %v4682_v11 }
 0xaab   :  { %5085 = vtanh.f32 %v1842_v17  ;;  %4687 = vmatprep.subr.bf16.mxu0 %v4686_v51 }
 0xaac   :  { %5087 = vtanh.f32 %v1841_v30 }
 0xaae   :  { %4689 = vmatpush3.bf16.msra.mxu0 %v4686_v51 }
 0xab1   :  { %v5082_v54 = vpop.eup %5081 }
 0xab2   :  { %v5084_v57 = vpop.eup %5083  ;;  %v1848_v32 = vadd.f32 1.0, %v5082_v54 }
 0xab3   :  { %v1847_v33 = vadd.f32 1.0, %v5084_v57 }
 0xab4   :  { %v1852_v48 = vmul.f32 %v1848_v32, %v1820_v41 }
 0xab5   :  { %v5086_v49 = vpop.eup %5085  ;;  %v1851_v55 = vmul.f32 %v1847_v33, %v1819_v60 }
 0xab6   :  { %v5088_v61 = vpop.eup %5087  ;;  %v1850_v62 = vadd.f32 1.0, %v5086_v49 }
 0xab7   :  { %4364 = vmatprep.mubr.msk.f32.mxu1 %vm1867_vm8, %v1851_v55  ;;  %v1849_v2 = vadd.f32 1.0, %v5088_v61 }
 0xab8   :  { %4365 = vmatmul.mubr.msk.f32.vlgmr.msra.gmra.mrb[24].mxu1 %vm1867_vm8, %v1852_v48  ;;  %v1854_v21 = vmul.f32 %v1850_v62, %v1822_v8  ;;  %v3852_v48 = vld [vmem:[#allocation8 + $0x1] ss:$0 sm:$0xff]  ;;  %v3853_v8 = vld [vmem:[#allocation9 + $0x1] ss:$0 sm:$0xff] }
 0xab9   :  { %v1853_v18 = vmul.f32 %v1849_v2, %v1821_v1 }
 0xabb   :  { %4367 = vmatprep.mubr.msk.f32.mxu1 %vm1867_vm8, %v1853_v18 }
 0xabc   :  { %4368 = vmatmul.mubr.msk.f32.gmra.mrb[26].mxu1 %vm1867_vm8, %v1854_v21 }
 0xb8b   :  { %v4366_v39 = vpop.f32.mrb[24].mxu1 }
 0xb8c   :  { %v1952_v24 = vadd.f32 %v4366_v39, %v3847_v22  ;;  %v1946_v25 = vpop.f32.mrb[25].mxu1 }
 0xb8d   :  { %v1947_v26 = vadd.f32 %v3847_v22, %v1946_v25 }
 0xb8e   :  { %v6231_v27 = vadd.f32 %v1952_v24, %v6181_v7 }
 0xb8f   :  { %v6234_v28 = vadd.f32 %v1947_v26, %v6183_v23  ;;  %v4369_v14 = vpop.f32.mrb[26].mxu1 }
 0xb90   :  { %v1962_v29 = vadd.f32 %v4369_v14, %v3847_v22  ;;  %v1956_v20 = vpop.f32.mrb[27].mxu1  ;;  %v1976_v31 = vsel %vm369_vm4, %v6231_v27, 0.0 }
 0xb91   :  { %v1957_v34 = vadd.f32 %v3847_v22, %v1956_v20  ;;  %1977 = vadd.xlane.f32.xlu1 %v1976_v31  ;;  %v1973_v19 = vsel %vm369_vm4, %v6234_v28, 0.0 }
 0xb92   :  { %v6241_v35 = vadd.f32 %v1962_v29, %v6191_v56  ;;  %1974 = vadd.xlane.f32.xlu0 %v1973_v19  ;;  %v3858_v19 = vld [vmem:[#allocation11 + $0x1] ss:$0 sm:$0xff] }
 0xb93   :  { %v6244_v7 = vadd.f32 %v1957_v34, %v6193_v12 }
 0xb94   :  { %v1982_v23 = vsel %vm369_vm4, %v6241_v35, 0.0 }
 0xb95   :  { %1983 = vadd.xlane.f32.xlu1 %v1982_v23  ;;  %v1979_v36 = vsel %vm369_vm4, %v6244_v7, 0.0 }
 0xb96   :  { %1980 = vadd.xlane.f32.xlu0 %v1979_v36 }
 0xc1e   :  { %v1978_v37 = vpop.xlane.xlu1 %1977 }
 0xc1f   :  { %v1986_v38 = vmul.f32 0.03125, %v1978_v37  ;;  %v1975_v40 = vpop.xlane.xlu0 %1974 }
 0xc20   :  { %v1985_v42 = vmul.f32 0.03125, %v1975_v40 }
 0xc21   :  { %v1990_v44 = vsub.f32 %v6231_v27, %v1986_v38 }
 0xc22   :  { %v1989_v56 = vsub.f32 %v6234_v28, %v1985_v42  ;;  %v1984_v5 = vpop.xlane.xlu1 %1983 }
 0xc23   :  { %v1988_v46 = vmul.f32 0.03125, %v1984_v5  ;;  %v1981_v12 = vpop.xlane.xlu0 %1980  ;;  %v1994_v47 = vmul.f32 %v1990_v44, %v1990_v44 }
 0xc24   :  { %v1987_v52 = vmul.f32 0.03125, %v1981_v12  ;;  %v1993_v53 = vmul.f32 %v1989_v56, %v1989_v56 }
 0xc25   :  { %v1992_v59 = vsub.f32 %v6241_v35, %v1988_v46  ;;  %v2000_v63 = vsel %vm369_vm4, %v1994_v47, 0.0 }
 0xc26   :  { %v1991_v0 = vsub.f32 %v6244_v7, %v1987_v52  ;;  %2001 = vadd.xlane.f32.xlu1 %v2000_v63  ;;  %v1997_v3 = vsel %vm369_vm4, %v1993_v53, 0.0 }
 0xc27   :  { %1998 = vadd.xlane.f32.xlu0 %v1997_v3  ;;  %v1996_v4 = vmul.f32 %v1992_v59, %v1992_v59 }
 0xc28   :  { %v1995_v43 = vmul.f32 %v1991_v0, %v1991_v0 }
 0xc29   :  { %v2006_v6 = vsel %vm369_vm4, %v1996_v4, 0.0 }
 0xc2a   :  { %2007 = vadd.xlane.f32.xlu1 %v2006_v6  ;;  %v2003_v10 = vsel %vm369_vm4, %v1995_v43, 0.0 }
 0xc2b   :  { %2004 = vadd.xlane.f32.xlu0 %v2003_v10 }
 0xcb3   :  { %v2002_v15 = vpop.xlane.xlu1 %2001 }
 0xcb4   :  { %v2010_v16 = vmul.f32 0.03125, %v2002_v15  ;;  %v1999_v17 = vpop.xlane.xlu0 %1998 }
 0xcb5   :  { %v2009_v30 = vmul.f32 0.03125, %v1999_v17 }
 0xcb6   :  { %v2014_v54 = vadd.f32 1e-06, %v2010_v16 }
 0xcb7   :  { %v2013_v57 = vadd.f32 1e-06, %v2009_v30  ;;  %v2008_v32 = vpop.xlane.xlu1 %2007 }
 0xcb8   :  { %5089 = vrsqrt.f32 %v2014_v54  ;;  %v2012_v60 = vmul.f32 0.03125, %v2008_v32  ;;  %v2005_v33 = vpop.xlane.xlu0 %2004 }
 0xcb9   :  { %5091 = vrsqrt.f32 %v2013_v57  ;;  %v2011_v41 = vmul.f32 0.03125, %v2005_v33 }
 0xcba   :  { %v2016_v49 = vadd.f32 1e-06, %v2012_v60 }
 0xcbb   :  { %v2015_v55 = vadd.f32 1e-06, %v2011_v41 }
 0xcbc   :  { %5093 = vrsqrt.f32 %v2016_v49 }
 0xcbd   :  { %5095 = vrsqrt.f32 %v2015_v55 }
 0xcc2   :  { %v5090_v61 = vpop.eup %5089 }
 0xcc3   :  { %v5092_v62 = vpop.eup %5091  ;;  %v2022_v1 = vmul.f32 %v5090_v61, %v1990_v44 }
 0xcc4   :  { %v2021_v2 = vmul.f32 %v5092_v62, %v1989_v56 }
 0xcc5   :  { %v2032_v18 = vmul.f32 %v3852_v48, %v2022_v1 }
 0xcc6   :  { %v5094_v21 = vpop.eup %5093  ;;  %v2031_v22 = vmul.f32 %v3852_v48, %v2021_v2 }
 0xcc7   :  { %v5096_v39 = vpop.eup %5095  ;;  %v2024_v24 = vmul.f32 %v5094_v21, %v1992_v59  ;;  %v2042_v14 = vadd.f32 %v3853_v8, %v2032_v18 }
 0xcc8   :  { %v2041_v25 = vadd.f32 %v3853_v8, %v2031_v22  ;;  %v2023_v26 = vmul.f32 %v5096_v39, %v1991_v0 }
 0xcc9   :  { %v2034_v29 = vmul.f32 %v3852_v48, %v2024_v24 }
 0xcca   :  { %4378 = vmatprep.mubr.msk.f32.mxu0 %vm369_vm4, %v2041_v25  ;;  %v2033_v20 = vmul.f32 %v3852_v48, %v2023_v26 }
 0xccb   :  { %4379 = vmatmul.mubr.msk.f32.vlgmr.msra.gmra.mrb[24].mxu0 %vm369_vm4, %v2042_v14  ;;  %v2044_v34 = vadd.f32 %v3853_v8, %v2034_v29 }
 0xccc   :  { %v2043_v31 = vadd.f32 %v3853_v8, %v2033_v20 }
 0xcce   :  { %4381 = vmatprep.mubr.msk.f32.mxu0 %vm369_vm4, %v2043_v31 }
 0xccf   :  { %4382 = vmatmul.mubr.msk.f32.gmra.mrb[26].mxu0 %vm369_vm4, %v2044_v34 }
 0xd9e   :  { %v4380_v23 = vpop.f32.mrb[24].mxu0 }
 0xd9f   :  { %v2142_v36 = vadd.f32 %v4380_v23, %v3858_v19  ;;  %v2136_v37 = vpop.f32.mrb[25].mxu0 }
 0xda0   :  { %v2137_v38 = vadd.f32 %v3858_v19, %v2136_v37 }
 0xda1   :  { %2156 = vst.msk [vmem:[#allocation2 + $0x8] sm:$0xff] %vm551_vm5, %v2142_v36  ;;  %2165 = vrot.lane.b32.xlu1 %v2142_v36, %s5519_s1 }
 0xda2   :  { %2155 = vst.msk [vmem:[#allocation2] sm:$0xff] %vm551_vm5, %v2137_v38  ;;  %2163 = vrot.lane.b32.xlu0 %v2137_v38, %s5519_s1  ;;  %v4383_v40 = vpop.f32.mrb[26].mxu0 }
 0xda3   :  { %v2152_v42 = vadd.f32 %v4383_v40, %v3858_v19  ;;  %v2146_v44 = vpop.f32.mrb[27].mxu0 }
 0xda4   :  { %v2147_v56 = vadd.f32 %v3858_v19, %v2146_v44 }
 0xda5   :  { %2158 = vst.msk [vmem:[#allocation2 + $0x18] sm:$0xff] %vm551_vm5, %v2152_v42 }
 0xda6   :  { %2157 = vst.msk [vmem:[#allocation2 + $0x10] sm:$0xff] %vm551_vm5, %v2147_v56  ;;  %2179 = vrot.lane.b32.xlu0 %v2137_v38, %s5520_s27  ;;  %2167 = vrot.lane.b32.xlu1 %v2147_v56, %s5519_s1 }
 0xda8   :  { %v6287_v46 = vld [vmem:[#allocation2 + $0x8] sm:$0xff] }
 0xda9   :  { %v2211_v5 = vld [vmem:[#allocation2] sm:$0xff] }
 0xdaa   :  { %4416 = vmatprep.mubr.msk.f32.mxu1 %vm672_vm6, %v2211_v5  ;;  %2183 = vrot.lane.b32.xlu0 %v2147_v56, %s5520_s27  ;;  %v6292_v12 = vpack.i.bf16 %v6287_v46, %v2211_v5 }
 0xdab   :  { %2169 = vrot.lane.b32.xlu1 %v2152_v42, %s5519_s1 }
 0xdac   :  { %v6299_v52 = vld [vmem:[#allocation2 + $0x18] sm:$0xff] }
 0xdad   :  { %v6297_v47 = vld [vmem:[#allocation2 + $0x10] sm:$0xff] }
 0xdae   :  { %2195 = vrot.lane.b32.xlu0 %v2137_v38, %s5521_s11  ;;  %v4926_v53 = vpack.i.bf16 %v6299_v52, %v6297_v47 }
 0xdaf   :  { %2181 = vrot.lane.b32.xlu1 %v2142_v36, %s5520_s27 }
 0xdb2   :  { %2199 = vrot.lane.b32.xlu0 %v2147_v56, %s5521_s11 }
 0xdb3   :  { %2185 = vrot.lane.b32.xlu1 %v2152_v42, %s5520_s27  ;;  %s6701_s27 = sld [smem:[#allocation36_spill]] }
 0xdb6   :  { %4922 = vrot.lane.b32.xlu0 %v6292_v12, %s5522_s9 }
 0xdb7   :  { %2197 = vrot.lane.b32.xlu1 %v2142_v36, %s5521_s11 }
 0xdbb   :  { %2201 = vrot.lane.b32.xlu1 %v2152_v42, %s5521_s11 }
 0xdbf   :  { %4927 = vrot.lane.b32.xlu1 %v4926_v53, %s5522_s9 }
 0xe13   :  { %v2166_v59 = vpop.permute.xlu1 %2165 }
 0xe14   :  { %2176 = vst.msk [vmem:[#allocation2 + $0x28] sm:$0xff] %vm551_vm5, %v2166_v59  ;;  %v2164_v63 = vpop.permute.xlu0 %2163 }
 0xe15   :  { %2175 = vst.msk [vmem:[#allocation2 + $0x20] sm:$0xff] %vm551_vm5, %v2164_v63 }
 0xe18   :  { %v2168_v0 = vpop.permute.xlu1 %2167  ;;  %v2180_v3 = vpop.permute.xlu0 %2179 }
 0xe19   :  { %2177 = vst.msk [vmem:[#allocation2 + $0x30] sm:$0xff] %vm551_vm5, %v2168_v0  ;;  %2191 = vst.msk [vmem:[#allocation2 + $0x40] sm:$0xff] %vm551_vm5, %v2180_v3 }
 0xe1b   :  { %v6309_v4 = vld [vmem:[#allocation2 + $0x28] sm:$0xff] }
 0xe1c   :  { %v2184_v43 = vpop.permute.xlu0 %2183  ;;  %v6311_v6 = vld [vmem:[#allocation2 + $0x20] sm:$0xff] }
 0xe1d   :  { %v2170_v10 = vpop.permute.xlu1 %2169  ;;  %2193 = vst.msk [vmem:[#allocation2 + $0x50] sm:$0xff] %vm551_vm5, %v2184_v43  ;;  %v4931_v9 = vpack.i.bf16 %v6309_v4, %v6311_v6 }
 0xe1e   :  { %2178 = vst.msk [vmem:[#allocation2 + $0x38] sm:$0xff] %vm551_vm5, %v2170_v10 }
 0xe1f   :  { %4932 = vrot.lane.b32.xlu0 %v4931_v9, %s5522_s9 }
 0xe20   :  { %v2196_v45 = vpop.permute.xlu0 %2195  ;;  %v6321_v51 = vld [vmem:[#allocation2 + $0x30] sm:$0xff]  ;;  %v6329_v32 = vld [vmem:[#allocation2 + $0x40] sm:$0xff] }
 0xe21   :  { %v2182_v11 = vpop.permute.xlu1 %2181  ;;  %2207 = vst.msk [vmem:[#allocation2 + $0x60] sm:$0xff] %vm551_vm5, %v2196_v45 }
 0xe22   :  { %2192 = vst.msk [vmem:[#allocation2 + $0x48] sm:$0xff] %vm551_vm5, %v2182_v11 }
 0xe24   :  { %v2200_v13 = vpop.permute.xlu0 %2199  ;;  %v6339_v55 = vld [vmem:[#allocation2 + $0x50] sm:$0xff] }
 0xe25   :  { %v2186_v50 = vpop.permute.xlu1 %2185  ;;  %2209 = vst.msk [vmem:[#allocation2 + $0x70] sm:$0xff] %vm551_vm5, %v2200_v13  ;;  %v6323_v15 = vld [vmem:[#allocation2 + $0x38] sm:$0xff] }
 0xe26   :  { %2194 = vst.msk [vmem:[#allocation2 + $0x58] sm:$0xff] %vm551_vm5, %v2186_v50  ;;  %v4936_v16 = vpack.i.bf16 %v6323_v15, %v6321_v51 }
 0xe28   :  { %4937 = vrot.lane.b32.xlu1 %v4936_v16, %s5522_s9  ;;  %v4923_v17 = vpop.permute.xlu0 %4922  ;;  %v6349_v1 = vld [vmem:[#allocation2 + $0x60] sm:$0xff] }
 0xe29   :  { %v2198_v30 = vpop.permute.xlu1 %2197  ;;  %v4925_v54 = vunpack.i.h.bf16 %v4923_v17  ;;  %v4924_v57 = vunpack.i.l.bf16 %v4923_v17  ;;  %v6331_v60 = vld [vmem:[#allocation2 + $0x48] sm:$0xff] }
 0xe2a   :  { %2208 = vst.msk [vmem:[#allocation2 + $0x68] sm:$0xff] %vm551_vm5, %v2198_v30  ;;  %v4941_v33 = vpack.i.bf16 %v6331_v60, %v6329_v32 }
 0xe2b   :  { %v4690_v41 = vpack.c.bf16 %v4925_v54, %v4924_v57 }
 0xe2c   :  { %4942 = vrot.lane.b32.xlu0 %v4941_v33, %s5522_s9  ;;  %v6359_v39 = vld [vmem:[#allocation2 + $0x70] sm:$0xff] }
 0xe2d   :  { %v2202_v49 = vpop.permute.xlu1 %2201  ;;  %4692 = vmatprep.subr.msk.bf16.mxu1 %vm5940_vm7, %v4690_v41  ;;  %v6341_v61 = vld [vmem:[#allocation2 + $0x58] sm:$0xff] }
 0xe2e   :  { %2210 = vst.msk [vmem:[#allocation2 + $0x78] sm:$0xff] %vm551_vm5, %v2202_v49  ;;  %4695 = vmatpush3.bf16.xpose.msk.msra.mxu1 %vm5940_vm7, %v4690_v41  ;;  %v4946_v48 = vpack.i.bf16 %v6341_v61, %v6339_v55 }
 0xe30   :  { %4947 = vrot.lane.b32.xlu1 %v4946_v48, %s5522_s9 }
 0xe31   :  { %v4928_v62 = vpop.permute.xlu1 %4927  ;;  %v6351_v2 = vld [vmem:[#allocation2 + $0x68] sm:$0xff] }
 0xe32   :  { %v4930_v8 = vunpack.i.h.bf16 %v4928_v62  ;;  %v4929_v18 = vunpack.i.l.bf16 %v4928_v62  ;;  %v6355_v21 = vpack.i.bf16 %v6351_v2, %v6349_v1 }
 0xe34   :  { %v4696_v22 = vpack.c.bf16 %v4930_v8, %v4929_v18  ;;  %4952 = vrot.lane.b32.xlu0 %v6355_v21, %s5522_s9 }
 0xe35   :  { %v6361_v24 = vld [vmem:[#allocation2 + $0x78] sm:$0xff] }
 0xe36   :  { %4698 = vmatprep.subr.msk.bf16.mxu1 %vm5940_vm7, %v4696_v22  ;;  %v6367_v25 = vpack.i.bf16 %v6361_v24, %v6359_v39 }
 0xe37   :  { %4701 = vmatpush3.bf16.xpose.msk.msra.mxu1 %vm5940_vm7, %v4696_v22 }
 0xe38   :  { %4962 = vrot.lane.b32.xlu0 %v6292_v12, %s5523_s23  ;;  %4957 = vrot.lane.b32.xlu1 %v6367_v25, %s5522_s9 }
 0xe3c   :  { %4967 = vrot.lane.b32.xlu0 %v4926_v53, %s5523_s23  ;;  %4972 = vrot.lane.b32.xlu1 %v4931_v9, %s5523_s23 }
 0xe40   :  { %4982 = vrot.lane.b32.xlu0 %v4936_v16, %s5523_s23  ;;  %4977 = vrot.lane.b32.xlu1 %v4941_v33, %s5523_s23 }
 0xe44   :  { %4987 = vrot.lane.b32.xlu0 %v4946_v48, %s5523_s23 }
 0xe91   :  { %v4933_v26 = vpop.permute.xlu0 %4932 }
 0xe92   :  { %v4935_v14 = vunpack.i.h.bf16 %v4933_v26  ;;  %v4934_v29 = vunpack.i.l.bf16 %v4933_v26 }
 0xe94   :  { %v4702_v20 = vpack.c.bf16 %v4935_v14, %v4934_v29 }
 0xe96   :  { %4704 = vmatprep.subr.msk.bf16.mxu1 %vm5940_vm7, %v4702_v20 }
 0xe97   :  { %4707 = vmatpush3.bf16.xpose.msk.msra.mxu1 %vm5940_vm7, %v4702_v20 }
 0xe9a   :  { %v4938_v31 = vpop.permute.xlu1 %4937 }
 0xe9b   :  { %v4940_v34 = vunpack.i.h.bf16 %v4938_v31  ;;  %v4939_v19 = vunpack.i.l.bf16 %v4938_v31 }
 0xe9d   :  { %v4708_v23 = vpack.c.bf16 %v4940_v34, %v4939_v19 }
 0xe9e   :  { %v4943_v36 = vpop.permute.xlu0 %4942 }
 0xe9f   :  { %v4945_v37 = vunpack.i.h.bf16 %v4943_v36  ;;  %v4944_v38 = vunpack.i.l.bf16 %v4943_v36  ;;  %4710 = vmatprep.subr.msk.bf16.mxu1 %vm5940_vm7, %v4708_v23 }
 0xea0   :  { %4713 = vmatpush3.bf16.xpose.msk.msra.mxu1 %vm5940_vm7, %v4708_v23  ;;  %v5190_v23 = vld [vmem:[%s6700_s5 + $0x20] sm:$0xff] }
 0xea1   :  { %v4714_v40 = vpack.c.bf16 %v4945_v37, %v4944_v38 }
 0xea2   :  { %v4948_v42 = vpop.permute.xlu1 %4947 }
 0xea3   :  { %v4950_v44 = vunpack.i.h.bf16 %v4948_v42  ;;  %v4949_v56 = vunpack.i.l.bf16 %v4948_v42  ;;  %4716 = vmatprep.subr.msk.bf16.mxu1 %vm5940_vm7, %v4714_v40 }
 0xea5   :  { %v4720_v12 = vpack.c.bf16 %v4950_v44, %v4949_v56 }
 0xea6   :  { %v4953_v5 = vpop.permute.xlu0 %4952 }
 0xea7   :  { %v4955_v53 = vunpack.i.h.bf16 %v4953_v5  ;;  %v4954_v59 = vunpack.i.l.bf16 %v4953_v5  ;;  %v5192_v5 = vld [vmem:[%s6700_s5 + $0x30] sm:$0xff] }
 0xea8   :  { %4719 = vmatpush3.bf16.xpose.msk.msra.mxu1 %vm5940_vm7, %v4714_v40  ;;  %v5191_v40 = vld [vmem:[%s6700_s5 + $0x38] sm:$0xff] }
 0xea9   :  { %4722 = vmatprep.subr.msk.bf16.mxu1 %vm5940_vm7, %v4720_v12  ;;  %v4726_v9 = vpack.c.bf16 %v4955_v53, %v4954_v59 }
 0xeaa   :  { %v4958_v63 = vpop.permute.xlu1 %4957  ;;  %v4963_v0 = vpop.permute.xlu0 %4962 }
 0xeab   :  { %v4965_v3 = vunpack.i.h.bf16 %v4963_v0  ;;  %v4964_v43 = vunpack.i.l.bf16 %v4963_v0  ;;  %v4960_v54 = vunpack.i.h.bf16 %v4958_v63  ;;  %v4959_v33 = vunpack.i.l.bf16 %v4958_v63 }
 0xead   :  { %v4738_v10 = vpack.c.bf16 %v4965_v3, %v4964_v43  ;;  %v4732_v8 = vpack.c.bf16 %v4960_v54, %v4959_v33  ;;  %v5193_v43 = vld [vmem:[%s6700_s5 + $0x40] sm:$0xff]  ;;  %v5199_v54 = vld [vmem:[%s6700_s5 + $0x70] sm:$0xff]  ;;  %v5200_v33 = vld [vmem:[%s6700_s5 + $0x78] sm:$0xff] }
 0xeae   :  { %v4973_v45 = vpop.permute.xlu1 %4972  ;;  %v4968_v11 = vpop.permute.xlu0 %4967 }
 0xeaf   :  { %v4975_v13 = vunpack.i.h.bf16 %v4973_v45  ;;  %v4974_v50 = vunpack.i.l.bf16 %v4973_v45  ;;  %v4970_v16 = vunpack.i.h.bf16 %v4968_v11  ;;  %v4969_v17 = vunpack.i.l.bf16 %v4968_v11  ;;  %4739 = vmatprep.subr.bf16.mxu0 %v4738_v10  ;;  %v5196_v11 = vld [vmem:[%s6700_s5 + $0x48] sm:$0xff] }
 0xeb0   :  { %4725 = vmatpush3.bf16.xpose.msk.msra.mxu1 %vm5940_vm7, %v4720_v12  ;;  %4741 = vmatpush3.bf16.msra.mxu0 %v4738_v10 }
 0xeb1   :  { %v4742_v30 = vpack.c.bf16 %v4970_v16, %v4969_v17  ;;  %4728 = vmatprep.subr.msk.bf16.mxu1 %vm5940_vm7, %v4726_v9  ;;  %v4746_v41 = vpack.c.bf16 %v4975_v13, %v4974_v50  ;;  %v5197_v50 = vld [vmem:[%s6700_s5 + $0x60] sm:$0xff]  ;;  %v5198_v17 = vld [vmem:[%s6700_s5 + $0x68] sm:$0xff] }
 0xeb2   :  { %v4983_v57 = vpop.permute.xlu0 %4982  ;;  %v4978_v62 = vpop.permute.xlu1 %4977 }
 0xeb3   :  { %v4985_v49 = vunpack.i.h.bf16 %v4983_v57  ;;  %v4984_v48 = vunpack.i.l.bf16 %v4983_v57  ;;  %4743 = vmatprep.subr.bf16.mxu0 %v4742_v30  ;;  %v4980_v18 = vunpack.i.h.bf16 %v4978_v62  ;;  %v4979_v22 = vunpack.i.l.bf16 %v4978_v62 }
 0xeb4   :  { %4745 = vmatpush3.bf16.msra.mxu0 %v4742_v30 }
 0xeb5   :  { %4747 = vmatprep.subr.bf16.mxu0 %v4746_v41  ;;  %v4750_v26 = vpack.c.bf16 %v4985_v49, %v4984_v48  ;;  %v4754_v29 = vpack.c.bf16 %v4980_v18, %v4979_v22 }
 0xeb6   :  { %v4988_v14 = vpop.permute.xlu0 %4987 }
 0xeb7   :  { %v4990_v20 = vunpack.i.h.bf16 %v4988_v14  ;;  %v4989_v31 = vunpack.i.l.bf16 %v4988_v14 }
 0xeb8   :  { %4731 = vmatpush3.bf16.xpose.msk.msra.mxu1 %vm5940_vm7, %v4726_v9  ;;  %4749 = vmatpush3.bf16.msra.mxu0 %v4746_v41  ;;  %v5194_v9 = vld [vmem:[%s6700_s5 + $0x58] sm:$0xff] }
 0xeb9   :  { %4734 = vmatprep.subr.msk.bf16.mxu1 %vm5940_vm7, %v4732_v8  ;;  %4751 = vmatprep.subr.bf16.mxu0 %v4750_v26  ;;  %v4758_v34 = vpack.c.bf16 %v4990_v20, %v4989_v31 }
 0xebc   :  { %4753 = vmatpush3.bf16.msra.mxu0 %v4750_v26 }
 0xebd   :  { %4755 = vmatprep.subr.bf16.mxu0 %v4754_v29 }
 0xec0   :  { %4737 = vmatpush3.bf16.xpose.msk.msra.mxu1 %vm5940_vm7, %v4732_v8  ;;  %4757 = vmatpush3.bf16.msra.mxu0 %v4754_v29 }
 0xec1   :  { %4759 = vmatprep.subr.bf16.mxu0 %v4758_v34 }
 0xec4   :  { %4761 = vmatpush3.bf16.msra.mxu0 %v4758_v34 }
 0xec7   :  { %4417 = vmatmul.mubr.msk.f32.vlgmr.msra.gmra.mrb[28].mxu1 %vm672_vm6, %v6287_v46  ;;  %v5185_v46 = vld [vmem:[%s6700_s5 + $0x8] sm:$0xff] }
 0xec8   :  { %4419 = vmatprep.mubr.msk.f32.mxu1 %vm672_vm6, %v6297_v47 }
 0xecb   :  { %4420 = vmatmul.mubr.msk.f32.gmra.mrb[30].mxu1 %vm672_vm6, %v6299_v52 }
 0xecc   :  { %4422 = vmatprep.mubr.msk.f32.mxu1 %vm672_vm6, %v6311_v6 }
 0xecf   :  { %4423 = vmatmul.mubr.msk.f32.gmra.mrb[32].mxu1 %vm672_vm6, %v6309_v4  ;;  %v5186_v4 = vld [vmem:[%s6700_s5] sm:$0xff] }
 0xed0   :  { %4425 = vmatprep.mubr.msk.f32.mxu1 %vm672_vm6, %v6321_v51 }
 0xed3   :  { %4426 = vmatmul.mubr.msk.f32.gmra.mrb[34].mxu1 %vm672_vm6, %v6323_v15  ;;  %v5187_v15 = vld [vmem:[%s6700_s5 + $0x18] sm:$0xff] }
 0xed4   :  { %4428 = vmatprep.mubr.msk.f32.mxu1 %vm672_vm6, %v6329_v32 }
 0xed7   :  { %4429 = vmatmul.mubr.msk.f32.gmra.mrb[36].mxu1 %vm672_vm6, %v6331_v60 }
 0xed8   :  { %4431 = vmatprep.mubr.msk.f32.mxu1 %vm672_vm6, %v6339_v55 }
 0xedb   :  { %4432 = vmatmul.mubr.msk.f32.gmra.mrb[38].mxu1 %vm672_vm6, %v6341_v61  ;;  %v5188_v61 = vld [vmem:[%s6700_s5 + $0x10] sm:$0xff] }
 0xedc   :  { %4434 = vmatprep.mubr.msk.f32.mxu1 %vm672_vm6, %v6349_v1 }
 0xedf   :  { %4435 = vmatmul.mubr.msk.f32.gmra.mrb[40].mxu1 %vm672_vm6, %v6351_v2  ;;  %v5189_v2 = vld [vmem:[%s6700_s5 + $0x28] sm:$0xff] }
 0xee0   :  { %4437 = vmatprep.mubr.msk.f32.mxu1 %vm672_vm6, %v6359_v39 }
 0xee3   :  { %4438 = vmatmul.mubr.msk.f32.gmra.mrb[42].mxu1 %vm672_vm6, %v6361_v24 }
 0xf9a   :  { %v4418_v58 = vpop.f32.mrb[28].mxu1 }
 0xf9b   :  { %v6437_v47 = vadd.f32 %v5185_v46, %v4418_v58  ;;  %v2405_v52 = vpop.f32.mrb[29].mxu1 }
 0xf9c   :  { %v6442_v6 = vadd.f32 %v5186_v4, %v2405_v52 }
 0xf9d   :  { %2486 = vmax.xlane.f32.xlu0 %v6437_v47 }
 0xf9e   :  { %v4421_v51 = vpop.f32.mrb[30].mxu1  ;;  %2484 = vmax.xlane.f32.xlu1 %v6442_v6 }
 0xf9f   :  { %v6449_v32 = vadd.f32 %v5187_v15, %v4421_v51  ;;  %v2415_v60 = vpop.f32.mrb[31].mxu1 }
 0xfa0   :  { %v6455_v1 = vadd.f32 %v5188_v61, %v2415_v60 }
 0xfa1   :  { %2490 = vmax.xlane.f32.xlu0 %v6449_v32 }
 0xfa2   :  { %v4424_v55 = vpop.f32.mrb[32].mxu1 }
 0xfa3   :  { %v2431_v39 = vadd.f32 %v5189_v2, %v4424_v55  ;;  %v2425_v24 = vpop.f32.mrb[33].mxu1 }
 0xfa4   :  { %v2426_v36 = vadd.f32 %v5190_v23, %v2425_v24 }
 0xfa5   :  { %2488 = vmax.xlane.f32.xlu0 %v6455_v1  ;;  %2494 = vmax.xlane.f32.xlu1 %v2431_v39 }
 0xfa6   :  { %v4427_v19 = vpop.f32.mrb[34].mxu1 }
 0xfa7   :  { %v2435_v37 = vpop.f32.mrb[35].mxu1  ;;  %v6467_v42 = vadd.f32 %v5191_v40, %v4427_v19 }
 0xfa8   :  { %v6473_v12 = vadd.f32 %v5192_v5, %v2435_v37 }
 0xfa9   :  { %2492 = vmax.xlane.f32.xlu0 %v2426_v36 }
 0xfaa   :  { %v4430_v38 = vpop.f32.mrb[36].mxu1 }
 0xfab   :  { %v2445_v44 = vpop.f32.mrb[37].mxu1  ;;  %v6501_v13 = vadd.f32 %v5196_v11, %v4430_v38 }
 0xfac   :  { %v6483_v10 = vadd.f32 %v5193_v43, %v2445_v44 }
 0xfad   :  { %2498 = vmax.xlane.f32.xlu0 %v6467_v42 }
 0xfae   :  { %v4433_v56 = vpop.f32.mrb[38].mxu1 }
 0xfaf   :  { %v2455_v53 = vpop.f32.mrb[39].mxu1  ;;  %v6489_v45 = vadd.f32 %v5194_v9, %v4433_v56 }
 0xfb1   :  { %2496 = vmax.xlane.f32.xlu0 %v6473_v12 }
 0xfb2   :  { %v4436_v59 = vpop.f32.mrb[40].mxu1 }
 0xfb3   :  { %v2465_v63 = vpop.f32.mrb[41].mxu1  ;;  %v6513_v30 = vadd.f32 %v5198_v17, %v4436_v59 }
 0xfb4   :  { %v6506_v16 = vadd.f32 %v5197_v50, %v2465_v63 }
 0xfb6   :  { %v4439_v0 = vpop.f32.mrb[42].mxu1  ;;  %4992 = vrot.lane.b32.xlu1 %v6355_v21, %s5523_s23  ;;  %v5195_v21 = vld [vmem:[%s6700_s5 + $0x50] sm:$0xff] }
 0xfb7   :  { %v2475_v3 = vpop.f32.mrb[43].mxu1  ;;  %v6525_v41 = vadd.f32 %v5200_v33, %v4439_v0 }
 0xfb8   :  { %v6518_v57 = vadd.f32 %v5199_v54, %v2475_v3 }
 0xfc7   :  { %4997 = vrot.lane.b32.xlu0 %v6367_v25, %s5523_s23  ;;  %v6495_v25 = vadd.f32 %v5195_v21, %v2455_v53 }
 0xfda   :  { %2500 = vmax.xlane.f32.xlu1 %v6483_v10 }
 0xfde   :  { %2506 = vmax.xlane.f32.xlu1 %v6489_v45 }
 0xfe2   :  { %2504 = vmax.xlane.f32.xlu1 %v6495_v25 }
 0xfe6   :  { %2502 = vmax.xlane.f32.xlu0 %v6501_v13  ;;  %2508 = vmax.xlane.f32.xlu1 %v6506_v16 }
 0xfea   :  { %2512 = vmax.xlane.f32.xlu0 %v6518_v57  ;;  %2510 = vmax.xlane.f32.xlu1 %v6513_v30 }
 0xfee   :  { %2514 = vmax.xlane.f32.xlu1 %v6525_v41 }
0x102a   :  { %v2487_v49 = vpop.xlane.xlu0 %2486 }
0x102b   :  { %v2485_v48 = vpop.xlane.xlu1 %2484  ;;  %v2517_v52 = vsub.f32 %v6437_v47, %v2487_v49 }
0x102c   :  { %v2516_v62 = vsub.f32 %v6442_v6, %v2485_v48 }
0x102d   :  { %v2534_v61 = vmul.f32 1.442695, %v2517_v52 }
0x102e   :  { %v2532_v8 = vmul.f32 1.442695, %v2516_v62  ;;  %v2491_v18 = vpop.xlane.xlu0 %2490 }
0x102f   :  { %v2519_v2 = vsub.f32 %v6449_v32, %v2491_v18 }
0x1030   :  { %5097 = vpow2.f32 %v2532_v8 }
0x1032   :  { %v2489_v22 = vpop.xlane.xlu0 %2488  ;;  %v2495_v26 = vpop.xlane.xlu1 %2494 }
0x1033   :  { %v2521_v14 = vsub.f32 %v2431_v39, %v2495_v26  ;;  %v2518_v4 = vsub.f32 %v6455_v1, %v2489_v22  ;;  %v2538_v1 = vmul.f32 1.442695, %v2519_v2 }
0x1035   :  { %v2542_v29 = vmul.f32 1.442695, %v2521_v14  ;;  %v2536_v39 = vmul.f32 1.442695, %v2518_v4 }
0x1036   :  { %v2493_v20 = vpop.xlane.xlu0 %2492  ;;  %v4993_v31 = vpop.permute.xlu1 %4992 }
0x1037   :  { %v2520_v34 = vsub.f32 %v2426_v36, %v2493_v20  ;;  %v4995_v58 = vunpack.i.h.bf16 %v4993_v31  ;;  %v4994_v46 = vunpack.i.l.bf16 %v4993_v31  ;;  %5099 = vpow2.f32 %v2542_v29 }
0x1039   :  { %v2540_v51 = vmul.f32 1.442695, %v2520_v34  ;;  %v4762_v15 = vpack.c.bf16 %v4995_v58, %v4994_v46  ;;  %v3896_v58 = vld [vmem:[%s6669_s8 + $0x28] sm:$0xff]  ;;  %v3895_v46 = vld [vmem:[%s6669_s8 + $0x20] sm:$0xff] }
0x103a   :  { %v5098_v6 = vpop.eup %5097  ;;  %v2499_v60 = vpop.xlane.xlu0 %2498 }
0x103b   :  { %5101 = vpow2.f32 %v2540_v51  ;;  %v2523_v55 = vsub.f32 %v6467_v42, %v2499_v60  ;;  %4763 = vmatprep.subr.bf16.mxu0 %v4762_v15  ;;  %4472 = vmatprep.mubr.f32.mxu0 %v5098_v6 }
0x103c   :  { %4765 = vmatpush3.bf16.msra.mxu0 %v4762_v15 }
0x103d   :  { %v2546_v24 = vmul.f32 1.442695, %v2523_v55 }
0x103e   :  { %v2497_v19 = vpop.xlane.xlu0 %2496 }
0x103f   :  { %5103 = vpow2.f32 %v2546_v24  ;;  %v2522_v47 = vsub.f32 %v6473_v12, %v2497_v19 }
0x1040   :  { %5105 = vpow2.f32 %v2534_v61 }
0x1041   :  { %5107 = vpow2.f32 %v2536_v39  ;;  %v2544_v23 = vmul.f32 1.442695, %v2522_v47  ;;  %v5100_v36 = vpop.eup %5099 }
0x1042   :  { %v4998_v37 = vpop.permute.xlu0 %4997  ;;  %2574 = vadd.xlane.f32.xlu1 %v5100_v36 }
0x1043   :  { %5109 = vpow2.f32 %v2544_v23  ;;  %v5000_v38 = vunpack.i.h.bf16 %v4998_v37  ;;  %v4999_v40 = vunpack.i.l.bf16 %v4998_v37 }
0x1044   :  { %5111 = vpow2.f32 %v2538_v1 }
0x1045   :  { %v5102_v42 = vpop.eup %5101  ;;  %v4766_v32 = vpack.c.bf16 %v5000_v38, %v4999_v40 }
0x1046   :  { %2572 = vadd.xlane.f32.xlu0 %v5102_v42 }
0x1047   :  { %4767 = vmatprep.subr.bf16.mxu0 %v4766_v32 }
0x1048   :  { %4769 = vmatpush3.bf16.msra.mxu0 %v4766_v32 }
0x1049   :  { %v5104_v44 = vpop.eup %5103  ;;  %4496 = vmatprep.subr.mxu0 %v3896_v58 }
0x104a   :  { %v5106_v56 = vpop.eup %5105  ;;  %2578 = vadd.xlane.f32.xlu1 %v5104_v44 }
0x104b   :  { %v5108_v5 = vpop.eup %5107  ;;  %4473 = vmatmul.mubr.f32.vlgmr.msra.gmra.mrb[28].mxu0 %v5106_v56 }
0x104c   :  { %4475 = vmatprep.mubr.f32.mxu0 %v5108_v5  ;;  %4497 = vmatpush3.msra.mxu0 %v3896_v58 }
0x104d   :  { %v5110_v12 = vpop.eup %5109  ;;  %4504 = vmatprep.subr.mxu0 %v3895_v46 }
0x104e   :  { %v5112_v53 = vpop.eup %5111  ;;  %2576 = vadd.xlane.f32.xlu0 %v5110_v12  ;;  %2566 = vadd.xlane.f32.xlu1 %v5106_v56 }
0x104f   :  { %4476 = vmatmul.mubr.f32.gmra.mrb[30].mxu0 %v5112_v53 }
0x1050   :  { %4478 = vmatprep.mubr.f32.mxu0 %v5102_v42  ;;  %v3905_v42 = vld [vmem:[%s6669_s8 + $0x30] sm:$0xff] }
0x1052   :  { %2564 = vadd.xlane.f32.xlu0 %v5098_v6  ;;  %2570 = vadd.xlane.f32.xlu1 %v5112_v53 }
0x1053   :  { %4479 = vmatmul.mubr.f32.gmra.mrb[32].mxu0 %v5100_v36 }
0x1054   :  { %4481 = vmatprep.mubr.f32.mxu0 %v5110_v12 }
0x1056   :  { %2568 = vadd.xlane.f32.xlu0 %v5108_v5 }
0x1057   :  { %4482 = vmatmul.mubr.f32.gmra.mrb[34].mxu0 %v5104_v44 }
0x1067   :  { %v2501_v59 = vpop.xlane.xlu1 %2500 }
0x1068   :  { %v2524_v63 = vsub.f32 %v6483_v10, %v2501_v59 }
0x106a   :  { %v2548_v0 = vmul.f32 1.442695, %v2524_v63 }
0x106b   :  { %v2507_v3 = vpop.xlane.xlu1 %2506 }
0x106c   :  { %5113 = vpow2.f32 %v2548_v0  ;;  %v2527_v11 = vsub.f32 %v6489_v45, %v2507_v3 }
0x106e   :  { %v2554_v10 = vmul.f32 1.442695, %v2527_v11 }
0x106f   :  { %v2505_v43 = vpop.xlane.xlu1 %2504 }
0x1070   :  { %v2526_v9 = vsub.f32 %v6495_v25, %v2505_v43 }
0x1072   :  { %v2552_v21 = vmul.f32 1.442695, %v2526_v9  ;;  %v3910_v9 = vld [vmem:[%s6669_s8 + $0x38] sm:$0xff] }
0x1073   :  { %v2503_v50 = vpop.xlane.xlu0 %2502  ;;  %v2509_v17 = vpop.xlane.xlu1 %2508 }
0x1074   :  { %5115 = vpow2.f32 %v2552_v21  ;;  %v2525_v54 = vsub.f32 %v6501_v13, %v2503_v50  ;;  %v2528_v33 = vsub.f32 %v6506_v16, %v2509_v17 }
0x1076   :  { %v5114_v49 = vpop.eup %5113  ;;  %v2550_v48 = vmul.f32 1.442695, %v2525_v54  ;;  %v2556_v62 = vmul.f32 1.442695, %v2528_v33 }
0x1077   :  { %v2513_v8 = vpop.xlane.xlu0 %2512  ;;  %2580 = vadd.xlane.f32.xlu0 %v5114_v49  ;;  %v2511_v18 = vpop.xlane.xlu1 %2510  ;;  %4484 = vmatprep.mubr.f32.mxu0 %v5114_v49 }
0x1078   :  { %5117 = vpow2.f32 %v2550_v48  ;;  %v2530_v25 = vsub.f32 %v6518_v57, %v2513_v8  ;;  %v2529_v45 = vsub.f32 %v6513_v30, %v2511_v18 }
0x1079   :  { %5119 = vpow2.f32 %v2556_v62 }
0x107a   :  { %v2560_v22 = vmul.f32 1.442695, %v2530_v25  ;;  %5121 = vpow2.f32 %v2554_v10  ;;  %v2558_v13 = vmul.f32 1.442695, %v2529_v45 }
0x107b   :  { %v2515_v26 = vpop.xlane.xlu1 %2514 }
0x107c   :  { %5123 = vpow2.f32 %v2560_v22  ;;  %v2531_v16 = vsub.f32 %v6525_v41, %v2515_v26 }
0x107d   :  { %5125 = vpow2.f32 %v2558_v13 }
0x107e   :  { %v5116_v14 = vpop.eup %5115  ;;  %v2562_v29 = vmul.f32 1.442695, %v2531_v16 }
0x107f   :  { %2584 = vadd.xlane.f32.xlu0 %v5116_v14 }
0x1080   :  { %5127 = vpow2.f32 %v2562_v29 }
0x1082   :  { %v5118_v20 = vpop.eup %5117 }
0x1083   :  { %v5120_v31 = vpop.eup %5119  ;;  %2582 = vadd.xlane.f32.xlu1 %v5118_v20  ;;  %4485 = vmatmul.mubr.f32.gmra.mrb[36].mxu0 %v5118_v20 }
0x1084   :  { %2588 = vadd.xlane.f32.xlu0 %v5120_v31  ;;  %4487 = vmatprep.mubr.f32.mxu0 %v5116_v14  ;;  %v5122_v30 = vpop.eup %5121 }
0x1086   :  { %v5124_v57 = vpop.eup %5123 }
0x1087   :  { %2586 = vadd.xlane.f32.xlu1 %v5122_v30  ;;  %4488 = vmatmul.mubr.f32.gmra.mrb[38].mxu0 %v5122_v30  ;;  %v5126_v34 = vpop.eup %5125 }
0x1088   :  { %2592 = vadd.xlane.f32.xlu0 %v5124_v57  ;;  %4490 = vmatprep.mubr.f32.mxu0 %v5120_v31 }
0x108a   :  { %v5128_v41 = vpop.eup %5127 }
0x108b   :  { %2590 = vadd.xlane.f32.xlu1 %v5126_v34  ;;  %4491 = vmatmul.mubr.f32.gmra.mrb[40].mxu0 %v5126_v34 }
0x108c   :  { %4493 = vmatprep.mubr.f32.mxu0 %v5124_v57 }
0x108f   :  { %2594 = vadd.xlane.f32.xlu1 %v5128_v41  ;;  %4494 = vmatmul.mubr.f32.gmra.mrb[42].mxu0 %v5128_v41 }
0x10cf   :  { %v2575_v4 = vpop.xlane.xlu1 %2574 }
0x10d3   :  { %v2573_v52 = vpop.xlane.xlu0 %2572 }
0x10d4   :  { %5129 = vrcp.f32 %v2573_v52 }
0x10d5   :  { %5131 = vrcp.f32 %v2575_v4 }
0x10d7   :  { %v2579_v15 = vpop.xlane.xlu1 %2578 }
0x10db   :  { %v2577_v51 = vpop.xlane.xlu0 %2576  ;;  %v2567_v61 = vpop.xlane.xlu1 %2566 }
0x10dc   :  { %5133 = vrcp.f32 %v2577_v51 }
0x10dd   :  { %5135 = vrcp.f32 %v2579_v15 }
0x10de   :  { %v5130_v47 = vpop.eup %5129 }
0x10df   :  { %v2565_v6 = vpop.xlane.xlu0 %2564  ;;  %v2571_v1 = vpop.xlane.xlu1 %2570 }
0x10e0   :  { %5137 = vrcp.f32 %v2565_v6  ;;  %v5132_v36 = vpop.eup %5131 }
0x10e1   :  { %5139 = vrcp.f32 %v2567_v61  ;;  %v3915_v61 = vld [vmem:[#allocation12 + $0x1] ss:$0 sm:$0xff] }
0x10e3   :  { %v2569_v24 = vpop.xlane.xlu0 %2568 }
0x10e4   :  { %5141 = vrcp.f32 %v2569_v24 }
0x10e5   :  { %5143 = vrcp.f32 %v2571_v1 }
0x10e6   :  { %v5134_v32 = vpop.eup %5133 }
0x10e7   :  { %v5136_v56 = vpop.eup %5135 }
0x10ea   :  { %v5138_v12 = vpop.eup %5137 }
0x10eb   :  { %v5140_v63 = vpop.eup %5139 }
0x10ee   :  { %v5142_v0 = vpop.eup %5141 }
0x10ef   :  { %v5144_v21 = vpop.eup %5143 }
0x1104   :  { %v2581_v17 = vpop.xlane.xlu0 %2580 }
0x1105   :  { %5145 = vrcp.f32 %v2581_v17 }
0x110c   :  { %v2585_v54 = vpop.xlane.xlu0 %2584 }
0x110f   :  { %v5146_v8 = vpop.eup %5145 }
0x1110   :  { %v2583_v50 = vpop.xlane.xlu1 %2582 }
0x1111   :  { %5147 = vrcp.f32 %v2583_v50  ;;  %v2589_v49 = vpop.xlane.xlu0 %2588 }
0x1112   :  { %5149 = vrcp.f32 %v2585_v54 }
0x1114   :  { %v2587_v33 = vpop.xlane.xlu1 %2586 }
0x1115   :  { %5151 = vrcp.f32 %v2587_v33  ;;  %v2593_v62 = vpop.xlane.xlu0 %2592 }
0x1116   :  { %5153 = vrcp.f32 %v2589_v49 }
0x1118   :  { %v2591_v48 = vpop.xlane.xlu1 %2590 }
0x1119   :  { %5155 = vrcp.f32 %v2591_v48 }
0x111a   :  { %5157 = vrcp.f32 %v2593_v62 }
0x111b   :  { %v5148_v45 = vpop.eup %5147 }
0x111c   :  { %v2595_v18 = vpop.xlane.xlu1 %2594  ;;  %v5150_v16 = vpop.eup %5149 }
0x111d   :  { %5159 = vrcp.f32 %v2595_v18  ;;  %v3321_v18 = vld [vmem:[#allocation17 + $0x38] sm:$0xff] }
0x111e   :  { %v4474_v60 = vpop.f32.mrb[28].mxu0 }
0x111f   :  { %v2710_v55 = vpop.f32.mrb[29].mxu0  ;;  %v2806_v3 = vmul.f32 %v5140_v63, %v4474_v60  ;;  %v5152_v29 = vpop.eup %5151 }
0x1120   :  { %v2805_v59 = vmul.f32 %v5138_v12, %v2710_v55  ;;  %v5154_v57 = vpop.eup %5153 }
0x1122   :  { %v4477_v2 = vpop.f32.mrb[30].mxu0 }
0x1123   :  { %v2720_v39 = vpop.f32.mrb[31].mxu0  ;;  %v2808_v11 = vmul.f32 %v5144_v21, %v4477_v2  ;;  %v5156_v41 = vpop.eup %5155 }
0x1124   :  { %v2807_v43 = vmul.f32 %v5142_v0, %v2720_v39  ;;  %v5158_v4 = vpop.eup %5157 }
0x1126   :  { %v4480_v19 = vpop.f32.mrb[32].mxu0 }
0x1127   :  { %v2730_v23 = vpop.f32.mrb[33].mxu0  ;;  %v2810_v38 = vmul.f32 %v5132_v36, %v4480_v19  ;;  %v5160_v15 = vpop.eup %5159 }
0x1128   :  { %v2809_v37 = vmul.f32 %v5130_v47, %v2730_v23 }
0x112a   :  { %v4483_v40 = vpop.f32.mrb[34].mxu0  ;;  %4498 = vmatprep.mubr.msk.f32.mxu0 %vm672_vm6, %v2809_v37 }
0x112b   :  { %v2740_v44 = vpop.f32.mrb[35].mxu0  ;;  %4499 = vmatmul.mubr.msk.f32.vlgmr.msra.gmra.mrb[44].mxu0 %vm672_vm6, %v2810_v38  ;;  %v2812_v53 = vmul.f32 %v5136_v56, %v4483_v40 }
0x112c   :  { %v2811_v5 = vmul.f32 %v5134_v32, %v2740_v44  ;;  %4505 = vmatpush3.msra.mxu0 %v3895_v46  ;;  %v3318_v32 = vld [vmem:[#allocation17 + $0x20] sm:$0xff]  ;;  %v3319_v44 = vld [vmem:[#allocation17 + $0x28] sm:$0xff] }
0x112d   :  { %4512 = vmatprep.subr.mxu0 %v3905_v42 }
0x112e   :  { %4501 = vmatprep.mubr.msk.f32.mxu0 %vm672_vm6, %v2811_v5 }
0x112f   :  { %4502 = vmatmul.mubr.msk.f32.gmra.mrb[46].mxu0 %vm672_vm6, %v2812_v53 }
0x1130   :  { %4506 = vmatprep.mubr.msk.f32.mxu0 %vm672_vm6, %v2805_v59 }
0x1133   :  { %4507 = vmatmul.mubr.msk.f32.vlgmr.msra.gmra.mrb[44].mxu0 %vm672_vm6, %v2806_v3 }
0x1134   :  { %4509 = vmatprep.mubr.msk.f32.mxu0 %vm672_vm6, %v2807_v43  ;;  %4513 = vmatpush3.msra.mxu0 %v3905_v42 }
0x1135   :  { %4520 = vmatprep.subr.mxu0 %v3910_v9 }
0x1137   :  { %4510 = vmatmul.mubr.msk.f32.gmra.mrb[46].mxu0 %vm672_vm6, %v2808_v11 }
0x1156   :  { %v4486_v10 = vpop.f32.mrb[36].mxu0 }
0x1157   :  { %v2750_v25 = vpop.f32.mrb[37].mxu0  ;;  %v2814_v26 = vmul.f32 %v5148_v45, %v4486_v10 }
0x1158   :  { %v2813_v22 = vmul.f32 %v5146_v8, %v2750_v25  ;;  %v3320_v8 = vld [vmem:[#allocation17 + $0x30] sm:$0xff] }
0x1159   :  { %v4774_v25 = vpack.c.bf16 %v3321_v18, %v3320_v8 }
0x115a   :  { %v4489_v13 = vpop.f32.mrb[38].mxu0  ;;  %4514 = vmatprep.mubr.msk.f32.mxu0 %vm672_vm6, %v2813_v22 }
0x115b   :  { %v2760_v14 = vpop.f32.mrb[39].mxu0  ;;  %4515 = vmatmul.mubr.msk.f32.vlgmr.msra.gmra.mrb[44].mxu0 %vm672_vm6, %v2814_v26  ;;  %v2816_v31 = vmul.f32 %v5152_v29, %v4489_v13 }
0x115c   :  { %v2815_v20 = vmul.f32 %v5150_v16, %v2760_v14  ;;  %4521 = vmatpush3.msra.mxu0 %v3910_v9 }
0x115e   :  { %v4492_v30 = vpop.f32.mrb[40].mxu0  ;;  %4517 = vmatprep.mubr.msk.f32.mxu0 %vm672_vm6, %v2815_v20 }
0x115f   :  { %v2770_v34 = vpop.f32.mrb[41].mxu0  ;;  %4518 = vmatmul.mubr.msk.f32.gmra.mrb[46].mxu0 %vm672_vm6, %v2816_v31  ;;  %v2818_v46 = vmul.f32 %v5156_v41, %v4492_v30 }
0x1160   :  { %v2817_v58 = vmul.f32 %v5154_v57, %v2770_v34 }
0x1162   :  { %v4495_v52 = vpop.f32.mrb[42].mxu0  ;;  %4522 = vmatprep.mubr.msk.f32.mxu0 %vm672_vm6, %v2817_v58  ;;  %v3916_v58 = vld [vmem:[#allocation14 + $0x1] ss:$0 sm:$0xff] }
0x1163   :  { %v2780_v51 = vpop.f32.mrb[43].mxu0  ;;  %4523 = vmatmul.mubr.msk.f32.vlgmr.msra.gmra.mrb[44].mxu0 %vm672_vm6, %v2818_v46  ;;  %v2820_v60 = vmul.f32 %v5160_v15, %v4495_v52 }
0x1164   :  { %v2819_v6 = vmul.f32 %v5158_v4, %v2780_v51  ;;  %v3917_v51 = vld [vmem:[#allocation15 + $0x1] ss:$0 sm:$0xff] }
0x1166   :  { %4525 = vmatprep.mubr.msk.f32.mxu0 %vm672_vm6, %v2819_v6 }
0x1167   :  { %4526 = vmatmul.mubr.msk.f32.gmra.mrb[46].mxu0 %vm672_vm6, %v2820_v60 }
0x1236   :  { %v4524_v55 = vpop.f32.mrb[44].mxu0 }
0x1237   :  { %v3226_v2 = vadd.f32 %v4524_v55, %v6231_v27  ;;  %v3202_v39 = vpop.f32.mrb[45].mxu0 }
0x1238   :  { %v3225_v24 = vadd.f32 %v3202_v39, %v6234_v28 }
0x1239   :  { %v6572_v19 = vadd.f32 %v3915_v61, %v3226_v2 }
0x123a   :  { %v6574_v47 = vadd.f32 %v3915_v61, %v3225_v24  ;;  %v4527_v1 = vpop.f32.mrb[46].mxu0 }
0x123b   :  { %v3228_v23 = vadd.f32 %v4527_v1, %v6241_v35  ;;  %v3212_v36 = vpop.f32.mrb[47].mxu0  ;;  %v3248_v37 = vsel %vm369_vm4, %v6572_v19, 0.0 }
0x123c   :  { %v3227_v38 = vadd.f32 %v3212_v36, %v6244_v7  ;;  %3249 = vadd.xlane.f32.xlu1 %v3248_v37  ;;  %v3245_v27 = vsel %vm369_vm4, %v6574_v47, 0.0  ;;  %v4770_v7 = vpack.c.bf16 %v3319_v44, %v3318_v32  ;;  %v3926_v32 = vld [vmem:[%s6675_s14 + $0x40] sm:$0xff] }
0x123d   :  { %v6582_v40 = vadd.f32 %v3915_v61, %v3228_v23  ;;  %3246 = vadd.xlane.f32.xlu0 %v3245_v27  ;;  %v3924_v27 = vld [vmem:[%s6675_s14 + $0x30] sm:$0xff] }
0x123e   :  { %v6584_v28 = vadd.f32 %v3915_v61, %v3227_v38  ;;  %4771 = vmatprep.subr.bf16.mxu1 %v4770_v7  ;;  %v3923_v38 = vld [vmem:[%s6675_s14 + $0x28] sm:$0xff] }
0x123f   :  { %v3254_v42 = vsel %vm369_vm4, %v6582_v40, 0.0  ;;  %4773 = vmatpush3.bf16.msra.mxu1 %v4770_v7  ;;  %v3927_v7 = vld [vmem:[%s6675_s14 + $0x48] sm:$0xff] }
0x1240   :  { %3255 = vadd.xlane.f32.xlu1 %v3254_v42  ;;  %v3251_v35 = vsel %vm369_vm4, %v6584_v28, 0.0  ;;  %4775 = vmatprep.subr.bf16.mxu1 %v4774_v25  ;;  %v4778_v42 = vpack.c.bf16 %v3924_v27, %v3923_v38 }
0x1241   :  { %3252 = vadd.xlane.f32.xlu0 %v3251_v35  ;;  %v3925_v35 = vld [vmem:[%s6675_s14 + $0x38] sm:$0xff] }
0x1242   :  { %4779 = vmatprep.subr.bf16.mxu0 %v4778_v42  ;;  %v4782_v44 = vpack.c.bf16 %v3926_v32, %v3925_v35 }
0x1243   :  { %4777 = vmatpush3.bf16.msra.mxu1 %v4774_v25  ;;  %4781 = vmatpush3.bf16.msra.mxu0 %v4778_v42 }
0x1244   :  { %4783 = vmatprep.subr.bf16.mxu0 %v4782_v44 }
0x1247   :  { %4785 = vmatpush3.bf16.msra.mxu0 %v4782_v44 }
0x1248   :  { %4550 = vmatprep.subr.mxu0 %v3927_v7 }
0x124b   :  { %4551 = vmatpush3.msra.mxu0 %v3927_v7 }
0x12c9   :  { %v3250_v56 = vpop.xlane.xlu1 %3249 }
0x12ca   :  { %v3258_v5 = vmul.f32 0.03125, %v3250_v56  ;;  %v3247_v12 = vpop.xlane.xlu0 %3246  ;;  %v3918_v56 = vld [vmem:[#allocation18 + $0x1] ss:$0 sm:$0xff] }
0x12cb   :  { %v3257_v53 = vmul.f32 0.03125, %v3247_v12 }
0x12cc   :  { %v3262_v59 = vsub.f32 %v6572_v19, %v3258_v5 }
0x12cd   :  { %v3261_v63 = vsub.f32 %v6574_v47, %v3257_v53  ;;  %v3256_v0 = vpop.xlane.xlu1 %3255 }
0x12ce   :  { %v3260_v3 = vmul.f32 0.03125, %v3256_v0  ;;  %v3253_v43 = vpop.xlane.xlu0 %3252  ;;  %v3266_v9 = vmul.f32 %v3262_v59, %v3262_v59 }
0x12cf   :  { %v3259_v21 = vmul.f32 0.03125, %v3253_v43  ;;  %v3265_v11 = vmul.f32 %v3261_v63, %v3261_v63 }
0x12d0   :  { %v3264_v50 = vsub.f32 %v6582_v40, %v3260_v3  ;;  %v3272_v17 = vsel %vm369_vm4, %v3266_v9, 0.0 }
0x12d1   :  { %v3263_v54 = vsub.f32 %v6584_v28, %v3259_v21  ;;  %3273 = vadd.xlane.f32.xlu1 %v3272_v17  ;;  %v3269_v33 = vsel %vm369_vm4, %v3265_v11, 0.0 }
0x12d2   :  { %3270 = vadd.xlane.f32.xlu0 %v3269_v33  ;;  %v3268_v49 = vmul.f32 %v3264_v50, %v3264_v50 }
0x12d3   :  { %v3267_v48 = vmul.f32 %v3263_v54, %v3263_v54 }
0x12d4   :  { %v3278_v62 = vsel %vm369_vm4, %v3268_v49, 0.0 }
0x12d5   :  { %3279 = vadd.xlane.f32.xlu1 %v3278_v62  ;;  %v3275_v10 = vsel %vm369_vm4, %v3267_v48, 0.0 }
0x12d6   :  { %3276 = vadd.xlane.f32.xlu0 %v3275_v10 }
0x135e   :  { %v3274_v45 = vpop.xlane.xlu1 %3273 }
0x135f   :  { %v3282_v22 = vmul.f32 0.03125, %v3274_v45  ;;  %v3271_v26 = vpop.xlane.xlu0 %3270 }
0x1360   :  { %v3281_v13 = vmul.f32 0.03125, %v3271_v26 }
0x1361   :  { %v3286_v16 = vadd.f32 1e-06, %v3282_v22 }
0x1362   :  { %v3285_v14 = vadd.f32 1e-06, %v3281_v13  ;;  %v3280_v29 = vpop.xlane.xlu1 %3279 }
0x1363   :  { %5161 = vrsqrt.f32 %v3286_v16  ;;  %v3284_v20 = vmul.f32 0.03125, %v3280_v29  ;;  %v3277_v31 = vpop.xlane.xlu0 %3276 }
0x1364   :  { %5163 = vrsqrt.f32 %v3285_v14  ;;  %v3283_v30 = vmul.f32 0.03125, %v3277_v31 }
0x1365   :  { %v3288_v57 = vadd.f32 1e-06, %v3284_v20 }
0x1366   :  { %v3287_v34 = vadd.f32 1e-06, %v3283_v30 }
0x1367   :  { %5165 = vrsqrt.f32 %v3288_v57 }
0x1368   :  { %5167 = vrsqrt.f32 %v3287_v34 }
0x136d   :  { %v5162_v41 = vpop.eup %5161 }
0x136e   :  { %v5164_v46 = vpop.eup %5163  ;;  %v3294_v52 = vmul.f32 %v5162_v41, %v3262_v59 }
0x136f   :  { %v3293_v4 = vmul.f32 %v5164_v46, %v3261_v63 }
0x1370   :  { %v3304_v15 = vmul.f32 %v3916_v58, %v3294_v52 }
0x1371   :  { %v5166_v6 = vpop.eup %5165  ;;  %v3303_v60 = vmul.f32 %v3916_v58, %v3293_v4 }
0x1372   :  { %v5168_v55 = vpop.eup %5167  ;;  %v3296_v61 = vmul.f32 %v5166_v6, %v3264_v50  ;;  %v3314_v24 = vadd.f32 %v3917_v51, %v3304_v15 }
0x1373   :  { %v3313_v2 = vadd.f32 %v3917_v51, %v3303_v60  ;;  %v3295_v39 = vmul.f32 %v5168_v55, %v3263_v54 }
0x1374   :  { %v3306_v1 = vmul.f32 %v3916_v58, %v3296_v61  ;;  %v3928_v61 = vld [vmem:[#allocation20 + $0x1] ss:$0 sm:$0xff] }
0x1375   :  { %4536 = vmatprep.mubr.msk.f32.mxu1 %vm369_vm4, %v3313_v2  ;;  %v3305_v23 = vmul.f32 %v3916_v58, %v3295_v39 }
0x1376   :  { %4537 = vmatmul.mubr.msk.f32.vlgmr.msra.gmra.mrb[44].mxu1 %vm369_vm4, %v3314_v24  ;;  %v3316_v37 = vadd.f32 %v3917_v51, %v3306_v1 }
0x1377   :  { %v3315_v36 = vadd.f32 %v3917_v51, %v3305_v23 }
0x1379   :  { %4539 = vmatprep.mubr.msk.f32.mxu1 %vm369_vm4, %v3315_v36 }
0x137a   :  { %4540 = vmatmul.mubr.msk.f32.gmra.mrb[46].mxu1 %vm369_vm4, %v3316_v37 }
0x1449   :  { %v4538_v5 = vpop.f32.mrb[44].mxu1 }
0x144a   :  { %v3414_v12 = vadd.f32 %v4538_v5, %v3918_v56  ;;  %v3408_v53 = vpop.f32.mrb[45].mxu1 }
0x144b   :  { %v3409_v59 = vadd.f32 %v3918_v56, %v3408_v53 }
0x144c   :  { %v3432_v63 = vmul.f32 0.044715, %v3414_v12  ;;  %v3428_v34 = vmul.f32 0.5, %v3414_v12 }
0x144d   :  { %v3431_v0 = vmul.f32 0.044715, %v3409_v59  ;;  %v4541_v3 = vpop.f32.mrb[46].mxu1  ;;  %v3427_v30 = vmul.f32 0.5, %v3409_v59 }
0x144e   :  { %v3436_v43 = vmul.f32 %v3432_v63, %v3414_v12  ;;  %v3424_v9 = vadd.f32 %v4541_v3, %v3918_v56  ;;  %v3418_v21 = vpop.f32.mrb[47].mxu1 }
0x144f   :  { %v3435_v11 = vmul.f32 %v3431_v0, %v3409_v59  ;;  %v3419_v50 = vadd.f32 %v3918_v56, %v3418_v21 }
0x1450   :  { %v3440_v17 = vmul.f32 %v3436_v43, %v3414_v12  ;;  %v3434_v54 = vmul.f32 0.044715, %v3424_v9  ;;  %v3430_v6 = vmul.f32 0.5, %v3424_v9 }
0x1451   :  { %v3439_v33 = vmul.f32 %v3435_v11, %v3409_v59  ;;  %v3433_v49 = vmul.f32 0.044715, %v3419_v50  ;;  %v3429_v51 = vmul.f32 0.5, %v3419_v50 }
0x1452   :  { %v3444_v48 = vadd.f32 %v3440_v17, %v3414_v12  ;;  %v3438_v62 = vmul.f32 %v3434_v54, %v3424_v9 }
0x1453   :  { %v3443_v10 = vadd.f32 %v3439_v33, %v3409_v59  ;;  %v3437_v8 = vmul.f32 %v3433_v49, %v3419_v50 }
0x1454   :  { %v3448_v18 = vmul.f32 0.7978846, %v3444_v48  ;;  %v3442_v25 = vmul.f32 %v3438_v62, %v3424_v9  ;;  %v3652_v62 = vld [vmem:[%s6679_s18] sm:$0xff] }
0x1455   :  { %v3441_v45 = vmul.f32 %v3437_v8, %v3419_v50  ;;  %v3447_v22 = vmul.f32 0.7978846, %v3443_v10  ;;  %v3653_v10 = vld [vmem:[%s6679_s18 + $0x8] sm:$0xff] }
0x1456   :  { %5169 = vtanh.f32 %v3448_v18  ;;  %v3446_v26 = vadd.f32 %v3442_v25, %v3424_v9  ;;  %v4786_v8 = vpack.c.bf16 %v3653_v10, %v3652_v62  ;;  %v3654_v18 = vld [vmem:[%s6679_s18 + $0x10] sm:$0xff]  ;;  %v3655_v25 = vld [vmem:[%s6679_s18 + $0x18] sm:$0xff] }
0x1457   :  { %v3445_v13 = vadd.f32 %v3441_v45, %v3419_v50  ;;  %5171 = vtanh.f32 %v3447_v22  ;;  %v4790_v45 = vpack.c.bf16 %v3655_v25, %v3654_v18 }
0x1458   :  { %v3450_v16 = vmul.f32 0.7978846, %v3446_v26  ;;  %4787 = vmatprep.subr.bf16.mxu1 %v4786_v8 }
0x1459   :  { %v3449_v14 = vmul.f32 0.7978846, %v3445_v13  ;;  %4789 = vmatpush3.bf16.msra.mxu1 %v4786_v8 }
0x145a   :  { %5173 = vtanh.f32 %v3450_v16  ;;  %4791 = vmatprep.subr.bf16.mxu1 %v4790_v45 }
0x145b   :  { %5175 = vtanh.f32 %v3449_v14 }
0x145d   :  { %4793 = vmatpush3.bf16.msra.mxu1 %v4790_v45 }
0x1460   :  { %v5170_v29 = vpop.eup %5169 }
0x1461   :  { %v5172_v20 = vpop.eup %5171  ;;  %v3456_v31 = vadd.f32 1.0, %v5170_v29 }
0x1462   :  { %v3455_v57 = vadd.f32 1.0, %v5172_v20 }
0x1463   :  { %v3460_v52 = vmul.f32 %v3456_v31, %v3428_v34 }
0x1464   :  { %v5174_v41 = vpop.eup %5173  ;;  %v3459_v58 = vmul.f32 %v3455_v57, %v3427_v30 }
0x1465   :  { %v5176_v46 = vpop.eup %5175  ;;  %v3458_v4 = vadd.f32 1.0, %v5174_v41 }
0x1466   :  { %4552 = vmatprep.mubr.msk.f32.mxu0 %vm1867_vm8, %v3459_v58  ;;  %v3457_v15 = vadd.f32 1.0, %v5176_v46  ;;  %v3933_v46 = vld [vmem:[#allocation21] ss:$0 sm:$0xff] }
0x1467   :  { %4553 = vmatmul.mubr.msk.f32.vlgmr.msra.gmra.mrb[48].mxu0 %vm1867_vm8, %v3460_v52  ;;  %v3462_v55 = vmul.f32 %v3458_v4, %v3430_v6 }
0x1468   :  { %v3461_v60 = vmul.f32 %v3457_v15, %v3429_v51  ;;  %v3934_v15 = vld [vmem:[#allocation23] ss:$0 sm:$0xff] }
0x146a   :  { %4555 = vmatprep.mubr.msk.f32.mxu0 %vm1867_vm8, %v3461_v60 }
0x146b   :  { %4556 = vmatmul.mubr.msk.f32.gmra.mrb[50].mxu0 %vm1867_vm8, %v3462_v55 }
0x153a   :  { %v4554_v2 = vpop.f32.mrb[48].mxu0 }
0x153b   :  { %v3561_v39 = vadd.f32 %v4554_v2, %v3928_v61  ;;  %v3555_v24 = vpop.f32.mrb[49].mxu0 }
0x153c   :  { %v3556_v1 = vadd.f32 %v3928_v61, %v3555_v24 }
0x153d   :  { %v3575_v23 = vadd.f32 %v3561_v39, %v6572_v19 }
0x153e   :  { %v3574_v36 = vadd.f32 %v3556_v1, %v6574_v47  ;;  %v4557_v37 = vpop.f32.mrb[50].mxu0 }
0x153f   :  { %v3571_v38 = vadd.f32 %v4557_v37, %v3928_v61  ;;  %v3565_v27 = vpop.f32.mrb[51].mxu0  ;;  %v3583_v42 = vsel %vm369_vm4, %v3575_v23, 0.0 }
0x1540   :  { %v3566_v35 = vadd.f32 %v3928_v61, %v3565_v27  ;;  %3584 = vadd.xlane.f32.xlu1 %v3583_v42  ;;  %v3580_v32 = vsel %vm369_vm4, %v3574_v36, 0.0  ;;  %v3935_v27 = vld [vmem:[#allocation3] ss:$0 sm:$0xff] }
0x1541   :  { %v3577_v44 = vadd.f32 %v3571_v38, %v6582_v40  ;;  %3581 = vadd.xlane.f32.xlu0 %v3580_v32 }
0x1542   :  { %v3576_v7 = vadd.f32 %v3566_v35, %v6584_v28 }
0x1543   :  { %v3589_v56 = vsel %vm369_vm4, %v3577_v44, 0.0 }
0x1544   :  { %3590 = vadd.xlane.f32.xlu1 %v3589_v56  ;;  %v3586_v19 = vsel %vm369_vm4, %v3576_v7, 0.0 }
0x1545   :  { %3587 = vadd.xlane.f32.xlu0 %v3586_v19 }
0x15cd   :  { %v3585_v47 = vpop.xlane.xlu1 %3584 }
0x15ce   :  { %v3593_v5 = vmul.f32 0.03125, %v3585_v47  ;;  %v3582_v12 = vpop.xlane.xlu0 %3581 }
0x15cf   :  { %v3592_v53 = vmul.f32 0.03125, %v3582_v12 }
0x15d0   :  { %v3597_v59 = vsub.f32 %v3575_v23, %v3593_v5 }
0x15d1   :  { %v3596_v63 = vsub.f32 %v3574_v36, %v3592_v53  ;;  %v3591_v0 = vpop.xlane.xlu1 %3590 }
0x15d2   :  { %v3595_v3 = vmul.f32 0.03125, %v3591_v0  ;;  %v3588_v43 = vpop.xlane.xlu0 %3587  ;;  %v3601_v9 = vmul.f32 %v3597_v59, %v3597_v59 }
0x15d3   :  { %v3594_v40 = vmul.f32 0.03125, %v3588_v43  ;;  %v3600_v21 = vmul.f32 %v3596_v63, %v3596_v63 }
0x15d4   :  { %v3599_v11 = vsub.f32 %v3577_v44, %v3595_v3  ;;  %v3607_v28 = vsel %vm369_vm4, %v3601_v9, 0.0 }
0x15d5   :  { %v3598_v50 = vsub.f32 %v3576_v7, %v3594_v40  ;;  %3608 = vadd.xlane.f32.xlu1 %v3607_v28  ;;  %v3604_v17 = vsel %vm369_vm4, %v3600_v21, 0.0 }
0x15d6   :  { %3605 = vadd.xlane.f32.xlu0 %v3604_v17  ;;  %v3603_v54 = vmul.f32 %v3599_v11, %v3599_v11 }
0x15d7   :  { %v3602_v33 = vmul.f32 %v3598_v50, %v3598_v50 }
0x15d8   :  { %v3613_v49 = vsel %vm369_vm4, %v3603_v54, 0.0 }
0x15d9   :  { %3614 = vadd.xlane.f32.xlu1 %v3613_v49  ;;  %v3610_v48 = vsel %vm369_vm4, %v3602_v33, 0.0 }
0x15da   :  { %3611 = vadd.xlane.f32.xlu0 %v3610_v48 }
0x1662   :  { %v3609_v22 = vpop.xlane.xlu1 %3608 }
0x1663   :  { %v3617_v26 = vmul.f32 0.03125, %v3609_v22  ;;  %v3606_v13 = vpop.xlane.xlu0 %3605 }
0x1664   :  { %v3616_v16 = vmul.f32 0.03125, %v3606_v13 }
0x1665   :  { %v3621_v14 = vadd.f32 1e-06, %v3617_v26 }
0x1666   :  { %v3620_v29 = vadd.f32 1e-06, %v3616_v16  ;;  %v3615_v20 = vpop.xlane.xlu1 %3614 }
0x1667   :  { %5177 = vrsqrt.f32 %v3621_v14  ;;  %v3619_v31 = vmul.f32 0.03125, %v3615_v20  ;;  %v3612_v30 = vpop.xlane.xlu0 %3611 }
0x1668   :  { %5179 = vrsqrt.f32 %v3620_v29  ;;  %v3618_v57 = vmul.f32 0.03125, %v3612_v30 }
0x1669   :  { %v3623_v34 = vadd.f32 1e-06, %v3619_v31 }
0x166a   :  { %v3622_v41 = vadd.f32 1e-06, %v3618_v57 }
0x166b   :  { %5181 = vrsqrt.f32 %v3623_v34 }
0x166c   :  { %5183 = vrsqrt.f32 %v3622_v41 }
0x1671   :  { %v5178_v58 = vpop.eup %5177 }
0x1672   :  { %v5180_v52 = vpop.eup %5179  ;;  %v3629_v4 = vmul.f32 %v5178_v58, %v3597_v59 }
0x1673   :  { %v3628_v51 = vmul.f32 %v5180_v52, %v3596_v63 }
0x1674   :  { %v3639_v6 = vmul.f32 %v3933_v46, %v3629_v4 }
0x1675   :  { %v5182_v60 = vpop.eup %5181  ;;  %v3638_v55 = vmul.f32 %v3933_v46, %v3628_v51 }
0x1676   :  { %v5184_v61 = vpop.eup %5183  ;;  %v3631_v2 = vmul.f32 %v5182_v60, %v3599_v11  ;;  %v3649_v1 = vadd.f32 %v3934_v15, %v3639_v6 }
0x1677   :  { %v3648_v39 = vadd.f32 %v3934_v15, %v3638_v55  ;;  %v3630_v24 = vmul.f32 %v5184_v61, %v3598_v50 }
0x1678   :  { %v3641_v23 = vmul.f32 %v3933_v46, %v3631_v2 }
0x1679   :  { %4566 = vmatprep.mubr.msk.f32.mxu1 %vm369_vm4, %v3648_v39  ;;  %v3640_v36 = vmul.f32 %v3933_v46, %v3630_v24 }
0x167a   :  { %4567 = vmatmul.mubr.msk.f32.vlgmr.msra.gmra.mrb[48].mxu1 %vm369_vm4, %v3649_v1  ;;  %v3651_v38 = vadd.f32 %v3934_v15, %v3641_v23 }
0x167b   :  { %v3650_v37 = vadd.f32 %v3934_v15, %v3640_v36 }
0x167d   :  { %4569 = vmatprep.mubr.msk.f32.mxu1 %vm369_vm4, %v3650_v37 }
0x167e   :  { %4570 = vmatmul.mubr.msk.f32.gmra.mrb[50].mxu1 %vm369_vm4, %v3651_v38 }
0x174d   :  { %v4568_v42 = vpop.f32.mrb[48].mxu1 }
0x174e   :  { %v3747_v35 = vadd.f32 %v4568_v42, %v3935_v27  ;;  %v3741_v32 = vpop.f32.mrb[49].mxu1 }
0x174f   :  { %v3742_v44 = vadd.f32 %v3935_v27, %v3741_v32 }
0x1750   :  { %3762 = vst.msk [vmem:[%s6701_s27 + $0x8] sm:$0xff] %vm3760_vm9, %v3747_v35 }
0x1751   :  { %3761 = vst.msk [vmem:[%s6701_s27] sm:$0xff] %vm3760_vm9, %v3742_v44  ;;  %v4571_v7 = vpop.f32.mrb[50].mxu1 }
0x1752   :  { %v3757_v56 = vadd.f32 %v4571_v7, %v3935_v27  ;;  %v3751_v19 = vpop.f32.mrb[51].mxu1 }
0x1753   :  { %v3752_v47 = vadd.f32 %v3935_v27, %v3751_v19 }
0x1754   :  { %3764 = vst.msk [vmem:[%s6701_s27 + $0x18] sm:$0xff] %vm3760_vm9, %v3757_v56 }
0x1755   :  { %3763 = vst.msk [vmem:[%s6701_s27 + $0x10] sm:$0xff] %vm3760_vm9, %v3752_v47 }
0x1756   :  { %3769 = vsyncpa [#allocation5], 1 }
0x1757   :  { %3770 = vsyncpa [#allocation7], 1 }
0x1758   :  { %3771 = vsyncpa [#allocation10], 1 }
0x1759   :  { %3772 = vsyncpa [#allocation13], 1 }
0x175a   :  { %3773 = vsyncpa [#allocation16], 1 }
0x175b   :  { %3774 = vsyncpa [#allocation19], 1 }
0x175c   :  { %3775 = vsyncpa [#allocation22], 1 }

</bundles_post_ra>
